<compile_context>
chip_gen: v5e
topology: v5e:2x2
jax: 0.10.0
libtpu: 0.0.40
codegen_flags: <defaults>
</compile_context>

<pallas_src>
from functools import partial

import jax
import jax.numpy as jnp
from jax.experimental import pallas as pl
from jax.experimental.pallas import tpu as pltpu

EPS_NORM = 1e-8    # _l2_normalize eps
SMOOTH = 1e-10     # softDiceLoss smooth


def _round_up(a, b):
    return (a + b - 1) // b * b


def _choose_tile(s):
    # lane-dense pixel tile: multiple of 128, capped at 2048 lanes.
    return min(2048, _round_up(s, 128))


# ---------------------------------------------------------------------------
# In-kernel helpers (pure VPU/EUP: no MXU, no cross-sublane reductions)
# ---------------------------------------------------------------------------
def _lane_mask(s_idx, ts, s_valid):
    col = jax.lax.broadcasted_iota(jnp.int32, (1, ts), 1)
    return (s_idx * ts + col < s_valid).astype(jnp.float32)


def _logits_rows(rows, w_ref, b_ref, head, C, K):
    """rows: list of C arrays (1, TS). Returns K arrays (1, TS) of logits."""
    zs = []
    off_w = head * C * K
    off_b = head * K
    for k in range(K):
        z = rows[0] * w_ref[off_w + k]
        for c in range(1, C):
            z = z + rows[c] * w_ref[off_w + c * K + k]
        z = z + b_ref[off_b + k]
        zs.append(z)
    return zs


def _softmax_rows(zs):
    m = zs[0]
    for z in zs[1:]:
        m = jnp.maximum(m, z)
    es = [jnp.exp(z - m) for z in zs]
    tot = es[0]
    for e in es[1:]:
        tot = tot + e
    inv = pl.reciprocal(tot, approx=True)
    return [e * inv for e in es]


# ---------------------------------------------------------------------------
# Kernel 1: per-sample sum(d*d) for the initial random perturbation
# ---------------------------------------------------------------------------
def _make_sumsq_kernel(C, TS, S, need_mask):
    def kernel(d_ref, out_ref, acc_ref):
        n = pl.program_id(0)
        s = pl.program_id(1)

        @pl.when(s == 0)
        def _init():
            acc_ref[0] = 0.0

        v = d_ref[...]
        v = v * v
        if need_mask:
            v = v * _lane_mask(s, TS, S)
        acc_ref[0] += jnp.sum(v)

        @pl.when(s == pl.num_programs(1) - 1)
        def _fin():
            out_ref[n] = acc_ref[0]

    return kernel


def _per_sample_sumsq(d, *, C, K, TS, S, n_s):
    N = d.shape[0]
    need_mask = (n_s * TS != S)
    kernel = _make_sumsq_kernel(C, TS, S, need_mask)
    return pl.pallas_call(
        kernel,
        out_shape=jax.ShapeDtypeStruct((N,), jnp.float32),
        grid_spec=pltpu.PrefetchScalarGridSpec(
            num_scalar_prefetch=0,
            grid=(N, n_s),
            in_specs=[pl.BlockSpec((None, C, TS), lambda n, s: (n, 0, s))],
            out_specs=pl.BlockSpec(memory_space=pltpu.SMEM),
            scratch_shapes=[pltpu.SMEM((1,), jnp.float32)],
        ),
        compiler_params=pltpu.CompilerParams(
            dimension_semantics=("arbitrary", "arbitrary")),
    )(d)


# ---------------------------------------------------------------------------
# Kernel 2: fused "perturb + two-head pointwise conv + softmax + dice sums"
# For each (pred_head, target_head) pair it accumulates, over the whole grid,
#   [intersect_k, z_sum_k, y_sum_k]  with p = softmax(h_pred(x + sc*d)),
#                                         t = softmax(h_tgt(x))
# Probabilities never touch HBM; sums land in a small SMEM output.
# ---------------------------------------------------------------------------
def _make_dice_sums_kernel(pairs, C, K, TS, S, need_mask):
    n_out = len(pairs) * 3 * K

    def kernel(x_ref, d_ref, sc_ref, w_ref, b_ref, out_ref, acc_ref):
        n = pl.program_id(0)
        s = pl.program_id(1)

        @pl.when(jnp.logical_and(n == 0, s == 0))
        def _init():
            for i in range(n_out):
                acc_ref[i] = 0.0

        sc = sc_ref[n]
        x_rows = [x_ref[c:c + 1, :] for c in range(C)]
        xp_rows = [x_rows[c] + sc * d_ref[c:c + 1, :] for c in range(C)]

        mask = _lane_mask(s, TS, S) if need_mask else None

        pert = {}   # softmax(h(x + sc*d))  -> "logp_hat"
        clean = {}  # softmax(h(x))         -> "pred"  (recomputed, no HBM)
        for ph, th in pairs:
            if ph not in pert:
                pert[ph] = _softmax_rows(_logits_rows(xp_rows, w_ref, b_ref, ph, C, K))
            if th not in clean:
                clean[th] = _softmax_rows(_logits_rows(x_rows, w_ref, b_ref, th, C, K))

        for pi, (ph, th) in enumerate(pairs):
            base = pi * 3 * K
            for k in range(K):
                pk = pert[ph][k]
                tk = clean[th][k]
                if need_mask:
                    pk = pk * mask
                    tk = tk * mask
                acc_ref[base + k] += jnp.sum(pk * tk)           # intersect
                acc_ref[base + K + k] += jnp.sum(pk * pk)       # z_sum
                acc_ref[base + 2 * K + k] += jnp.sum(tk * tk)   # y_sum

        @pl.when(jnp.logical_and(n == pl.num_programs(0) - 1,
                                 s == pl.num_programs(1) - 1))
        def _fin():
            for i in range(n_out):
                out_ref[i] = acc_ref[i]

    return kernel


def _dice_sums(x, d, sc, w_all, b_all, *, pairs, C, K, TS, S, n_s):
    N = x.shape[0]
    need_mask = (n_s * TS != S)
    n_out = len(pairs) * 3 * K
    kernel = _make_dice_sums_kernel(pairs, C, K, TS, S, need_mask)
    blk = pl.BlockSpec((None, C, TS), lambda n, s: (n, 0, s))
    return pl.pallas_call(
        kernel,
        out_shape=jax.ShapeDtypeStruct((n_out,), jnp.float32),
        grid_spec=pltpu.PrefetchScalarGridSpec(
            num_scalar_prefetch=0,
            grid=(N, n_s),
            in_specs=[
                blk,                                    # x   (N, C, S_pad)
                blk,                                    # d   (N, C, S_pad)
                pl.BlockSpec(memory_space=pltpu.SMEM),  # sc  (N,)
                pl.BlockSpec(memory_space=pltpu.SMEM),  # w_all (2*C*K,)
                pl.BlockSpec(memory_space=pltpu.SMEM),  # b_all (2*K,)
            ],
            out_specs=pl.BlockSpec(memory_space=pltpu.SMEM),
            scratch_shapes=[pltpu.SMEM((n_out,), jnp.float32)],
        ),
        compiler_params=pltpu.CompilerParams(
            dimension_semantics=("arbitrary", "arbitrary")),
    )(x, d, sc, w_all, b_all)


# ---------------------------------------------------------------------------
# Kernel 3: analytic backward of dice(softmax(h0(x + sc*d)), softmax(h1(x)))
# w.r.t. (x + sc*d), fused with the per-sample ||grad||^2 reduction.
# The per-class dice coefficients (from the global sums) arrive via SMEM.
# ---------------------------------------------------------------------------
def _make_vat_grad_kernel(C, K, TS, S, need_mask):
    def kernel(x_ref, d_ref, sc_ref, w_ref, b_ref, coef_ref, g_ref, gss_ref, acc_ref):
        n = pl.program_id(0)
        s = pl.program_id(1)

        @pl.when(s == 0)
        def _init():
            acc_ref[0] = 0.0

        sc = sc_ref[n]
        x_rows = [x_ref[c:c + 1, :] for c in range(C)]
        xp_rows = [x_rows[c] + sc * d_ref[c:c + 1, :] for c in range(C)]

        p = _softmax_rows(_logits_rows(xp_rows, w_ref, b_ref, 0, C, K))  # head0(x+sc*d)
        t = _softmax_rows(_logits_rows(x_rows, w_ref, b_ref, 1, C, K))   # head1(x), no grad

        # dL/dp_k = a_k * p_k + b_k * t_k
        gp = [coef_ref[k] * p[k] + coef_ref[K + k] * t[k] for k in range(K)]
        dot = gp[0] * p[0]
        for k in range(1, K):
            dot = dot + gp[k] * p[k]
        gz = [p[k] * (gp[k] - dot) for k in range(K)]    # softmax backward

        gsq = None
        for c in range(C):                               # linear backward (head 0)
            gc = gz[0] * w_ref[c * K]
            for k in range(1, K):
                gc = gc + gz[k] * w_ref[c * K + k]
            g_ref[c:c + 1, :] = gc
            gsq = gc * gc if gsq is None else gsq + gc * gc

        if need_mask:
            gsq = gsq * _lane_mask(s, TS, S)
        acc_ref[0] += jnp.sum(gsq)                       # fused ||grad||^2 per sample

        @pl.when(s == pl.num_programs(1) - 1)
        def _fin():
            gss_ref[n] = acc_ref[0]

    return kernel


def _vat_grad(x, d, sc, w_all, b_all, coef, *, C, K, TS, S, n_s):
    N, _, S_pad = x.shape
    need_mask = (n_s * TS != S)
    kernel = _make_vat_grad_kernel(C, K, TS, S, need_mask)
    blk = pl.BlockSpec((None, C, TS), lambda n, s: (n, 0, s))
    return pl.pallas_call(
        kernel,
        out_shape=(jax.ShapeDtypeStruct((N, C, S_pad), jnp.float32),
                   jax.ShapeDtypeStruct((N,), jnp.float32)),
        grid_spec=pltpu.PrefetchScalarGridSpec(
            num_scalar_prefetch=0,
            grid=(N, n_s),
            in_specs=[
                blk, blk,                               # x, d
                pl.BlockSpec(memory_space=pltpu.SMEM),  # sc
                pl.BlockSpec(memory_space=pltpu.SMEM),  # w_all
                pl.BlockSpec(memory_space=pltpu.SMEM),  # b_all
                pl.BlockSpec(memory_space=pltpu.SMEM),  # coef (2*K,)
            ],
            out_specs=(blk, pl.BlockSpec(memory_space=pltpu.SMEM)),
            scratch_shapes=[pltpu.SMEM((1,), jnp.float32)],
        ),
        compiler_params=pltpu.CompilerParams(
            # TODO(synk): the sample axis could be "parallel" (v7x megacore) if
            # the fused per-sample ||g||^2 reduction were split out.
            dimension_semantics=("arbitrary", "arbitrary")),
    )(x, d, sc, w_all, b_all, coef)


# ---------------------------------------------------------------------------
# VAT2d_v1.forward
# ---------------------------------------------------------------------------
@partial(jax.jit, static_argnames=("xi", "epi", "ip"))
def vat2d_v1(params, x, key, xi=10.0, epi=6.0, ip=1):
    w0, b0, w1, b1 = params
    N, C, H, W = x.shape
    K = w0.shape[1]
    S = H * W
    TS = _choose_tile(S)
    n_s = (S + TS - 1) // TS
    S_pad = n_s * TS
    kw = dict(C=C, K=K, TS=TS, S=S, n_s=n_s)

    xf = x.reshape(N, C, S).astype(jnp.float32)          # NCHW is already channels-first
    d = jax.random.uniform(key, (N, C, S), jnp.float32) - 0.5
    if S_pad != S:
        pad = ((0, 0), (0, 0), (0, S_pad - S))
        xf = jnp.pad(xf, pad)
        d = jnp.pad(d, pad)

    w_all = jnp.concatenate([w0.reshape(-1), w1.reshape(-1)]).astype(jnp.float32)
    b_all = jnp.concatenate([b0.reshape(-1), b1.reshape(-1)]).astype(jnp.float32)

    # ||d_n||^2 for the (deferred) per-sample l2 normalization
    ss = _per_sample_sumsq(d, **kw)

    # --- power iteration(s): d <- normalize( d/dd dice(softmax(h0(x+xi*d_hat)), pred1) )
    for _ in range(ip):
        sc = (xi / (jnp.sqrt(ss) + EPS_NORM)).astype(jnp.float32)
        sums = _dice_sums(xf, d, sc, w_all, b_all, pairs=((0, 1),), **kw)
        inter = sums[:K]
        z_sum = sums[K:2 * K]
        y_sum = sums[2 * K:3 * K]
        den = z_sum + y_sum + SMOOTH
        a = 2.0 * (2.0 * inter + SMOOTH) / (K * den * den)
        bc = -2.0 / (K * den)
        coef = jnp.concatenate([a, bc]).astype(jnp.float32)
        # TODO(synk): the xi factor of d.grad is dropped — it cancels (up to the
        # 1e-8 eps) under the subsequent per-sample l2 normalization.
        d, ss = _vat_grad(xf, d, sc, w_all, b_all, coef, **kw)

    # --- final LDS: sum over heads of softDiceLoss(softmax(h(x+epi*d_hat)), pred_h)
    sc = (epi / (jnp.sqrt(ss) + EPS_NORM)).astype(jnp.float32)
    sums = _dice_sums(xf, d, sc, w_all, b_all, pairs=((0, 0), (1, 1)), **kw)
    lds = jnp.float32(0.0)
    for pi in range(2):
        base = pi * 3 * K
        inter = sums[base:base + K]
        z_sum = sums[base + K:base + 2 * K]
        y_sum = sums[base + 2 * K:base + 3 * K]
        dice = 1.0 - (2.0 * inter + SMOOTH) / (z_sum + y_sum + SMOOTH)
        lds = lds + jnp.sum(dice) / K
    return lds


if __name__ == "__main__":
    key = jax.random.PRNGKey(0)
    k_x, k_w0, k_b0, k_w1, k_b1, k_d = jax.random.split(key, 6)

    N, C, H, W = 2, 4, 16, 16   # small NCHW input
    K = 4                       # softDiceLoss(4) -> 4 classes per head

    x = jax.random.normal(k_x, (N, C, H, W), jnp.float32)
    w0 = 0.5 * jax.random.normal(k_w0, (C, K), jnp.float32)
    b0 = 0.1 * jax.random.normal(k_b0, (K,), jnp.float32)
    w1 = 0.5 * jax.random.normal(k_w1, (C, K), jnp.float32)
    b1 = 0.1 * jax.random.normal(k_b1, (K,), jnp.float32)

    lds = vat2d_v1((w0, b0, w1, b1), x, k_d, xi=10.0, epi=6.0, ip=1)
    lds = jax.block_until_ready(lds)
    assert lds.shape == () and bool(jnp.isfinite(lds))
    print("KERNEL_OK")
</pallas_src>

<mosaic_0001>
module attributes {stable_mosaic.version = 11 : i64} {
  func.func @kernel(%arg0: i32, %arg1: i32, %arg2: memref<1x4x256xf32, #tpu.memory_space<vmem>>, %arg3: memref<2xf32, #tpu.memory_space<smem>>, %arg4: memref<1xf32, #tpu.memory_space<smem>>) attributes {dimension_semantics = [#tpu.dimension_semantics<arbitrary>, #tpu.dimension_semantics<arbitrary>], iteration_bounds = array<i64: 2, 1>, scalar_prefetch = 0 : i64, scratch_operands = 1 : i64, tpu.core_type = #tpu.core_type<tc>, window_params = [{transform_indices = @transform_0, window_bounds = array<i64: 1, 4, 256>}, {transform_indices = @transform_1, window_bounds = array<i64: 2>}]} {
    %c0_i32 = arith.constant 0 : i32
    %0 = arith.cmpi eq, %arg1, %c0_i32 : i32
    %1 = arith.extui %0 : i1 to i32
    %c0_i32_0 = arith.constant 0 : i32
    %2 = arith.cmpi ne, %1, %c0_i32_0 : i32
    scf.if %2 {
      %cst_7 = arith.constant 0.000000e+00 : f32
      %c0_8 = arith.constant 0 : index
      %16 = memref.load %arg4[%c0_8] : memref<1xf32, #tpu.memory_space<smem>>
      memref.store %cst_7, %arg4[%c0_8] : memref<1xf32, #tpu.memory_space<smem>>
    } else {
    }
    %c0 = arith.constant 0 : index
    %c0_1 = arith.constant 0 : index
    %c0_2 = arith.constant 0 : index
    %3 = vector.load %arg2[%c0, %c0_1, %c0_2] : memref<1x4x256xf32, #tpu.memory_space<vmem>>, vector<1x4x256xf32>
    %4 = vector.shape_cast %3 : vector<1x4x256xf32> to vector<4x256xf32>
    %5 = arith.mulf %4, %4 : vector<4x256xf32>
    %c0_3 = arith.constant 0 : index
    %6 = memref.load %arg4[%c0_3] : memref<1xf32, #tpu.memory_space<smem>>
    %7 = vector.shape_cast %5 : vector<4x256xf32> to vector<1x4x256xf32>
    %cst = arith.constant dense<0.000000e+00> : vector<1xf32>
    %8 = vector.multi_reduction <add>, %7, %cst [1, 2] : vector<1x4x256xf32> to vector<1xf32>
    %9 = vector.shape_cast %8 : vector<1xf32> to vector<1x1x1xf32>
    %10 = vector.extract %9[0, 0, 0] : f32 from vector<1x1x1xf32>
    %11 = arith.addf %6, %10 : f32
    %c0_4 = arith.constant 0 : index
    %12 = memref.load %arg4[%c0_4] : memref<1xf32, #tpu.memory_space<smem>>
    memref.store %11, %arg4[%c0_4] : memref<1xf32, #tpu.memory_space<smem>>
    %c0_i32_5 = arith.constant 0 : i32
    %13 = arith.cmpi eq, %arg1, %c0_i32_5 : i32
    %14 = arith.extui %13 : i1 to i32
    %c0_i32_6 = arith.constant 0 : i32
    %15 = arith.cmpi ne, %14, %c0_i32_6 : i32
    scf.if %15 {
      %c0_7 = arith.constant 0 : index
      %16 = memref.load %arg4[%c0_7] : memref<1xf32, #tpu.memory_space<smem>>
      %17 = arith.index_cast %arg0 : i32 to index
      %18 = memref.load %arg3[%17] : memref<2xf32, #tpu.memory_space<smem>>
      memref.store %16, %arg3[%17] : memref<2xf32, #tpu.memory_space<smem>>
    } else {
    }
    return
  }
  func.func @transform_0(%arg0: i32, %arg1: i32) -> (i32, i32, i32) {
    %c0_i32 = arith.constant 0 : i32
    %c0_i32_0 = arith.constant 0 : i32
    return %arg0, %c0_i32, %arg1 : i32, i32, i32
  }
  func.func @transform_1(%arg0: i32, %arg1: i32) -> i32 {
    %c0_i32 = arith.constant 0 : i32
    %c0_i32_0 = arith.constant 0 : i32
    return %c0_i32 : i32
  }
}

module attributes {stable_mosaic.version = 11 : i64} {
  func.func @kernel(%arg0: i32, %arg1: i32, %arg2: memref<1x4x256xf32, #tpu.memory_space<vmem>>, %arg3: memref<1x4x256xf32, #tpu.memory_space<vmem>>, %arg4: memref<2xf32, #tpu.memory_space<smem>>, %arg5: memref<32xf32, #tpu.memory_space<smem>>, %arg6: memref<8xf32, #tpu.memory_space<smem>>, %arg7: memref<24xf32, #tpu.memory_space<smem>>, %arg8: memref<24xf32, #tpu.memory_space<smem>>) attributes {dimension_semantics = [#tpu.dimension_semantics<arbitrary>, #tpu.dimension_semantics<arbitrary>], iteration_bounds = array<i64: 2, 1>, scalar_prefetch = 0 : i64, scratch_operands = 1 : i64, tpu.core_type = #tpu.core_type<tc>, window_params = [{transform_indices = @transform_0, window_bounds = array<i64: 1, 4, 256>}, {transform_indices = @transform_1, window_bounds = array<i64: 1, 4, 256>}, {transform_indices = @transform_2, window_bounds = array<i64: 2>}, {transform_indices = @transform_3, window_bounds = array<i64: 32>}, {transform_indices = @transform_4, window_bounds = array<i64: 8>}, {transform_indices = @transform_5, window_bounds = array<i64: 24>}]} {
    %c0_i32 = arith.constant 0 : i32
    %0 = arith.cmpi eq, %arg0, %c0_i32 : i32
    %c0_i32_0 = arith.constant 0 : i32
    %1 = arith.cmpi eq, %arg1, %c0_i32_0 : i32
    %2 = arith.andi %0, %1 : i1
    %3 = arith.extui %2 : i1 to i32
    %c0_i32_1 = arith.constant 0 : i32
    %4 = arith.cmpi ne, %3, %c0_i32_1 : i32
    scf.if %4 {
      %cst_147 = arith.constant 0.000000e+00 : f32
      %c0_148 = arith.constant 0 : index
      %596 = memref.load %arg8[%c0_148] : memref<24xf32, #tpu.memory_space<smem>>
      memref.store %cst_147, %arg8[%c0_148] : memref<24xf32, #tpu.memory_space<smem>>
      %cst_149 = arith.constant 0.000000e+00 : f32
      %c1_150 = arith.constant 1 : index
      %597 = memref.load %arg8[%c1_150] : memref<24xf32, #tpu.memory_space<smem>>
      memref.store %cst_149, %arg8[%c1_150] : memref<24xf32, #tpu.memory_space<smem>>
      %cst_151 = arith.constant 0.000000e+00 : f32
      %c2_152 = arith.constant 2 : index
      %598 = memref.load %arg8[%c2_152] : memref<24xf32, #tpu.memory_space<smem>>
      memref.store %cst_151, %arg8[%c2_152] : memref<24xf32, #tpu.memory_space<smem>>
      %cst_153 = arith.constant 0.000000e+00 : f32
      %c3_154 = arith.constant 3 : index
      %599 = memref.load %arg8[%c3_154] : memref<24xf32, #tpu.memory_space<smem>>
      memref.store %cst_153, %arg8[%c3_154] : memref<24xf32, #tpu.memory_space<smem>>
      %cst_155 = arith.constant 0.000000e+00 : f32
      %c4_156 = arith.constant 4 : index
      %600 = memref.load %arg8[%c4_156] : memref<24xf32, #tpu.memory_space<smem>>
      memref.store %cst_155, %arg8[%c4_156] : memref<24xf32, #tpu.memory_space<smem>>
      %cst_157 = arith.constant 0.000000e+00 : f32
      %c5_158 = arith.constant 5 : index
      %601 = memref.load %arg8[%c5_158] : memref<24xf32, #tpu.memory_space<smem>>
      memref.store %cst_157, %arg8[%c5_158] : memref<24xf32, #tpu.memory_space<smem>>
      %cst_159 = arith.constant 0.000000e+00 : f32
      %c6_160 = arith.constant 6 : index
      %602 = memref.load %arg8[%c6_160] : memref<24xf32, #tpu.memory_space<smem>>
      memref.store %cst_159, %arg8[%c6_160] : memref<24xf32, #tpu.memory_space<smem>>
      %cst_161 = arith.constant 0.000000e+00 : f32
      %c7_162 = arith.constant 7 : index
      %603 = memref.load %arg8[%c7_162] : memref<24xf32, #tpu.memory_space<smem>>
      memref.store %cst_161, %arg8[%c7_162] : memref<24xf32, #tpu.memory_space<smem>>
      %cst_163 = arith.constant 0.000000e+00 : f32
      %c8_164 = arith.constant 8 : index
      %604 = memref.load %arg8[%c8_164] : memref<24xf32, #tpu.memory_space<smem>>
      memref.store %cst_163, %arg8[%c8_164] : memref<24xf32, #tpu.memory_space<smem>>
      %cst_165 = arith.constant 0.000000e+00 : f32
      %c9_166 = arith.constant 9 : index
      %605 = memref.load %arg8[%c9_166] : memref<24xf32, #tpu.memory_space<smem>>
      memref.store %cst_165, %arg8[%c9_166] : memref<24xf32, #tpu.memory_space<smem>>
      %cst_167 = arith.constant 0.000000e+00 : f32
      %c10_168 = arith.constant 10 : index
      %606 = memref.load %arg8[%c10_168] : memref<24xf32, #tpu.memory_space<smem>>
      memref.store %cst_167, %arg8[%c10_168] : memref<24xf32, #tpu.memory_space<smem>>
      %cst_169 = arith.constant 0.000000e+00 : f32
      %c11_170 = arith.constant 11 : index
      %607 = memref.load %arg8[%c11_170] : memref<24xf32, #tpu.memory_space<smem>>
      memref.store %cst_169, %arg8[%c11_170] : memref<24xf32, #tpu.memory_space<smem>>
      %cst_171 = arith.constant 0.000000e+00 : f32
      %c12_172 = arith.constant 12 : index
      %608 = memref.load %arg8[%c12_172] : memref<24xf32, #tpu.memory_space<smem>>
      memref.store %cst_171, %arg8[%c12_172] : memref<24xf32, #tpu.memory_space<smem>>
      %cst_173 = arith.constant 0.000000e+00 : f32
      %c13_174 = arith.constant 13 : index
      %609 = memref.load %arg8[%c13_174] : memref<24xf32, #tpu.memory_space<smem>>
      memref.store %cst_173, %arg8[%c13_174] : memref<24xf32, #tpu.memory_space<smem>>
      %cst_175 = arith.constant 0.000000e+00 : f32
      %c14_176 = arith.constant 14 : index
      %610 = memref.load %arg8[%c14_176] : memref<24xf32, #tpu.memory_space<smem>>
      memref.store %cst_175, %arg8[%c14_176] : memref<24xf32, #tpu.memory_space<smem>>
      %cst_177 = arith.constant 0.000000e+00 : f32
      %c15_178 = arith.constant 15 : index
      %611 = memref.load %arg8[%c15_178] : memref<24xf32, #tpu.memory_space<smem>>
      memref.store %cst_177, %arg8[%c15_178] : memref<24xf32, #tpu.memory_space<smem>>
      %cst_179 = arith.constant 0.000000e+00 : f32
      %c16_180 = arith.constant 16 : index
      %612 = memref.load %arg8[%c16_180] : memref<24xf32, #tpu.memory_space<smem>>
      memref.store %cst_179, %arg8[%c16_180] : memref<24xf32, #tpu.memory_space<smem>>
      %cst_181 = arith.constant 0.000000e+00 : f32
      %c17_182 = arith.constant 17 : index
      %613 = memref.load %arg8[%c17_182] : memref<24xf32, #tpu.memory_space<smem>>
      memref.store %cst_181, %arg8[%c17_182] : memref<24xf32, #tpu.memory_space<smem>>
      %cst_183 = arith.constant 0.000000e+00 : f32
      %c18_184 = arith.constant 18 : index
      %614 = memref.load %arg8[%c18_184] : memref<24xf32, #tpu.memory_space<smem>>
      memref.store %cst_183, %arg8[%c18_184] : memref<24xf32, #tpu.memory_space<smem>>
      %cst_185 = arith.constant 0.000000e+00 : f32
      %c19_186 = arith.constant 19 : index
      %615 = memref.load %arg8[%c19_186] : memref<24xf32, #tpu.memory_space<smem>>
      memref.store %cst_185, %arg8[%c19_186] : memref<24xf32, #tpu.memory_space<smem>>
      %cst_187 = arith.constant 0.000000e+00 : f32
      %c20_188 = arith.constant 20 : index
      %616 = memref.load %arg8[%c20_188] : memref<24xf32, #tpu.memory_space<smem>>
      memref.store %cst_187, %arg8[%c20_188] : memref<24xf32, #tpu.memory_space<smem>>
      %cst_189 = arith.constant 0.000000e+00 : f32
      %c21_190 = arith.constant 21 : index
      %617 = memref.load %arg8[%c21_190] : memref<24xf32, #tpu.memory_space<smem>>
      memref.store %cst_189, %arg8[%c21_190] : memref<24xf32, #tpu.memory_space<smem>>
      %cst_191 = arith.constant 0.000000e+00 : f32
      %c22_192 = arith.constant 22 : index
      %618 = memref.load %arg8[%c22_192] : memref<24xf32, #tpu.memory_space<smem>>
      memref.store %cst_191, %arg8[%c22_192] : memref<24xf32, #tpu.memory_space<smem>>
      %cst_193 = arith.constant 0.000000e+00 : f32
      %c23_194 = arith.constant 23 : index
      %619 = memref.load %arg8[%c23_194] : memref<24xf32, #tpu.memory_space<smem>>
      memref.store %cst_193, %arg8[%c23_194] : memref<24xf32, #tpu.memory_space<smem>>
    } else {
    }
    %5 = arith.index_cast %arg0 : i32 to index
    %6 = memref.load %arg4[%5] : memref<2xf32, #tpu.memory_space<smem>>
    %c0 = arith.constant 0 : index
    %c0_2 = arith.constant 0 : index
    %c0_3 = arith.constant 0 : index
    %7 = vector.load %arg2[%c0, %c0_2, %c0_3] : memref<1x4x256xf32, #tpu.memory_space<vmem>>, vector<1x1x256xf32>
    %8 = vector.shape_cast %7 : vector<1x1x256xf32> to vector<1x256xf32>
    %c0_4 = arith.constant 0 : index
    %c1 = arith.constant 1 : index
    %c0_5 = arith.constant 0 : index
    %9 = vector.load %arg2[%c0_4, %c1, %c0_5] : memref<1x4x256xf32, #tpu.memory_space<vmem>>, vector<1x1x256xf32>
    %10 = vector.shape_cast %9 : vector<1x1x256xf32> to vector<1x256xf32>
    %c0_6 = arith.constant 0 : index
    %c2 = arith.constant 2 : index
    %c0_7 = arith.constant 0 : index
    %11 = vector.load %arg2[%c0_6, %c2, %c0_7] : memref<1x4x256xf32, #tpu.memory_space<vmem>>, vector<1x1x256xf32>
    %12 = vector.shape_cast %11 : vector<1x1x256xf32> to vector<1x256xf32>
    %c0_8 = arith.constant 0 : index
    %c3 = arith.constant 3 : index
    %c0_9 = arith.constant 0 : index
    %13 = vector.load %arg2[%c0_8, %c3, %c0_9] : memref<1x4x256xf32, #tpu.memory_space<vmem>>, vector<1x1x256xf32>
    %14 = vector.shape_cast %13 : vector<1x1x256xf32> to vector<1x256xf32>
    %c0_10 = arith.constant 0 : index
    %c0_11 = arith.constant 0 : index
    %c0_12 = arith.constant 0 : index
    %15 = vector.load %arg3[%c0_10, %c0_11, %c0_12] : memref<1x4x256xf32, #tpu.memory_space<vmem>>, vector<1x1x256xf32>
    %16 = vector.shape_cast %15 : vector<1x1x256xf32> to vector<1x256xf32>
    %17 = vector.broadcast %6 : f32 to vector<1x256xf32>
    %18 = arith.mulf %17, %16 : vector<1x256xf32>
    %19 = arith.addf %8, %18 : vector<1x256xf32>
    %c0_13 = arith.constant 0 : index
    %c1_14 = arith.constant 1 : index
    %c0_15 = arith.constant 0 : index
    %20 = vector.load %arg3[%c0_13, %c1_14, %c0_15] : memref<1x4x256xf32, #tpu.memory_space<vmem>>, vector<1x1x256xf32>
    %21 = vector.shape_cast %20 : vector<1x1x256xf32> to vector<1x256xf32>
    %22 = vector.broadcast %6 : f32 to vector<1x256xf32>
    %23 = arith.mulf %22, %21 : vector<1x256xf32>
    %24 = arith.addf %10, %23 : vector<1x256xf32>
    %c0_16 = arith.constant 0 : index
    %c2_17 = arith.constant 2 : index
    %c0_18 = arith.constant 0 : index
    %25 = vector.load %arg3[%c0_16, %c2_17, %c0_18] : memref<1x4x256xf32, #tpu.memory_space<vmem>>, vector<1x1x256xf32>
    %26 = vector.shape_cast %25 : vector<1x1x256xf32> to vector<1x256xf32>
    %27 = vector.broadcast %6 : f32 to vector<1x256xf32>
    %28 = arith.mulf %27, %26 : vector<1x256xf32>
    %29 = arith.addf %12, %28 : vector<1x256xf32>
    %c0_19 = arith.constant 0 : index
    %c3_20 = arith.constant 3 : index
    %c0_21 = arith.constant 0 : index
    %30 = vector.load %arg3[%c0_19, %c3_20, %c0_21] : memref<1x4x256xf32, #tpu.memory_space<vmem>>, vector<1x1x256xf32>
    %31 = vector.shape_cast %30 : vector<1x1x256xf32> to vector<1x256xf32>
    %32 = vector.broadcast %6 : f32 to vector<1x256xf32>
    %33 = arith.mulf %32, %31 : vector<1x256xf32>
    %34 = arith.addf %14, %33 : vector<1x256xf32>
    %c0_22 = arith.constant 0 : index
    %35 = memref.load %arg5[%c0_22] : memref<32xf32, #tpu.memory_space<smem>>
    %36 = vector.broadcast %35 : f32 to vector<1x256xf32>
    %37 = arith.mulf %19, %36 : vector<1x256xf32>
    %c4 = arith.constant 4 : index
    %38 = memref.load %arg5[%c4] : memref<32xf32, #tpu.memory_space<smem>>
    %39 = vector.broadcast %38 : f32 to vector<1x256xf32>
    %40 = arith.mulf %24, %39 : vector<1x256xf32>
    %41 = arith.addf %37, %40 : vector<1x256xf32>
    %c8 = arith.constant 8 : index
    %42 = memref.load %arg5[%c8] : memref<32xf32, #tpu.memory_space<smem>>
    %43 = vector.broadcast %42 : f32 to vector<1x256xf32>
    %44 = arith.mulf %29, %43 : vector<1x256xf32>
    %45 = arith.addf %41, %44 : vector<1x256xf32>
    %c12 = arith.constant 12 : index
    %46 = memref.load %arg5[%c12] : memref<32xf32, #tpu.memory_space<smem>>
    %47 = vector.broadcast %46 : f32 to vector<1x256xf32>
    %48 = arith.mulf %34, %47 : vector<1x256xf32>
    %49 = arith.addf %45, %48 : vector<1x256xf32>
    %c0_23 = arith.constant 0 : index
    %50 = memref.load %arg6[%c0_23] : memref<8xf32, #tpu.memory_space<smem>>
    %51 = vector.broadcast %50 : f32 to vector<1x256xf32>
    %52 = arith.addf %49, %51 : vector<1x256xf32>
    %c1_24 = arith.constant 1 : index
    %53 = memref.load %arg5[%c1_24] : memref<32xf32, #tpu.memory_space<smem>>
    %54 = vector.broadcast %53 : f32 to vector<1x256xf32>
    %55 = arith.mulf %19, %54 : vector<1x256xf32>
    %c5 = arith.constant 5 : index
    %56 = memref.load %arg5[%c5] : memref<32xf32, #tpu.memory_space<smem>>
    %57 = vector.broadcast %56 : f32 to vector<1x256xf32>
    %58 = arith.mulf %24, %57 : vector<1x256xf32>
    %59 = arith.addf %55, %58 : vector<1x256xf32>
    %c9 = arith.constant 9 : index
    %60 = memref.load %arg5[%c9] : memref<32xf32, #tpu.memory_space<smem>>
    %61 = vector.broadcast %60 : f32 to vector<1x256xf32>
    %62 = arith.mulf %29, %61 : vector<1x256xf32>
    %63 = arith.addf %59, %62 : vector<1x256xf32>
    %c13 = arith.constant 13 : index
    %64 = memref.load %arg5[%c13] : memref<32xf32, #tpu.memory_space<smem>>
    %65 = vector.broadcast %64 : f32 to vector<1x256xf32>
    %66 = arith.mulf %34, %65 : vector<1x256xf32>
    %67 = arith.addf %63, %66 : vector<1x256xf32>
    %c1_25 = arith.constant 1 : index
    %68 = memref.load %arg6[%c1_25] : memref<8xf32, #tpu.memory_space<smem>>
    %69 = vector.broadcast %68 : f32 to vector<1x256xf32>
    %70 = arith.addf %67, %69 : vector<1x256xf32>
    %c2_26 = arith.constant 2 : index
    %71 = memref.load %arg5[%c2_26] : memref<32xf32, #tpu.memory_space<smem>>
    %72 = vector.broadcast %71 : f32 to vector<1x256xf32>
    %73 = arith.mulf %19, %72 : vector<1x256xf32>
    %c6 = arith.constant 6 : index
    %74 = memref.load %arg5[%c6] : memref<32xf32, #tpu.memory_space<smem>>
    %75 = vector.broadcast %74 : f32 to vector<1x256xf32>
    %76 = arith.mulf %24, %75 : vector<1x256xf32>
    %77 = arith.addf %73, %76 : vector<1x256xf32>
    %c10 = arith.constant 10 : index
    %78 = memref.load %arg5[%c10] : memref<32xf32, #tpu.memory_space<smem>>
    %79 = vector.broadcast %78 : f32 to vector<1x256xf32>
    %80 = arith.mulf %29, %79 : vector<1x256xf32>
    %81 = arith.addf %77, %80 : vector<1x256xf32>
    %c14 = arith.constant 14 : index
    %82 = memref.load %arg5[%c14] : memref<32xf32, #tpu.memory_space<smem>>
    %83 = vector.broadcast %82 : f32 to vector<1x256xf32>
    %84 = arith.mulf %34, %83 : vector<1x256xf32>
    %85 = arith.addf %81, %84 : vector<1x256xf32>
    %c2_27 = arith.constant 2 : index
    %86 = memref.load %arg6[%c2_27] : memref<8xf32, #tpu.memory_space<smem>>
    %87 = vector.broadcast %86 : f32 to vector<1x256xf32>
    %88 = arith.addf %85, %87 : vector<1x256xf32>
    %c3_28 = arith.constant 3 : index
    %89 = memref.load %arg5[%c3_28] : memref<32xf32, #tpu.memory_space<smem>>
    %90 = vector.broadcast %89 : f32 to vector<1x256xf32>
    %91 = arith.mulf %19, %90 : vector<1x256xf32>
    %c7 = arith.constant 7 : index
    %92 = memref.load %arg5[%c7] : memref<32xf32, #tpu.memory_space<smem>>
    %93 = vector.broadcast %92 : f32 to vector<1x256xf32>
    %94 = arith.mulf %24, %93 : vector<1x256xf32>
    %95 = arith.addf %91, %94 : vector<1x256xf32>
    %c11 = arith.constant 11 : index
    %96 = memref.load %arg5[%c11] : memref<32xf32, #tpu.memory_space<smem>>
    %97 = vector.broadcast %96 : f32 to vector<1x256xf32>
    %98 = arith.mulf %29, %97 : vector<1x256xf32>
    %99 = arith.addf %95, %98 : vector<1x256xf32>
    %c15 = arith.constant 15 : index
    %100 = memref.load %arg5[%c15] : memref<32xf32, #tpu.memory_space<smem>>
    %101 = vector.broadcast %100 : f32 to vector<1x256xf32>
    %102 = arith.mulf %34, %101 : vector<1x256xf32>
    %103 = arith.addf %99, %102 : vector<1x256xf32>
    %c3_29 = arith.constant 3 : index
    %104 = memref.load %arg6[%c3_29] : memref<8xf32, #tpu.memory_space<smem>>
    %105 = vector.broadcast %104 : f32 to vector<1x256xf32>
    %106 = arith.addf %103, %105 : vector<1x256xf32>
    %107 = arith.maximumf %52, %70 : vector<1x256xf32>
    %108 = arith.maximumf %107, %88 : vector<1x256xf32>
    %109 = arith.maximumf %108, %106 : vector<1x256xf32>
    %110 = arith.subf %52, %109 : vector<1x256xf32>
    %111 = math.exp %110 : vector<1x256xf32>
    %112 = arith.subf %70, %109 : vector<1x256xf32>
    %113 = math.exp %112 : vector<1x256xf32>
    %114 = arith.subf %88, %109 : vector<1x256xf32>
    %115 = math.exp %114 : vector<1x256xf32>
    %116 = arith.subf %106, %109 : vector<1x256xf32>
    %117 = math.exp %116 : vector<1x256xf32>
    %118 = arith.addf %111, %113 : vector<1x256xf32>
    %119 = arith.addf %118, %115 : vector<1x256xf32>
    %120 = arith.addf %119, %117 : vector<1x256xf32>
    %121 = tpu.reciprocal %120 {approx = true} : vector<1x256xf32> -> vector<1x256xf32>
    %122 = arith.mulf %111, %121 : vector<1x256xf32>
    %123 = arith.mulf %113, %121 : vector<1x256xf32>
    %124 = arith.mulf %115, %121 : vector<1x256xf32>
    %125 = arith.mulf %117, %121 : vector<1x256xf32>
    %c0_30 = arith.constant 0 : index
    %126 = memref.load %arg5[%c0_30] : memref<32xf32, #tpu.memory_space<smem>>
    %127 = vector.broadcast %126 : f32 to vector<1x256xf32>
    %128 = arith.mulf %8, %127 : vector<1x256xf32>
    %c4_31 = arith.constant 4 : index
    %129 = memref.load %arg5[%c4_31] : memref<32xf32, #tpu.memory_space<smem>>
    %130 = vector.broadcast %129 : f32 to vector<1x256xf32>
    %131 = arith.mulf %10, %130 : vector<1x256xf32>
    %132 = arith.addf %128, %131 : vector<1x256xf32>
    %c8_32 = arith.constant 8 : index
    %133 = memref.load %arg5[%c8_32] : memref<32xf32, #tpu.memory_space<smem>>
    %134 = vector.broadcast %133 : f32 to vector<1x256xf32>
    %135 = arith.mulf %12, %134 : vector<1x256xf32>
    %136 = arith.addf %132, %135 : vector<1x256xf32>
    %c12_33 = arith.constant 12 : index
    %137 = memref.load %arg5[%c12_33] : memref<32xf32, #tpu.memory_space<smem>>
    %138 = vector.broadcast %137 : f32 to vector<1x256xf32>
    %139 = arith.mulf %14, %138 : vector<1x256xf32>
    %140 = arith.addf %136, %139 : vector<1x256xf32>
    %c0_34 = arith.constant 0 : index
    %141 = memref.load %arg6[%c0_34] : memref<8xf32, #tpu.memory_space<smem>>
    %142 = vector.broadcast %141 : f32 to vector<1x256xf32>
    %143 = arith.addf %140, %142 : vector<1x256xf32>
    %c1_35 = arith.constant 1 : index
    %144 = memref.load %arg5[%c1_35] : memref<32xf32, #tpu.memory_space<smem>>
    %145 = vector.broadcast %144 : f32 to vector<1x256xf32>
    %146 = arith.mulf %8, %145 : vector<1x256xf32>
    %c5_36 = arith.constant 5 : index
    %147 = memref.load %arg5[%c5_36] : memref<32xf32, #tpu.memory_space<smem>>
    %148 = vector.broadcast %147 : f32 to vector<1x256xf32>
    %149 = arith.mulf %10, %148 : vector<1x256xf32>
    %150 = arith.addf %146, %149 : vector<1x256xf32>
    %c9_37 = arith.constant 9 : index
    %151 = memref.load %arg5[%c9_37] : memref<32xf32, #tpu.memory_space<smem>>
    %152 = vector.broadcast %151 : f32 to vector<1x256xf32>
    %153 = arith.mulf %12, %152 : vector<1x256xf32>
    %154 = arith.addf %150, %153 : vector<1x256xf32>
    %c13_38 = arith.constant 13 : index
    %155 = memref.load %arg5[%c13_38] : memref<32xf32, #tpu.memory_space<smem>>
    %156 = vector.broadcast %155 : f32 to vector<1x256xf32>
    %157 = arith.mulf %14, %156 : vector<1x256xf32>
    %158 = arith.addf %154, %157 : vector<1x256xf32>
    %c1_39 = arith.constant 1 : index
    %159 = memref.load %arg6[%c1_39] : memref<8xf32, #tpu.memory_space<smem>>
    %160 = vector.broadcast %159 : f32 to vector<1x256xf32>
    %161 = arith.addf %158, %160 : vector<1x256xf32>
    %c2_40 = arith.constant 2 : index
    %162 = memref.load %arg5[%c2_40] : memref<32xf32, #tpu.memory_space<smem>>
    %163 = vector.broadcast %162 : f32 to vector<1x256xf32>
    %164 = arith.mulf %8, %163 : vector<1x256xf32>
    %c6_41 = arith.constant 6 : index
    %165 = memref.load %arg5[%c6_41] : memref<32xf32, #tpu.memory_space<smem>>
    %166 = vector.broadcast %165 : f32 to vector<1x256xf32>
    %167 = arith.mulf %10, %166 : vector<1x256xf32>
    %168 = arith.addf %164, %167 : vector<1x256xf32>
    %c10_42 = arith.constant 10 : index
    %169 = memref.load %arg5[%c10_42] : memref<32xf32, #tpu.memory_space<smem>>
    %170 = vector.broadcast %169 : f32 to vector<1x256xf32>
    %171 = arith.mulf %12, %170 : vector<1x256xf32>
    %172 = arith.addf %168, %171 : vector<1x256xf32>
    %c14_43 = arith.constant 14 : index
    %173 = memref.load %arg5[%c14_43] : memref<32xf32, #tpu.memory_space<smem>>
    %174 = vector.broadcast %173 : f32 to vector<1x256xf32>
    %175 = arith.mulf %14, %174 : vector<1x256xf32>
    %176 = arith.addf %172, %175 : vector<1x256xf32>
    %c2_44 = arith.constant 2 : index
    %177 = memref.load %arg6[%c2_44] : memref<8xf32, #tpu.memory_space<smem>>
    %178 = vector.broadcast %177 : f32 to vector<1x256xf32>
    %179 = arith.addf %176, %178 : vector<1x256xf32>
    %c3_45 = arith.constant 3 : index
    %180 = memref.load %arg5[%c3_45] : memref<32xf32, #tpu.memory_space<smem>>
    %181 = vector.broadcast %180 : f32 to vector<1x256xf32>
    %182 = arith.mulf %8, %181 : vector<1x256xf32>
    %c7_46 = arith.constant 7 : index
    %183 = memref.load %arg5[%c7_46] : memref<32xf32, #tpu.memory_space<smem>>
    %184 = vector.broadcast %183 : f32 to vector<1x256xf32>
    %185 = arith.mulf %10, %184 : vector<1x256xf32>
    %186 = arith.addf %182, %185 : vector<1x256xf32>
    %c11_47 = arith.constant 11 : index
    %187 = memref.load %arg5[%c11_47] : memref<32xf32, #tpu.memory_space<smem>>
    %188 = vector.broadcast %187 : f32 to vector<1x256xf32>
    %189 = arith.mulf %12, %188 : vector<1x256xf32>
    %190 = arith.addf %186, %189 : vector<1x256xf32>
    %c15_48 = arith.constant 15 : index
    %191 = memref.load %arg5[%c15_48] : memref<32xf32, #tpu.memory_space<smem>>
    %192 = vector.broadcast %191 : f32 to vector<1x256xf32>
    %193 = arith.mulf %14, %192 : vector<1x256xf32>
    %194 = arith.addf %190, %193 : vector<1x256xf32>
    %c3_49 = arith.constant 3 : index
    %195 = memref.load %arg6[%c3_49] : memref<8xf32, #tpu.memory_space<smem>>
    %196 = vector.broadcast %195 : f32 to vector<1x256xf32>
    %197 = arith.addf %194, %196 : vector<1x256xf32>
    %198 = arith.maximumf %143, %161 : vector<1x256xf32>
    %199 = arith.maximumf %198, %179 : vector<1x256xf32>
    %200 = arith.maximumf %199, %197 : vector<1x256xf32>
    %201 = arith.subf %143, %200 : vector<1x256xf32>
    %202 = math.exp %201 : vector<1x256xf32>
    %203 = arith.subf %161, %200 : vector<1x256xf32>
    %204 = math.exp %203 : vector<1x256xf32>
    %205 = arith.subf %179, %200 : vector<1x256xf32>
    %206 = math.exp %205 : vector<1x256xf32>
    %207 = arith.subf %197, %200 : vector<1x256xf32>
    %208 = math.exp %207 : vector<1x256xf32>
    %209 = arith.addf %202, %204 : vector<1x256xf32>
    %210 = arith.addf %209, %206 : vector<1x256xf32>
    %211 = arith.addf %210, %208 : vector<1x256xf32>
    %212 = tpu.reciprocal %211 {approx = true} : vector<1x256xf32> -> vector<1x256xf32>
    %213 = arith.mulf %202, %212 : vector<1x256xf32>
    %214 = arith.mulf %204, %212 : vector<1x256xf32>
    %215 = arith.mulf %206, %212 : vector<1x256xf32>
    %216 = arith.mulf %208, %212 : vector<1x256xf32>
    %c16 = arith.constant 16 : index
    %217 = memref.load %arg5[%c16] : memref<32xf32, #tpu.memory_space<smem>>
    %218 = vector.broadcast %217 : f32 to vector<1x256xf32>
    %219 = arith.mulf %19, %218 : vector<1x256xf32>
    %c20 = arith.constant 20 : index
    %220 = memref.load %arg5[%c20] : memref<32xf32, #tpu.memory_space<smem>>
    %221 = vector.broadcast %220 : f32 to vector<1x256xf32>
    %222 = arith.mulf %24, %221 : vector<1x256xf32>
    %223 = arith.addf %219, %222 : vector<1x256xf32>
    %c24 = arith.constant 24 : index
    %224 = memref.load %arg5[%c24] : memref<32xf32, #tpu.memory_space<smem>>
    %225 = vector.broadcast %224 : f32 to vector<1x256xf32>
    %226 = arith.mulf %29, %225 : vector<1x256xf32>
    %227 = arith.addf %223, %226 : vector<1x256xf32>
    %c28 = arith.constant 28 : index
    %228 = memref.load %arg5[%c28] : memref<32xf32, #tpu.memory_space<smem>>
    %229 = vector.broadcast %228 : f32 to vector<1x256xf32>
    %230 = arith.mulf %34, %229 : vector<1x256xf32>
    %231 = arith.addf %227, %230 : vector<1x256xf32>
    %c4_50 = arith.constant 4 : index
    %232 = memref.load %arg6[%c4_50] : memref<8xf32, #tpu.memory_space<smem>>
    %233 = vector.broadcast %232 : f32 to vector<1x256xf32>
    %234 = arith.addf %231, %233 : vector<1x256xf32>
    %c17 = arith.constant 17 : index
    %235 = memref.load %arg5[%c17] : memref<32xf32, #tpu.memory_space<smem>>
    %236 = vector.broadcast %235 : f32 to vector<1x256xf32>
    %237 = arith.mulf %19, %236 : vector<1x256xf32>
    %c21 = arith.constant 21 : index
    %238 = memref.load %arg5[%c21] : memref<32xf32, #tpu.memory_space<smem>>
    %239 = vector.broadcast %238 : f32 to vector<1x256xf32>
    %240 = arith.mulf %24, %239 : vector<1x256xf32>
    %241 = arith.addf %237, %240 : vector<1x256xf32>
    %c25 = arith.constant 25 : index
    %242 = memref.load %arg5[%c25] : memref<32xf32, #tpu.memory_space<smem>>
    %243 = vector.broadcast %242 : f32 to vector<1x256xf32>
    %244 = arith.mulf %29, %243 : vector<1x256xf32>
    %245 = arith.addf %241, %244 : vector<1x256xf32>
    %c29 = arith.constant 29 : index
    %246 = memref.load %arg5[%c29] : memref<32xf32, #tpu.memory_space<smem>>
    %247 = vector.broadcast %246 : f32 to vector<1x256xf32>
    %248 = arith.mulf %34, %247 : vector<1x256xf32>
    %249 = arith.addf %245, %248 : vector<1x256xf32>
    %c5_51 = arith.constant 5 : index
    %250 = memref.load %arg6[%c5_51] : memref<8xf32, #tpu.memory_space<smem>>
    %251 = vector.broadcast %250 : f32 to vector<1x256xf32>
    %252 = arith.addf %249, %251 : vector<1x256xf32>
    %c18 = arith.constant 18 : index
    %253 = memref.load %arg5[%c18] : memref<32xf32, #tpu.memory_space<smem>>
    %254 = vector.broadcast %253 : f32 to vector<1x256xf32>
    %255 = arith.mulf %19, %254 : vector<1x256xf32>
    %c22 = arith.constant 22 : index
    %256 = memref.load %arg5[%c22] : memref<32xf32, #tpu.memory_space<smem>>
    %257 = vector.broadcast %256 : f32 to vector<1x256xf32>
    %258 = arith.mulf %24, %257 : vector<1x256xf32>
    %259 = arith.addf %255, %258 : vector<1x256xf32>
    %c26 = arith.constant 26 : index
    %260 = memref.load %arg5[%c26] : memref<32xf32, #tpu.memory_space<smem>>
    %261 = vector.broadcast %260 : f32 to vector<1x256xf32>
    %262 = arith.mulf %29, %261 : vector<1x256xf32>
    %263 = arith.addf %259, %262 : vector<1x256xf32>
    %c30 = arith.constant 30 : index
    %264 = memref.load %arg5[%c30] : memref<32xf32, #tpu.memory_space<smem>>
    %265 = vector.broadcast %264 : f32 to vector<1x256xf32>
    %266 = arith.mulf %34, %265 : vector<1x256xf32>
    %267 = arith.addf %263, %266 : vector<1x256xf32>
    %c6_52 = arith.constant 6 : index
    %268 = memref.load %arg6[%c6_52] : memref<8xf32, #tpu.memory_space<smem>>
    %269 = vector.broadcast %268 : f32 to vector<1x256xf32>
    %270 = arith.addf %267, %269 : vector<1x256xf32>
    %c19 = arith.constant 19 : index
    %271 = memref.load %arg5[%c19] : memref<32xf32, #tpu.memory_space<smem>>
    %272 = vector.broadcast %271 : f32 to vector<1x256xf32>
    %273 = arith.mulf %19, %272 : vector<1x256xf32>
    %c23 = arith.constant 23 : index
    %274 = memref.load %arg5[%c23] : memref<32xf32, #tpu.memory_space<smem>>
    %275 = vector.broadcast %274 : f32 to vector<1x256xf32>
    %276 = arith.mulf %24, %275 : vector<1x256xf32>
    %277 = arith.addf %273, %276 : vector<1x256xf32>
    %c27 = arith.constant 27 : index
    %278 = memref.load %arg5[%c27] : memref<32xf32, #tpu.memory_space<smem>>
    %279 = vector.broadcast %278 : f32 to vector<1x256xf32>
    %280 = arith.mulf %29, %279 : vector<1x256xf32>
    %281 = arith.addf %277, %280 : vector<1x256xf32>
    %c31 = arith.constant 31 : index
    %282 = memref.load %arg5[%c31] : memref<32xf32, #tpu.memory_space<smem>>
    %283 = vector.broadcast %282 : f32 to vector<1x256xf32>
    %284 = arith.mulf %34, %283 : vector<1x256xf32>
    %285 = arith.addf %281, %284 : vector<1x256xf32>
    %c7_53 = arith.constant 7 : index
    %286 = memref.load %arg6[%c7_53] : memref<8xf32, #tpu.memory_space<smem>>
    %287 = vector.broadcast %286 : f32 to vector<1x256xf32>
    %288 = arith.addf %285, %287 : vector<1x256xf32>
    %289 = arith.maximumf %234, %252 : vector<1x256xf32>
    %290 = arith.maximumf %289, %270 : vector<1x256xf32>
    %291 = arith.maximumf %290, %288 : vector<1x256xf32>
    %292 = arith.subf %234, %291 : vector<1x256xf32>
    %293 = math.exp %292 : vector<1x256xf32>
    %294 = arith.subf %252, %291 : vector<1x256xf32>
    %295 = math.exp %294 : vector<1x256xf32>
    %296 = arith.subf %270, %291 : vector<1x256xf32>
    %297 = math.exp %296 : vector<1x256xf32>
    %298 = arith.subf %288, %291 : vector<1x256xf32>
    %299 = math.exp %298 : vector<1x256xf32>
    %300 = arith.addf %293, %295 : vector<1x256xf32>
    %301 = arith.addf %300, %297 : vector<1x256xf32>
    %302 = arith.addf %301, %299 : vector<1x256xf32>
    %303 = tpu.reciprocal %302 {approx = true} : vector<1x256xf32> -> vector<1x256xf32>
    %304 = arith.mulf %293, %303 : vector<1x256xf32>
    %305 = arith.mulf %295, %303 : vector<1x256xf32>
    %306 = arith.mulf %297, %303 : vector<1x256xf32>
    %307 = arith.mulf %299, %303 : vector<1x256xf32>
    %c16_54 = arith.constant 16 : index
    %308 = memref.load %arg5[%c16_54] : memref<32xf32, #tpu.memory_space<smem>>
    %309 = vector.broadcast %308 : f32 to vector<1x256xf32>
    %310 = arith.mulf %8, %309 : vector<1x256xf32>
    %c20_55 = arith.constant 20 : index
    %311 = memref.load %arg5[%c20_55] : memref<32xf32, #tpu.memory_space<smem>>
    %312 = vector.broadcast %311 : f32 to vector<1x256xf32>
    %313 = arith.mulf %10, %312 : vector<1x256xf32>
    %314 = arith.addf %310, %313 : vector<1x256xf32>
    %c24_56 = arith.constant 24 : index
    %315 = memref.load %arg5[%c24_56] : memref<32xf32, #tpu.memory_space<smem>>
    %316 = vector.broadcast %315 : f32 to vector<1x256xf32>
    %317 = arith.mulf %12, %316 : vector<1x256xf32>
    %318 = arith.addf %314, %317 : vector<1x256xf32>
    %c28_57 = arith.constant 28 : index
    %319 = memref.load %arg5[%c28_57] : memref<32xf32, #tpu.memory_space<smem>>
    %320 = vector.broadcast %319 : f32 to vector<1x256xf32>
    %321 = arith.mulf %14, %320 : vector<1x256xf32>
    %322 = arith.addf %318, %321 : vector<1x256xf32>
    %c4_58 = arith.constant 4 : index
    %323 = memref.load %arg6[%c4_58] : memref<8xf32, #tpu.memory_space<smem>>
    %324 = vector.broadcast %323 : f32 to vector<1x256xf32>
    %325 = arith.addf %322, %324 : vector<1x256xf32>
    %c17_59 = arith.constant 17 : index
    %326 = memref.load %arg5[%c17_59] : memref<32xf32, #tpu.memory_space<smem>>
    %327 = vector.broadcast %326 : f32 to vector<1x256xf32>
    %328 = arith.mulf %8, %327 : vector<1x256xf32>
    %c21_60 = arith.constant 21 : index
    %329 = memref.load %arg5[%c21_60] : memref<32xf32, #tpu.memory_space<smem>>
    %330 = vector.broadcast %329 : f32 to vector<1x256xf32>
    %331 = arith.mulf %10, %330 : vector<1x256xf32>
    %332 = arith.addf %328, %331 : vector<1x256xf32>
    %c25_61 = arith.constant 25 : index
    %333 = memref.load %arg5[%c25_61] : memref<32xf32, #tpu.memory_space<smem>>
    %334 = vector.broadcast %333 : f32 to vector<1x256xf32>
    %335 = arith.mulf %12, %334 : vector<1x256xf32>
    %336 = arith.addf %332, %335 : vector<1x256xf32>
    %c29_62 = arith.constant 29 : index
    %337 = memref.load %arg5[%c29_62] : memref<32xf32, #tpu.memory_space<smem>>
    %338 = vector.broadcast %337 : f32 to vector<1x256xf32>
    %339 = arith.mulf %14, %338 : vector<1x256xf32>
    %340 = arith.addf %336, %339 : vector<1x256xf32>
    %c5_63 = arith.constant 5 : index
    %341 = memref.load %arg6[%c5_63] : memref<8xf32, #tpu.memory_space<smem>>
    %342 = vector.broadcast %341 : f32 to vector<1x256xf32>
    %343 = arith.addf %340, %342 : vector<1x256xf32>
    %c18_64 = arith.constant 18 : index
    %344 = memref.load %arg5[%c18_64] : memref<32xf32, #tpu.memory_space<smem>>
    %345 = vector.broadcast %344 : f32 to vector<1x256xf32>
    %346 = arith.mulf %8, %345 : vector<1x256xf32>
    %c22_65 = arith.constant 22 : index
    %347 = memref.load %arg5[%c22_65] : memref<32xf32, #tpu.memory_space<smem>>
    %348 = vector.broadcast %347 : f32 to vector<1x256xf32>
    %349 = arith.mulf %10, %348 : vector<1x256xf32>
    %350 = arith.addf %346, %349 : vector<1x256xf32>
    %c26_66 = arith.constant 26 : index
    %351 = memref.load %arg5[%c26_66] : memref<32xf32, #tpu.memory_space<smem>>
    %352 = vector.broadcast %351 : f32 to vector<1x256xf32>
    %353 = arith.mulf %12, %352 : vector<1x256xf32>
    %354 = arith.addf %350, %353 : vector<1x256xf32>
    %c30_67 = arith.constant 30 : index
    %355 = memref.load %arg5[%c30_67] : memref<32xf32, #tpu.memory_space<smem>>
    %356 = vector.broadcast %355 : f32 to vector<1x256xf32>
    %357 = arith.mulf %14, %356 : vector<1x256xf32>
    %358 = arith.addf %354, %357 : vector<1x256xf32>
    %c6_68 = arith.constant 6 : index
    %359 = memref.load %arg6[%c6_68] : memref<8xf32, #tpu.memory_space<smem>>
    %360 = vector.broadcast %359 : f32 to vector<1x256xf32>
    %361 = arith.addf %358, %360 : vector<1x256xf32>
    %c19_69 = arith.constant 19 : index
    %362 = memref.load %arg5[%c19_69] : memref<32xf32, #tpu.memory_space<smem>>
    %363 = vector.broadcast %362 : f32 to vector<1x256xf32>
    %364 = arith.mulf %8, %363 : vector<1x256xf32>
    %c23_70 = arith.constant 23 : index
    %365 = memref.load %arg5[%c23_70] : memref<32xf32, #tpu.memory_space<smem>>
    %366 = vector.broadcast %365 : f32 to vector<1x256xf32>
    %367 = arith.mulf %10, %366 : vector<1x256xf32>
    %368 = arith.addf %364, %367 : vector<1x256xf32>
    %c27_71 = arith.constant 27 : index
    %369 = memref.load %arg5[%c27_71] : memref<32xf32, #tpu.memory_space<smem>>
    %370 = vector.broadcast %369 : f32 to vector<1x256xf32>
    %371 = arith.mulf %12, %370 : vector<1x256xf32>
    %372 = arith.addf %368, %371 : vector<1x256xf32>
    %c31_72 = arith.constant 31 : index
    %373 = memref.load %arg5[%c31_72] : memref<32xf32, #tpu.memory_space<smem>>
    %374 = vector.broadcast %373 : f32 to vector<1x256xf32>
    %375 = arith.mulf %14, %374 : vector<1x256xf32>
    %376 = arith.addf %372, %375 : vector<1x256xf32>
    %c7_73 = arith.constant 7 : index
    %377 = memref.load %arg6[%c7_73] : memref<8xf32, #tpu.memory_space<smem>>
    %378 = vector.broadcast %377 : f32 to vector<1x256xf32>
    %379 = arith.addf %376, %378 : vector<1x256xf32>
    %380 = arith.maximumf %325, %343 : vector<1x256xf32>
    %381 = arith.maximumf %380, %361 : vector<1x256xf32>
    %382 = arith.maximumf %381, %379 : vector<1x256xf32>
    %383 = arith.subf %325, %382 : vector<1x256xf32>
    %384 = math.exp %383 : vector<1x256xf32>
    %385 = arith.subf %343, %382 : vector<1x256xf32>
    %386 = math.exp %385 : vector<1x256xf32>
    %387 = arith.subf %361, %382 : vector<1x256xf32>
    %388 = math.exp %387 : vector<1x256xf32>
    %389 = arith.subf %379, %382 : vector<1x256xf32>
    %390 = math.exp %389 : vector<1x256xf32>
    %391 = arith.addf %384, %386 : vector<1x256xf32>
    %392 = arith.addf %391, %388 : vector<1x256xf32>
    %393 = arith.addf %392, %390 : vector<1x256xf32>
    %394 = tpu.reciprocal %393 {approx = true} : vector<1x256xf32> -> vector<1x256xf32>
    %395 = arith.mulf %384, %394 : vector<1x256xf32>
    %396 = arith.mulf %386, %394 : vector<1x256xf32>
    %397 = arith.mulf %388, %394 : vector<1x256xf32>
    %398 = arith.mulf %390, %394 : vector<1x256xf32>
    %c0_74 = arith.constant 0 : index
    %399 = memref.load %arg8[%c0_74] : memref<24xf32, #tpu.memory_space<smem>>
    %400 = arith.mulf %122, %213 : vector<1x256xf32>
    %401 = vector.shape_cast %400 : vector<1x256xf32> to vector<1x1x256xf32>
    %cst = arith.constant dense<0.000000e+00> : vector<1xf32>
    %402 = vector.multi_reduction <add>, %401, %cst [1, 2] : vector<1x1x256xf32> to vector<1xf32>
    %403 = vector.shape_cast %402 : vector<1xf32> to vector<1x1x1xf32>
    %404 = vector.extract %403[0, 0, 0] : f32 from vector<1x1x1xf32>
    %405 = arith.addf %399, %404 : f32
    %c0_75 = arith.constant 0 : index
    %406 = memref.load %arg8[%c0_75] : memref<24xf32, #tpu.memory_space<smem>>
    memref.store %405, %arg8[%c0_75] : memref<24xf32, #tpu.memory_space<smem>>
    %c4_76 = arith.constant 4 : index
    %407 = memref.load %arg8[%c4_76] : memref<24xf32, #tpu.memory_space<smem>>
    %408 = arith.mulf %122, %122 : vector<1x256xf32>
    %409 = vector.shape_cast %408 : vector<1x256xf32> to vector<1x1x256xf32>
    %cst_77 = arith.constant dense<0.000000e+00> : vector<1xf32>
    %410 = vector.multi_reduction <add>, %409, %cst_77 [1, 2] : vector<1x1x256xf32> to vector<1xf32>
    %411 = vector.shape_cast %410 : vector<1xf32> to vector<1x1x1xf32>
    %412 = vector.extract %411[0, 0, 0] : f32 from vector<1x1x1xf32>
    %413 = arith.addf %407, %412 : f32
    %c4_78 = arith.constant 4 : index
    %414 = memref.load %arg8[%c4_78] : memref<24xf32, #tpu.memory_space<smem>>
    memref.store %413, %arg8[%c4_78] : memref<24xf32, #tpu.memory_space<smem>>
    %c8_79 = arith.constant 8 : index
    %415 = memref.load %arg8[%c8_79] : memref<24xf32, #tpu.memory_space<smem>>
    %416 = arith.mulf %213, %213 : vector<1x256xf32>
    %417 = vector.shape_cast %416 : vector<1x256xf32> to vector<1x1x256xf32>
    %cst_80 = arith.constant dense<0.000000e+00> : vector<1xf32>
    %418 = vector.multi_reduction <add>, %417, %cst_80 [1, 2] : vector<1x1x256xf32> to vector<1xf32>
    %419 = vector.shape_cast %418 : vector<1xf32> to vector<1x1x1xf32>
    %420 = vector.extract %419[0, 0, 0] : f32 from vector<1x1x1xf32>
    %421 = arith.addf %415, %420 : f32
    %c8_81 = arith.constant 8 : index
    %422 = memref.load %arg8[%c8_81] : memref<24xf32, #tpu.memory_space<smem>>
    memref.store %421, %arg8[%c8_81] : memref<24xf32, #tpu.memory_space<smem>>
    %c1_82 = arith.constant 1 : index
    %423 = memref.load %arg8[%c1_82] : memref<24xf32, #tpu.memory_space<smem>>
    %424 = arith.mulf %123, %214 : vector<1x256xf32>
    %425 = vector.shape_cast %424 : vector<1x256xf32> to vector<1x1x256xf32>
    %cst_83 = arith.constant dense<0.000000e+00> : vector<1xf32>
    %426 = vector.multi_reduction <add>, %425, %cst_83 [1, 2] : vector<1x1x256xf32> to vector<1xf32>
    %427 = vector.shape_cast %426 : vector<1xf32> to vector<1x1x1xf32>
    %428 = vector.extract %427[0, 0, 0] : f32 from vector<1x1x1xf32>
    %429 = arith.addf %423, %428 : f32
    %c1_84 = arith.constant 1 : index
    %430 = memref.load %arg8[%c1_84] : memref<24xf32, #tpu.memory_space<smem>>
    memref.store %429, %arg8[%c1_84] : memref<24xf32, #tpu.memory_space<smem>>
    %c5_85 = arith.constant 5 : index
    %431 = memref.load %arg8[%c5_85] : memref<24xf32, #tpu.memory_space<smem>>
    %432 = arith.mulf %123, %123 : vector<1x256xf32>
    %433 = vector.shape_cast %432 : vector<1x256xf32> to vector<1x1x256xf32>
    %cst_86 = arith.constant dense<0.000000e+00> : vector<1xf32>
    %434 = vector.multi_reduction <add>, %433, %cst_86 [1, 2] : vector<1x1x256xf32> to vector<1xf32>
    %435 = vector.shape_cast %434 : vector<1xf32> to vector<1x1x1xf32>
    %436 = vector.extract %435[0, 0, 0] : f32 from vector<1x1x1xf32>
    %437 = arith.addf %431, %436 : f32
    %c5_87 = arith.constant 5 : index
    %438 = memref.load %arg8[%c5_87] : memref<24xf32, #tpu.memory_space<smem>>
    memref.store %437, %arg8[%c5_87] : memref<24xf32, #tpu.memory_space<smem>>
    %c9_88 = arith.constant 9 : index
    %439 = memref.load %arg8[%c9_88] : memref<24xf32, #tpu.memory_space<smem>>
    %440 = arith.mulf %214, %214 : vector<1x256xf32>
    %441 = vector.shape_cast %440 : vector<1x256xf32> to vector<1x1x256xf32>
    %cst_89 = arith.constant dense<0.000000e+00> : vector<1xf32>
    %442 = vector.multi_reduction <add>, %441, %cst_89 [1, 2] : vector<1x1x256xf32> to vector<1xf32>
    %443 = vector.shape_cast %442 : vector<1xf32> to vector<1x1x1xf32>
    %444 = vector.extract %443[0, 0, 0] : f32 from vector<1x1x1xf32>
    %445 = arith.addf %439, %444 : f32
    %c9_90 = arith.constant 9 : index
    %446 = memref.load %arg8[%c9_90] : memref<24xf32, #tpu.memory_space<smem>>
    memref.store %445, %arg8[%c9_90] : memref<24xf32, #tpu.memory_space<smem>>
    %c2_91 = arith.constant 2 : index
    %447 = memref.load %arg8[%c2_91] : memref<24xf32, #tpu.memory_space<smem>>
    %448 = arith.mulf %124, %215 : vector<1x256xf32>
    %449 = vector.shape_cast %448 : vector<1x256xf32> to vector<1x1x256xf32>
    %cst_92 = arith.constant dense<0.000000e+00> : vector<1xf32>
    %450 = vector.multi_reduction <add>, %449, %cst_92 [1, 2] : vector<1x1x256xf32> to vector<1xf32>
    %451 = vector.shape_cast %450 : vector<1xf32> to vector<1x1x1xf32>
    %452 = vector.extract %451[0, 0, 0] : f32 from vector<1x1x1xf32>
    %453 = arith.addf %447, %452 : f32
    %c2_93 = arith.constant 2 : index
    %454 = memref.load %arg8[%c2_93] : memref<24xf32, #tpu.memory_space<smem>>
    memref.store %453, %arg8[%c2_93] : memref<24xf32, #tpu.memory_space<smem>>
    %c6_94 = arith.constant 6 : index
    %455 = memref.load %arg8[%c6_94] : memref<24xf32, #tpu.memory_space<smem>>
    %456 = arith.mulf %124, %124 : vector<1x256xf32>
    %457 = vector.shape_cast %456 : vector<1x256xf32> to vector<1x1x256xf32>
    %cst_95 = arith.constant dense<0.000000e+00> : vector<1xf32>
    %458 = vector.multi_reduction <add>, %457, %cst_95 [1, 2] : vector<1x1x256xf32> to vector<1xf32>
    %459 = vector.shape_cast %458 : vector<1xf32> to vector<1x1x1xf32>
    %460 = vector.extract %459[0, 0, 0] : f32 from vector<1x1x1xf32>
    %461 = arith.addf %455, %460 : f32
    %c6_96 = arith.constant 6 : index
    %462 = memref.load %arg8[%c6_96] : memref<24xf32, #tpu.memory_space<smem>>
    memref.store %461, %arg8[%c6_96] : memref<24xf32, #tpu.memory_space<smem>>
    %c10_97 = arith.constant 10 : index
    %463 = memref.load %arg8[%c10_97] : memref<24xf32, #tpu.memory_space<smem>>
    %464 = arith.mulf %215, %215 : vector<1x256xf32>
    %465 = vector.shape_cast %464 : vector<1x256xf32> to vector<1x1x256xf32>
    %cst_98 = arith.constant dense<0.000000e+00> : vector<1xf32>
    %466 = vector.multi_reduction <add>, %465, %cst_98 [1, 2] : vector<1x1x256xf32> to vector<1xf32>
    %467 = vector.shape_cast %466 : vector<1xf32> to vector<1x1x1xf32>
    %468 = vector.extract %467[0, 0, 0] : f32 from vector<1x1x1xf32>
    %469 = arith.addf %463, %468 : f32
    %c10_99 = arith.constant 10 : index
    %470 = memref.load %arg8[%c10_99] : memref<24xf32, #tpu.memory_space<smem>>
    memref.store %469, %arg8[%c10_99] : memref<24xf32, #tpu.memory_space<smem>>
    %c3_100 = arith.constant 3 : index
    %471 = memref.load %arg8[%c3_100] : memref<24xf32, #tpu.memory_space<smem>>
    %472 = arith.mulf %125, %216 : vector<1x256xf32>
    %473 = vector.shape_cast %472 : vector<1x256xf32> to vector<1x1x256xf32>
    %cst_101 = arith.constant dense<0.000000e+00> : vector<1xf32>
    %474 = vector.multi_reduction <add>, %473, %cst_101 [1, 2] : vector<1x1x256xf32> to vector<1xf32>
    %475 = vector.shape_cast %474 : vector<1xf32> to vector<1x1x1xf32>
    %476 = vector.extract %475[0, 0, 0] : f32 from vector<1x1x1xf32>
    %477 = arith.addf %471, %476 : f32
    %c3_102 = arith.constant 3 : index
    %478 = memref.load %arg8[%c3_102] : memref<24xf32, #tpu.memory_space<smem>>
    memref.store %477, %arg8[%c3_102] : memref<24xf32, #tpu.memory_space<smem>>
    %c7_103 = arith.constant 7 : index
    %479 = memref.load %arg8[%c7_103] : memref<24xf32, #tpu.memory_space<smem>>
    %480 = arith.mulf %125, %125 : vector<1x256xf32>
    %481 = vector.shape_cast %480 : vector<1x256xf32> to vector<1x1x256xf32>
    %cst_104 = arith.constant dense<0.000000e+00> : vector<1xf32>
    %482 = vector.multi_reduction <add>, %481, %cst_104 [1, 2] : vector<1x1x256xf32> to vector<1xf32>
    %483 = vector.shape_cast %482 : vector<1xf32> to vector<1x1x1xf32>
    %484 = vector.extract %483[0, 0, 0] : f32 from vector<1x1x1xf32>
    %485 = arith.addf %479, %484 : f32
    %c7_105 = arith.constant 7 : index
    %486 = memref.load %arg8[%c7_105] : memref<24xf32, #tpu.memory_space<smem>>
    memref.store %485, %arg8[%c7_105] : memref<24xf32, #tpu.memory_space<smem>>
    %c11_106 = arith.constant 11 : index
    %487 = memref.load %arg8[%c11_106] : memref<24xf32, #tpu.memory_space<smem>>
    %488 = arith.mulf %216, %216 : vector<1x256xf32>
    %489 = vector.shape_cast %488 : vector<1x256xf32> to vector<1x1x256xf32>
    %cst_107 = arith.constant dense<0.000000e+00> : vector<1xf32>
    %490 = vector.multi_reduction <add>, %489, %cst_107 [1, 2] : vector<1x1x256xf32> to vector<1xf32>
    %491 = vector.shape_cast %490 : vector<1xf32> to vector<1x1x1xf32>
    %492 = vector.extract %491[0, 0, 0] : f32 from vector<1x1x1xf32>
    %493 = arith.addf %487, %492 : f32
    %c11_108 = arith.constant 11 : index
    %494 = memref.load %arg8[%c11_108] : memref<24xf32, #tpu.memory_space<smem>>
    memref.store %493, %arg8[%c11_108] : memref<24xf32, #tpu.memory_space<smem>>
    %c12_109 = arith.constant 12 : index
    %495 = memref.load %arg8[%c12_109] : memref<24xf32, #tpu.memory_space<smem>>
    %496 = arith.mulf %304, %395 : vector<1x256xf32>
    %497 = vector.shape_cast %496 : vector<1x256xf32> to vector<1x1x256xf32>
    %cst_110 = arith.constant dense<0.000000e+00> : vector<1xf32>
    %498 = vector.multi_reduction <add>, %497, %cst_110 [1, 2] : vector<1x1x256xf32> to vector<1xf32>
    %499 = vector.shape_cast %498 : vector<1xf32> to vector<1x1x1xf32>
    %500 = vector.extract %499[0, 0, 0] : f32 from vector<1x1x1xf32>
    %501 = arith.addf %495, %500 : f32
    %c12_111 = arith.constant 12 : index
    %502 = memref.load %arg8[%c12_111] : memref<24xf32, #tpu.memory_space<smem>>
    memref.store %501, %arg8[%c12_111] : memref<24xf32, #tpu.memory_space<smem>>
    %c16_112 = arith.constant 16 : index
    %503 = memref.load %arg8[%c16_112] : memref<24xf32, #tpu.memory_space<smem>>
    %504 = arith.mulf %304, %304 : vector<1x256xf32>
    %505 = vector.shape_cast %504 : vector<1x256xf32> to vector<1x1x256xf32>
    %cst_113 = arith.constant dense<0.000000e+00> : vector<1xf32>
    %506 = vector.multi_reduction <add>, %505, %cst_113 [1, 2] : vector<1x1x256xf32> to vector<1xf32>
    %507 = vector.shape_cast %506 : vector<1xf32> to vector<1x1x1xf32>
    %508 = vector.extract %507[0, 0, 0] : f32 from vector<1x1x1xf32>
    %509 = arith.addf %503, %508 : f32
    %c16_114 = arith.constant 16 : index
    %510 = memref.load %arg8[%c16_114] : memref<24xf32, #tpu.memory_space<smem>>
    memref.store %509, %arg8[%c16_114] : memref<24xf32, #tpu.memory_space<smem>>
    %c20_115 = arith.constant 20 : index
    %511 = memref.load %arg8[%c20_115] : memref<24xf32, #tpu.memory_space<smem>>
    %512 = arith.mulf %395, %395 : vector<1x256xf32>
    %513 = vector.shape_cast %512 : vector<1x256xf32> to vector<1x1x256xf32>
    %cst_116 = arith.constant dense<0.000000e+00> : vector<1xf32>
    %514 = vector.multi_reduction <add>, %513, %cst_116 [1, 2] : vector<1x1x256xf32> to vector<1xf32>
    %515 = vector.shape_cast %514 : vector<1xf32> to vector<1x1x1xf32>
    %516 = vector.extract %515[0, 0, 0] : f32 from vector<1x1x1xf32>
    %517 = arith.addf %511, %516 : f32
    %c20_117 = arith.constant 20 : index
    %518 = memref.load %arg8[%c20_117] : memref<24xf32, #tpu.memory_space<smem>>
    memref.store %517, %arg8[%c20_117] : memref<24xf32, #tpu.memory_space<smem>>
    %c13_118 = arith.constant 13 : index
    %519 = memref.load %arg8[%c13_118] : memref<24xf32, #tpu.memory_space<smem>>
    %520 = arith.mulf %305, %396 : vector<1x256xf32>
    %521 = vector.shape_cast %520 : vector<1x256xf32> to vector<1x1x256xf32>
    %cst_119 = arith.constant dense<0.000000e+00> : vector<1xf32>
    %522 = vector.multi_reduction <add>, %521, %cst_119 [1, 2] : vector<1x1x256xf32> to vector<1xf32>
    %523 = vector.shape_cast %522 : vector<1xf32> to vector<1x1x1xf32>
    %524 = vector.extract %523[0, 0, 0] : f32 from vector<1x1x1xf32>
    %525 = arith.addf %519, %524 : f32
    %c13_120 = arith.constant 13 : index
    %526 = memref.load %arg8[%c13_120] : memref<24xf32, #tpu.memory_space<smem>>
    memref.store %525, %arg8[%c13_120] : memref<24xf32, #tpu.memory_space<smem>>
    %c17_121 = arith.constant 17 : index
    %527 = memref.load %arg8[%c17_121] : memref<24xf32, #tpu.memory_space<smem>>
    %528 = arith.mulf %305, %305 : vector<1x256xf32>
    %529 = vector.shape_cast %528 : vector<1x256xf32> to vector<1x1x256xf32>
    %cst_122 = arith.constant dense<0.000000e+00> : vector<1xf32>
    %530 = vector.multi_reduction <add>, %529, %cst_122 [1, 2] : vector<1x1x256xf32> to vector<1xf32>
    %531 = vector.shape_cast %530 : vector<1xf32> to vector<1x1x1xf32>
    %532 = vector.extract %531[0, 0, 0] : f32 from vector<1x1x1xf32>
    %533 = arith.addf %527, %532 : f32
    %c17_123 = arith.constant 17 : index
    %534 = memref.load %arg8[%c17_123] : memref<24xf32, #tpu.memory_space<smem>>
    memref.store %533, %arg8[%c17_123] : memref<24xf32, #tpu.memory_space<smem>>
    %c21_124 = arith.constant 21 : index
    %535 = memref.load %arg8[%c21_124] : memref<24xf32, #tpu.memory_space<smem>>
    %536 = arith.mulf %396, %396 : vector<1x256xf32>
    %537 = vector.shape_cast %536 : vector<1x256xf32> to vector<1x1x256xf32>
    %cst_125 = arith.constant dense<0.000000e+00> : vector<1xf32>
    %538 = vector.multi_reduction <add>, %537, %cst_125 [1, 2] : vector<1x1x256xf32> to vector<1xf32>
    %539 = vector.shape_cast %538 : vector<1xf32> to vector<1x1x1xf32>
    %540 = vector.extract %539[0, 0, 0] : f32 from vector<1x1x1xf32>
    %541 = arith.addf %535, %540 : f32
    %c21_126 = arith.constant 21 : index
    %542 = memref.load %arg8[%c21_126] : memref<24xf32, #tpu.memory_space<smem>>
    memref.store %541, %arg8[%c21_126] : memref<24xf32, #tpu.memory_space<smem>>
    %c14_127 = arith.constant 14 : index
    %543 = memref.load %arg8[%c14_127] : memref<24xf32, #tpu.memory_space<smem>>
    %544 = arith.mulf %306, %397 : vector<1x256xf32>
    %545 = vector.shape_cast %544 : vector<1x256xf32> to vector<1x1x256xf32>
    %cst_128 = arith.constant dense<0.000000e+00> : vector<1xf32>
    %546 = vector.multi_reduction <add>, %545, %cst_128 [1, 2] : vector<1x1x256xf32> to vector<1xf32>
    %547 = vector.shape_cast %546 : vector<1xf32> to vector<1x1x1xf32>
    %548 = vector.extract %547[0, 0, 0] : f32 from vector<1x1x1xf32>
    %549 = arith.addf %543, %548 : f32
    %c14_129 = arith.constant 14 : index
    %550 = memref.load %arg8[%c14_129] : memref<24xf32, #tpu.memory_space<smem>>
    memref.store %549, %arg8[%c14_129] : memref<24xf32, #tpu.memory_space<smem>>
    %c18_130 = arith.constant 18 : index
    %551 = memref.load %arg8[%c18_130] : memref<24xf32, #tpu.memory_space<smem>>
    %552 = arith.mulf %306, %306 : vector<1x256xf32>
    %553 = vector.shape_cast %552 : vector<1x256xf32> to vector<1x1x256xf32>
    %cst_131 = arith.constant dense<0.000000e+00> : vector<1xf32>
    %554 = vector.multi_reduction <add>, %553, %cst_131 [1, 2] : vector<1x1x256xf32> to vector<1xf32>
    %555 = vector.shape_cast %554 : vector<1xf32> to vector<1x1x1xf32>
    %556 = vector.extract %555[0, 0, 0] : f32 from vector<1x1x1xf32>
    %557 = arith.addf %551, %556 : f32
    %c18_132 = arith.constant 18 : index
    %558 = memref.load %arg8[%c18_132] : memref<24xf32, #tpu.memory_space<smem>>
    memref.store %557, %arg8[%c18_132] : memref<24xf32, #tpu.memory_space<smem>>
    %c22_133 = arith.constant 22 : index
    %559 = memref.load %arg8[%c22_133] : memref<24xf32, #tpu.memory_space<smem>>
    %560 = arith.mulf %397, %397 : vector<1x256xf32>
    %561 = vector.shape_cast %560 : vector<1x256xf32> to vector<1x1x256xf32>
    %cst_134 = arith.constant dense<0.000000e+00> : vector<1xf32>
    %562 = vector.multi_reduction <add>, %561, %cst_134 [1, 2] : vector<1x1x256xf32> to vector<1xf32>
    %563 = vector.shape_cast %562 : vector<1xf32> to vector<1x1x1xf32>
    %564 = vector.extract %563[0, 0, 0] : f32 from vector<1x1x1xf32>
    %565 = arith.addf %559, %564 : f32
    %c22_135 = arith.constant 22 : index
    %566 = memref.load %arg8[%c22_135] : memref<24xf32, #tpu.memory_space<smem>>
    memref.store %565, %arg8[%c22_135] : memref<24xf32, #tpu.memory_space<smem>>
    %c15_136 = arith.constant 15 : index
    %567 = memref.load %arg8[%c15_136] : memref<24xf32, #tpu.memory_space<smem>>
    %568 = arith.mulf %307, %398 : vector<1x256xf32>
    %569 = vector.shape_cast %568 : vector<1x256xf32> to vector<1x1x256xf32>
    %cst_137 = arith.constant dense<0.000000e+00> : vector<1xf32>
    %570 = vector.multi_reduction <add>, %569, %cst_137 [1, 2] : vector<1x1x256xf32> to vector<1xf32>
    %571 = vector.shape_cast %570 : vector<1xf32> to vector<1x1x1xf32>
    %572 = vector.extract %571[0, 0, 0] : f32 from vector<1x1x1xf32>
    %573 = arith.addf %567, %572 : f32
    %c15_138 = arith.constant 15 : index
    %574 = memref.load %arg8[%c15_138] : memref<24xf32, #tpu.memory_space<smem>>
    memref.store %573, %arg8[%c15_138] : memref<24xf32, #tpu.memory_space<smem>>
    %c19_139 = arith.constant 19 : index
    %575 = memref.load %arg8[%c19_139] : memref<24xf32, #tpu.memory_space<smem>>
    %576 = arith.mulf %307, %307 : vector<1x256xf32>
    %577 = vector.shape_cast %576 : vector<1x256xf32> to vector<1x1x256xf32>
    %cst_140 = arith.constant dense<0.000000e+00> : vector<1xf32>
    %578 = vector.multi_reduction <add>, %577, %cst_140 [1, 2] : vector<1x1x256xf32> to vector<1xf32>
    %579 = vector.shape_cast %578 : vector<1xf32> to vector<1x1x1xf32>
    %580 = vector.extract %579[0, 0, 0] : f32 from vector<1x1x1xf32>
    %581 = arith.addf %575, %580 : f32
    %c19_141 = arith.constant 19 : index
    %582 = memref.load %arg8[%c19_141] : memref<24xf32, #tpu.memory_space<smem>>
    memref.store %581, %arg8[%c19_141] : memref<24xf32, #tpu.memory_space<smem>>
    %c23_142 = arith.constant 23 : index
    %583 = memref.load %arg8[%c23_142] : memref<24xf32, #tpu.memory_space<smem>>
    %584 = arith.mulf %398, %398 : vector<1x256xf32>
    %585 = vector.shape_cast %584 : vector<1x256xf32> to vector<1x1x256xf32>
    %cst_143 = arith.constant dense<0.000000e+00> : vector<1xf32>
    %586 = vector.multi_reduction <add>, %585, %cst_143 [1, 2] : vector<1x1x256xf32> to vector<1xf32>
    %587 = vector.shape_cast %586 : vector<1xf32> to vector<1x1x1xf32>
    %588 = vector.extract %587[0, 0, 0] : f32 from vector<1x1x1xf32>
    %589 = arith.addf %583, %588 : f32
    %c23_144 = arith.constant 23 : index
    %590 = memref.load %arg8[%c23_144] : memref<24xf32, #tpu.memory_space<smem>>
    memref.store %589, %arg8[%c23_144] : memref<24xf32, #tpu.memory_space<smem>>
    %c1_i32 = arith.constant 1 : i32
    %591 = arith.cmpi eq, %arg0, %c1_i32 : i32
    %c0_i32_145 = arith.constant 0 : i32
    %592 = arith.cmpi eq, %arg1, %c0_i32_145 : i32
    %593 = arith.andi %591, %592 : i1
    %594 = arith.extui %593 : i1 to i32
    %c0_i32_146 = arith.constant 0 : i32
    %595 = arith.cmpi ne, %594, %c0_i32_146 : i32
    scf.if %595 {
      %c0_147 = arith.constant 0 : index
      %596 = memref.load %arg8[%c0_147] : memref<24xf32, #tpu.memory_space<smem>>
      %c0_148 = arith.constant 0 : index
      %597 = memref.load %arg7[%c0_148] : memref<24xf32, #tpu.memory_space<smem>>
      memref.store %596, %arg7[%c0_148] : memref<24xf32, #tpu.memory_space<smem>>
      %c1_149 = arith.constant 1 : index
      %598 = memref.load %arg8[%c1_149] : memref<24xf32, #tpu.memory_space<smem>>
      %c1_150 = arith.constant 1 : index
      %599 = memref.load %arg7[%c1_150] : memref<24xf32, #tpu.memory_space<smem>>
      memref.store %598, %arg7[%c1_150] : memref<24xf32, #tpu.memory_space<smem>>
      %c2_151 = arith.constant 2 : index
      %600 = memref.load %arg8[%c2_151] : memref<24xf32, #tpu.memory_space<smem>>
      %c2_152 = arith.constant 2 : index
      %601 = memref.load %arg7[%c2_152] : memref<24xf32, #tpu.memory_space<smem>>
      memref.store %600, %arg7[%c2_152] : memref<24xf32, #tpu.memory_space<smem>>
      %c3_153 = arith.constant 3 : index
      %602 = memref.load %arg8[%c3_153] : memref<24xf32, #tpu.memory_space<smem>>
      %c3_154 = arith.constant 3 : index
      %603 = memref.load %arg7[%c3_154] : memref<24xf32, #tpu.memory_space<smem>>
      memref.store %602, %arg7[%c3_154] : memref<24xf32, #tpu.memory_space<smem>>
      %c4_155 = arith.constant 4 : index
      %604 = memref.load %arg8[%c4_155] : memref<24xf32, #tpu.memory_space<smem>>
      %c4_156 = arith.constant 4 : index
      %605 = memref.load %arg7[%c4_156] : memref<24xf32, #tpu.memory_space<smem>>
      memref.store %604, %arg7[%c4_156] : memref<24xf32, #tpu.memory_space<smem>>
      %c5_157 = arith.constant 5 : index
      %606 = memref.load %arg8[%c5_157] : memref<24xf32, #tpu.memory_space<smem>>
      %c5_158 = arith.constant 5 : index
      %607 = memref.load %arg7[%c5_158] : memref<24xf32, #tpu.memory_space<smem>>
      memref.store %606, %arg7[%c5_158] : memref<24xf32, #tpu.memory_space<smem>>
      %c6_159 = arith.constant 6 : index
      %608 = memref.load %arg8[%c6_159] : memref<24xf32, #tpu.memory_space<smem>>
      %c6_160 = arith.constant 6 : index
      %609 = memref.load %arg7[%c6_160] : memref<24xf32, #tpu.memory_space<smem>>
      memref.store %608, %arg7[%c6_160] : memref<24xf32, #tpu.memory_space<smem>>
      %c7_161 = arith.constant 7 : index
      %610 = memref.load %arg8[%c7_161] : memref<24xf32, #tpu.memory_space<smem>>
      %c7_162 = arith.constant 7 : index
      %611 = memref.load %arg7[%c7_162] : memref<24xf32, #tpu.memory_space<smem>>
      memref.store %610, %arg7[%c7_162] : memref<24xf32, #tpu.memory_space<smem>>
      %c8_163 = arith.constant 8 : index
      %612 = memref.load %arg8[%c8_163] : memref<24xf32, #tpu.memory_space<smem>>
      %c8_164 = arith.constant 8 : index
      %613 = memref.load %arg7[%c8_164] : memref<24xf32, #tpu.memory_space<smem>>
      memref.store %612, %arg7[%c8_164] : memref<24xf32, #tpu.memory_space<smem>>
      %c9_165 = arith.constant 9 : index
      %614 = memref.load %arg8[%c9_165] : memref<24xf32, #tpu.memory_space<smem>>
      %c9_166 = arith.constant 9 : index
      %615 = memref.load %arg7[%c9_166] : memref<24xf32, #tpu.memory_space<smem>>
      memref.store %614, %arg7[%c9_166] : memref<24xf32, #tpu.memory_space<smem>>
      %c10_167 = arith.constant 10 : index
      %616 = memref.load %arg8[%c10_167] : memref<24xf32, #tpu.memory_space<smem>>
      %c10_168 = arith.constant 10 : index
      %617 = memref.load %arg7[%c10_168] : memref<24xf32, #tpu.memory_space<smem>>
      memref.store %616, %arg7[%c10_168] : memref<24xf32, #tpu.memory_space<smem>>
      %c11_169 = arith.constant 11 : index
      %618 = memref.load %arg8[%c11_169] : memref<24xf32, #tpu.memory_space<smem>>
      %c11_170 = arith.constant 11 : index
      %619 = memref.load %arg7[%c11_170] : memref<24xf32, #tpu.memory_space<smem>>
      memref.store %618, %arg7[%c11_170] : memref<24xf32, #tpu.memory_space<smem>>
      %c12_171 = arith.constant 12 : index
      %620 = memref.load %arg8[%c12_171] : memref<24xf32, #tpu.memory_space<smem>>
      %c12_172 = arith.constant 12 : index
      %621 = memref.load %arg7[%c12_172] : memref<24xf32, #tpu.memory_space<smem>>
      memref.store %620, %arg7[%c12_172] : memref<24xf32, #tpu.memory_space<smem>>
      %c13_173 = arith.constant 13 : index
      %622 = memref.load %arg8[%c13_173] : memref<24xf32, #tpu.memory_space<smem>>
      %c13_174 = arith.constant 13 : index
      %623 = memref.load %arg7[%c13_174] : memref<24xf32, #tpu.memory_space<smem>>
      memref.store %622, %arg7[%c13_174] : memref<24xf32, #tpu.memory_space<smem>>
      %c14_175 = arith.constant 14 : index
      %624 = memref.load %arg8[%c14_175] : memref<24xf32, #tpu.memory_space<smem>>
      %c14_176 = arith.constant 14 : index
      %625 = memref.load %arg7[%c14_176] : memref<24xf32, #tpu.memory_space<smem>>
      memref.store %624, %arg7[%c14_176] : memref<24xf32, #tpu.memory_space<smem>>
      %c15_177 = arith.constant 15 : index
      %626 = memref.load %arg8[%c15_177] : memref<24xf32, #tpu.memory_space<smem>>
      %c15_178 = arith.constant 15 : index
      %627 = memref.load %arg7[%c15_178] : memref<24xf32, #tpu.memory_space<smem>>
      memref.store %626, %arg7[%c15_178] : memref<24xf32, #tpu.memory_space<smem>>
      %c16_179 = arith.constant 16 : index
      %628 = memref.load %arg8[%c16_179] : memref<24xf32, #tpu.memory_space<smem>>
      %c16_180 = arith.constant 16 : index
      %629 = memref.load %arg7[%c16_180] : memref<24xf32, #tpu.memory_space<smem>>
      memref.store %628, %arg7[%c16_180] : memref<24xf32, #tpu.memory_space<smem>>
      %c17_181 = arith.constant 17 : index
      %630 = memref.load %arg8[%c17_181] : memref<24xf32, #tpu.memory_space<smem>>
      %c17_182 = arith.constant 17 : index
      %631 = memref.load %arg7[%c17_182] : memref<24xf32, #tpu.memory_space<smem>>
      memref.store %630, %arg7[%c17_182] : memref<24xf32, #tpu.memory_space<smem>>
      %c18_183 = arith.constant 18 : index
      %632 = memref.load %arg8[%c18_183] : memref<24xf32, #tpu.memory_space<smem>>
      %c18_184 = arith.constant 18 : index
      %633 = memref.load %arg7[%c18_184] : memref<24xf32, #tpu.memory_space<smem>>
      memref.store %632, %arg7[%c18_184] : memref<24xf32, #tpu.memory_space<smem>>
      %c19_185 = arith.constant 19 : index
      %634 = memref.load %arg8[%c19_185] : memref<24xf32, #tpu.memory_space<smem>>
      %c19_186 = arith.constant 19 : index
      %635 = memref.load %arg7[%c19_186] : memref<24xf32, #tpu.memory_space<smem>>
      memref.store %634, %arg7[%c19_186] : memref<24xf32, #tpu.memory_space<smem>>
      %c20_187 = arith.constant 20 : index
      %636 = memref.load %arg8[%c20_187] : memref<24xf32, #tpu.memory_space<smem>>
      %c20_188 = arith.constant 20 : index
      %637 = memref.load %arg7[%c20_188] : memref<24xf32, #tpu.memory_space<smem>>
      memref.store %636, %arg7[%c20_188] : memref<24xf32, #tpu.memory_space<smem>>
      %c21_189 = arith.constant 21 : index
      %638 = memref.load %arg8[%c21_189] : memref<24xf32, #tpu.memory_space<smem>>
      %c21_190 = arith.constant 21 : index
      %639 = memref.load %arg7[%c21_190] : memref<24xf32, #tpu.memory_space<smem>>
      memref.store %638, %arg7[%c21_190] : memref<24xf32, #tpu.memory_space<smem>>
      %c22_191 = arith.constant 22 : index
      %640 = memref.load %arg8[%c22_191] : memref<24xf32, #tpu.memory_space<smem>>
      %c22_192 = arith.constant 22 : index
      %641 = memref.load %arg7[%c22_192] : memref<24xf32, #tpu.memory_space<smem>>
      memref.store %640, %arg7[%c22_192] : memref<24xf32, #tpu.memory_space<smem>>
      %c23_193 = arith.constant 23 : index
      %642 = memref.load %arg8[%c23_193] : memref<24xf32, #tpu.memory_space<smem>>
      %c23_194 = arith.constant 23 : index
      %643 = memref.load %arg7[%c23_194] : memref<24xf32, #tpu.memory_space<smem>>
      memref.store %642, %arg7[%c23_194] : memref<24xf32, #tpu.memory_space<smem>>
    } else {
    }
    return
  }
  func.func @transform_0(%arg0: i32, %arg1: i32) -> (i32, i32, i32) {
    %c0_i32 = arith.constant 0 : i32
    %c0_i32_0 = arith.constant 0 : i32
    return %arg0, %c0_i32, %arg1 : i32, i32, i32
  }
  func.func @transform_1(%arg0: i32, %arg1: i32) -> (i32, i32, i32) {
    %c0_i32 = arith.constant 0 : i32
    %c0_i32_0 = arith.constant 0 : i32
    return %arg0, %c0_i32, %arg1 : i32, i32, i32
  }
  func.func @transform_2(%arg0: i32, %arg1: i32) -> i32 {
    %c0_i32 = arith.constant 0 : i32
    %c0_i32_0 = arith.constant 0 : i32
    return %c0_i32 : i32
  }
  func.func @transform_3(%arg0: i32, %arg1: i32) -> i32 {
    %c0_i32 = arith.constant 0 : i32
    %c0_i32_0 = arith.constant 0 : i32
    return %c0_i32 : i32
  }
  func.func @transform_4(%arg0: i32, %arg1: i32) -> i32 {
    %c0_i32 = arith.constant 0 : i32
    %c0_i32_0 = arith.constant 0 : i32
    return %c0_i32 : i32
  }
  func.func @transform_5(%arg0: i32, %arg1: i32) -> i32 {
    %c0_i32 = arith.constant 0 : i32
    %c0_i32_0 = arith.constant 0 : i32
    return %c0_i32 : i32
  }
}

module attributes {stable_mosaic.version = 11 : i64} {
  func.func @kernel(%arg0: i32, %arg1: i32, %arg2: memref<1x4x256xf32, #tpu.memory_space<vmem>>, %arg3: memref<1x4x256xf32, #tpu.memory_space<vmem>>, %arg4: memref<2xf32, #tpu.memory_space<smem>>, %arg5: memref<32xf32, #tpu.memory_space<smem>>, %arg6: memref<8xf32, #tpu.memory_space<smem>>, %arg7: memref<8xf32, #tpu.memory_space<smem>>, %arg8: memref<1x4x256xf32, #tpu.memory_space<vmem>>, %arg9: memref<2xf32, #tpu.memory_space<smem>>, %arg10: memref<1xf32, #tpu.memory_space<smem>>) attributes {dimension_semantics = [#tpu.dimension_semantics<arbitrary>, #tpu.dimension_semantics<arbitrary>], iteration_bounds = array<i64: 2, 1>, scalar_prefetch = 0 : i64, scratch_operands = 1 : i64, tpu.core_type = #tpu.core_type<tc>, window_params = [{transform_indices = @transform_0, window_bounds = array<i64: 1, 4, 256>}, {transform_indices = @transform_1, window_bounds = array<i64: 1, 4, 256>}, {transform_indices = @transform_2, window_bounds = array<i64: 2>}, {transform_indices = @transform_3, window_bounds = array<i64: 32>}, {transform_indices = @transform_4, window_bounds = array<i64: 8>}, {transform_indices = @transform_5, window_bounds = array<i64: 8>}, {transform_indices = @transform_6, window_bounds = array<i64: 1, 4, 256>}, {transform_indices = @transform_7, window_bounds = array<i64: 2>}]} {
    %c0_i32 = arith.constant 0 : i32
    %0 = arith.cmpi eq, %arg1, %c0_i32 : i32
    %1 = arith.extui %0 : i1 to i32
    %c0_i32_0 = arith.constant 0 : i32
    %2 = arith.cmpi ne, %1, %c0_i32_0 : i32
    scf.if %2 {
      %cst_73 = arith.constant 0.000000e+00 : f32
      %c0_74 = arith.constant 0 : index
      %347 = memref.load %arg10[%c0_74] : memref<1xf32, #tpu.memory_space<smem>>
      memref.store %cst_73, %arg10[%c0_74] : memref<1xf32, #tpu.memory_space<smem>>
    } else {
    }
    %3 = arith.index_cast %arg0 : i32 to index
    %4 = memref.load %arg4[%3] : memref<2xf32, #tpu.memory_space<smem>>
    %c0 = arith.constant 0 : index
    %c0_1 = arith.constant 0 : index
    %c0_2 = arith.constant 0 : index
    %5 = vector.load %arg2[%c0, %c0_1, %c0_2] : memref<1x4x256xf32, #tpu.memory_space<vmem>>, vector<1x1x256xf32>
    %6 = vector.shape_cast %5 : vector<1x1x256xf32> to vector<1x256xf32>
    %c0_3 = arith.constant 0 : index
    %c1 = arith.constant 1 : index
    %c0_4 = arith.constant 0 : index
    %7 = vector.load %arg2[%c0_3, %c1, %c0_4] : memref<1x4x256xf32, #tpu.memory_space<vmem>>, vector<1x1x256xf32>
    %8 = vector.shape_cast %7 : vector<1x1x256xf32> to vector<1x256xf32>
    %c0_5 = arith.constant 0 : index
    %c2 = arith.constant 2 : index
    %c0_6 = arith.constant 0 : index
    %9 = vector.load %arg2[%c0_5, %c2, %c0_6] : memref<1x4x256xf32, #tpu.memory_space<vmem>>, vector<1x1x256xf32>
    %10 = vector.shape_cast %9 : vector<1x1x256xf32> to vector<1x256xf32>
    %c0_7 = arith.constant 0 : index
    %c3 = arith.constant 3 : index
    %c0_8 = arith.constant 0 : index
    %11 = vector.load %arg2[%c0_7, %c3, %c0_8] : memref<1x4x256xf32, #tpu.memory_space<vmem>>, vector<1x1x256xf32>
    %12 = vector.shape_cast %11 : vector<1x1x256xf32> to vector<1x256xf32>
    %c0_9 = arith.constant 0 : index
    %c0_10 = arith.constant 0 : index
    %c0_11 = arith.constant 0 : index
    %13 = vector.load %arg3[%c0_9, %c0_10, %c0_11] : memref<1x4x256xf32, #tpu.memory_space<vmem>>, vector<1x1x256xf32>
    %14 = vector.shape_cast %13 : vector<1x1x256xf32> to vector<1x256xf32>
    %15 = vector.broadcast %4 : f32 to vector<1x256xf32>
    %16 = arith.mulf %15, %14 : vector<1x256xf32>
    %17 = arith.addf %6, %16 : vector<1x256xf32>
    %c0_12 = arith.constant 0 : index
    %c1_13 = arith.constant 1 : index
    %c0_14 = arith.constant 0 : index
    %18 = vector.load %arg3[%c0_12, %c1_13, %c0_14] : memref<1x4x256xf32, #tpu.memory_space<vmem>>, vector<1x1x256xf32>
    %19 = vector.shape_cast %18 : vector<1x1x256xf32> to vector<1x256xf32>
    %20 = vector.broadcast %4 : f32 to vector<1x256xf32>
    %21 = arith.mulf %20, %19 : vector<1x256xf32>
    %22 = arith.addf %8, %21 : vector<1x256xf32>
    %c0_15 = arith.constant 0 : index
    %c2_16 = arith.constant 2 : index
    %c0_17 = arith.constant 0 : index
    %23 = vector.load %arg3[%c0_15, %c2_16, %c0_17] : memref<1x4x256xf32, #tpu.memory_space<vmem>>, vector<1x1x256xf32>
    %24 = vector.shape_cast %23 : vector<1x1x256xf32> to vector<1x256xf32>
    %25 = vector.broadcast %4 : f32 to vector<1x256xf32>
    %26 = arith.mulf %25, %24 : vector<1x256xf32>
    %27 = arith.addf %10, %26 : vector<1x256xf32>
    %c0_18 = arith.constant 0 : index
    %c3_19 = arith.constant 3 : index
    %c0_20 = arith.constant 0 : index
    %28 = vector.load %arg3[%c0_18, %c3_19, %c0_20] : memref<1x4x256xf32, #tpu.memory_space<vmem>>, vector<1x1x256xf32>
    %29 = vector.shape_cast %28 : vector<1x1x256xf32> to vector<1x256xf32>
    %30 = vector.broadcast %4 : f32 to vector<1x256xf32>
    %31 = arith.mulf %30, %29 : vector<1x256xf32>
    %32 = arith.addf %12, %31 : vector<1x256xf32>
    %c0_21 = arith.constant 0 : index
    %33 = memref.load %arg5[%c0_21] : memref<32xf32, #tpu.memory_space<smem>>
    %34 = vector.broadcast %33 : f32 to vector<1x256xf32>
    %35 = arith.mulf %17, %34 : vector<1x256xf32>
    %c4 = arith.constant 4 : index
    %36 = memref.load %arg5[%c4] : memref<32xf32, #tpu.memory_space<smem>>
    %37 = vector.broadcast %36 : f32 to vector<1x256xf32>
    %38 = arith.mulf %22, %37 : vector<1x256xf32>
    %39 = arith.addf %35, %38 : vector<1x256xf32>
    %c8 = arith.constant 8 : index
    %40 = memref.load %arg5[%c8] : memref<32xf32, #tpu.memory_space<smem>>
    %41 = vector.broadcast %40 : f32 to vector<1x256xf32>
    %42 = arith.mulf %27, %41 : vector<1x256xf32>
    %43 = arith.addf %39, %42 : vector<1x256xf32>
    %c12 = arith.constant 12 : index
    %44 = memref.load %arg5[%c12] : memref<32xf32, #tpu.memory_space<smem>>
    %45 = vector.broadcast %44 : f32 to vector<1x256xf32>
    %46 = arith.mulf %32, %45 : vector<1x256xf32>
    %47 = arith.addf %43, %46 : vector<1x256xf32>
    %c0_22 = arith.constant 0 : index
    %48 = memref.load %arg6[%c0_22] : memref<8xf32, #tpu.memory_space<smem>>
    %49 = vector.broadcast %48 : f32 to vector<1x256xf32>
    %50 = arith.addf %47, %49 : vector<1x256xf32>
    %c1_23 = arith.constant 1 : index
    %51 = memref.load %arg5[%c1_23] : memref<32xf32, #tpu.memory_space<smem>>
    %52 = vector.broadcast %51 : f32 to vector<1x256xf32>
    %53 = arith.mulf %17, %52 : vector<1x256xf32>
    %c5 = arith.constant 5 : index
    %54 = memref.load %arg5[%c5] : memref<32xf32, #tpu.memory_space<smem>>
    %55 = vector.broadcast %54 : f32 to vector<1x256xf32>
    %56 = arith.mulf %22, %55 : vector<1x256xf32>
    %57 = arith.addf %53, %56 : vector<1x256xf32>
    %c9 = arith.constant 9 : index
    %58 = memref.load %arg5[%c9] : memref<32xf32, #tpu.memory_space<smem>>
    %59 = vector.broadcast %58 : f32 to vector<1x256xf32>
    %60 = arith.mulf %27, %59 : vector<1x256xf32>
    %61 = arith.addf %57, %60 : vector<1x256xf32>
    %c13 = arith.constant 13 : index
    %62 = memref.load %arg5[%c13] : memref<32xf32, #tpu.memory_space<smem>>
    %63 = vector.broadcast %62 : f32 to vector<1x256xf32>
    %64 = arith.mulf %32, %63 : vector<1x256xf32>
    %65 = arith.addf %61, %64 : vector<1x256xf32>
    %c1_24 = arith.constant 1 : index
    %66 = memref.load %arg6[%c1_24] : memref<8xf32, #tpu.memory_space<smem>>
    %67 = vector.broadcast %66 : f32 to vector<1x256xf32>
    %68 = arith.addf %65, %67 : vector<1x256xf32>
    %c2_25 = arith.constant 2 : index
    %69 = memref.load %arg5[%c2_25] : memref<32xf32, #tpu.memory_space<smem>>
    %70 = vector.broadcast %69 : f32 to vector<1x256xf32>
    %71 = arith.mulf %17, %70 : vector<1x256xf32>
    %c6 = arith.constant 6 : index
    %72 = memref.load %arg5[%c6] : memref<32xf32, #tpu.memory_space<smem>>
    %73 = vector.broadcast %72 : f32 to vector<1x256xf32>
    %74 = arith.mulf %22, %73 : vector<1x256xf32>
    %75 = arith.addf %71, %74 : vector<1x256xf32>
    %c10 = arith.constant 10 : index
    %76 = memref.load %arg5[%c10] : memref<32xf32, #tpu.memory_space<smem>>
    %77 = vector.broadcast %76 : f32 to vector<1x256xf32>
    %78 = arith.mulf %27, %77 : vector<1x256xf32>
    %79 = arith.addf %75, %78 : vector<1x256xf32>
    %c14 = arith.constant 14 : index
    %80 = memref.load %arg5[%c14] : memref<32xf32, #tpu.memory_space<smem>>
    %81 = vector.broadcast %80 : f32 to vector<1x256xf32>
    %82 = arith.mulf %32, %81 : vector<1x256xf32>
    %83 = arith.addf %79, %82 : vector<1x256xf32>
    %c2_26 = arith.constant 2 : index
    %84 = memref.load %arg6[%c2_26] : memref<8xf32, #tpu.memory_space<smem>>
    %85 = vector.broadcast %84 : f32 to vector<1x256xf32>
    %86 = arith.addf %83, %85 : vector<1x256xf32>
    %c3_27 = arith.constant 3 : index
    %87 = memref.load %arg5[%c3_27] : memref<32xf32, #tpu.memory_space<smem>>
    %88 = vector.broadcast %87 : f32 to vector<1x256xf32>
    %89 = arith.mulf %17, %88 : vector<1x256xf32>
    %c7 = arith.constant 7 : index
    %90 = memref.load %arg5[%c7] : memref<32xf32, #tpu.memory_space<smem>>
    %91 = vector.broadcast %90 : f32 to vector<1x256xf32>
    %92 = arith.mulf %22, %91 : vector<1x256xf32>
    %93 = arith.addf %89, %92 : vector<1x256xf32>
    %c11 = arith.constant 11 : index
    %94 = memref.load %arg5[%c11] : memref<32xf32, #tpu.memory_space<smem>>
    %95 = vector.broadcast %94 : f32 to vector<1x256xf32>
    %96 = arith.mulf %27, %95 : vector<1x256xf32>
    %97 = arith.addf %93, %96 : vector<1x256xf32>
    %c15 = arith.constant 15 : index
    %98 = memref.load %arg5[%c15] : memref<32xf32, #tpu.memory_space<smem>>
    %99 = vector.broadcast %98 : f32 to vector<1x256xf32>
    %100 = arith.mulf %32, %99 : vector<1x256xf32>
    %101 = arith.addf %97, %100 : vector<1x256xf32>
    %c3_28 = arith.constant 3 : index
    %102 = memref.load %arg6[%c3_28] : memref<8xf32, #tpu.memory_space<smem>>
    %103 = vector.broadcast %102 : f32 to vector<1x256xf32>
    %104 = arith.addf %101, %103 : vector<1x256xf32>
    %105 = arith.maximumf %50, %68 : vector<1x256xf32>
    %106 = arith.maximumf %105, %86 : vector<1x256xf32>
    %107 = arith.maximumf %106, %104 : vector<1x256xf32>
    %108 = arith.subf %50, %107 : vector<1x256xf32>
    %109 = math.exp %108 : vector<1x256xf32>
    %110 = arith.subf %68, %107 : vector<1x256xf32>
    %111 = math.exp %110 : vector<1x256xf32>
    %112 = arith.subf %86, %107 : vector<1x256xf32>
    %113 = math.exp %112 : vector<1x256xf32>
    %114 = arith.subf %104, %107 : vector<1x256xf32>
    %115 = math.exp %114 : vector<1x256xf32>
    %116 = arith.addf %109, %111 : vector<1x256xf32>
    %117 = arith.addf %116, %113 : vector<1x256xf32>
    %118 = arith.addf %117, %115 : vector<1x256xf32>
    %119 = tpu.reciprocal %118 {approx = true} : vector<1x256xf32> -> vector<1x256xf32>
    %120 = arith.mulf %109, %119 : vector<1x256xf32>
    %121 = arith.mulf %111, %119 : vector<1x256xf32>
    %122 = arith.mulf %113, %119 : vector<1x256xf32>
    %123 = arith.mulf %115, %119 : vector<1x256xf32>
    %c16 = arith.constant 16 : index
    %124 = memref.load %arg5[%c16] : memref<32xf32, #tpu.memory_space<smem>>
    %125 = vector.broadcast %124 : f32 to vector<1x256xf32>
    %126 = arith.mulf %6, %125 : vector<1x256xf32>
    %c20 = arith.constant 20 : index
    %127 = memref.load %arg5[%c20] : memref<32xf32, #tpu.memory_space<smem>>
    %128 = vector.broadcast %127 : f32 to vector<1x256xf32>
    %129 = arith.mulf %8, %128 : vector<1x256xf32>
    %130 = arith.addf %126, %129 : vector<1x256xf32>
    %c24 = arith.constant 24 : index
    %131 = memref.load %arg5[%c24] : memref<32xf32, #tpu.memory_space<smem>>
    %132 = vector.broadcast %131 : f32 to vector<1x256xf32>
    %133 = arith.mulf %10, %132 : vector<1x256xf32>
    %134 = arith.addf %130, %133 : vector<1x256xf32>
    %c28 = arith.constant 28 : index
    %135 = memref.load %arg5[%c28] : memref<32xf32, #tpu.memory_space<smem>>
    %136 = vector.broadcast %135 : f32 to vector<1x256xf32>
    %137 = arith.mulf %12, %136 : vector<1x256xf32>
    %138 = arith.addf %134, %137 : vector<1x256xf32>
    %c4_29 = arith.constant 4 : index
    %139 = memref.load %arg6[%c4_29] : memref<8xf32, #tpu.memory_space<smem>>
    %140 = vector.broadcast %139 : f32 to vector<1x256xf32>
    %141 = arith.addf %138, %140 : vector<1x256xf32>
    %c17 = arith.constant 17 : index
    %142 = memref.load %arg5[%c17] : memref<32xf32, #tpu.memory_space<smem>>
    %143 = vector.broadcast %142 : f32 to vector<1x256xf32>
    %144 = arith.mulf %6, %143 : vector<1x256xf32>
    %c21 = arith.constant 21 : index
    %145 = memref.load %arg5[%c21] : memref<32xf32, #tpu.memory_space<smem>>
    %146 = vector.broadcast %145 : f32 to vector<1x256xf32>
    %147 = arith.mulf %8, %146 : vector<1x256xf32>
    %148 = arith.addf %144, %147 : vector<1x256xf32>
    %c25 = arith.constant 25 : index
    %149 = memref.load %arg5[%c25] : memref<32xf32, #tpu.memory_space<smem>>
    %150 = vector.broadcast %149 : f32 to vector<1x256xf32>
    %151 = arith.mulf %10, %150 : vector<1x256xf32>
    %152 = arith.addf %148, %151 : vector<1x256xf32>
    %c29 = arith.constant 29 : index
    %153 = memref.load %arg5[%c29] : memref<32xf32, #tpu.memory_space<smem>>
    %154 = vector.broadcast %153 : f32 to vector<1x256xf32>
    %155 = arith.mulf %12, %154 : vector<1x256xf32>
    %156 = arith.addf %152, %155 : vector<1x256xf32>
    %c5_30 = arith.constant 5 : index
    %157 = memref.load %arg6[%c5_30] : memref<8xf32, #tpu.memory_space<smem>>
    %158 = vector.broadcast %157 : f32 to vector<1x256xf32>
    %159 = arith.addf %156, %158 : vector<1x256xf32>
    %c18 = arith.constant 18 : index
    %160 = memref.load %arg5[%c18] : memref<32xf32, #tpu.memory_space<smem>>
    %161 = vector.broadcast %160 : f32 to vector<1x256xf32>
    %162 = arith.mulf %6, %161 : vector<1x256xf32>
    %c22 = arith.constant 22 : index
    %163 = memref.load %arg5[%c22] : memref<32xf32, #tpu.memory_space<smem>>
    %164 = vector.broadcast %163 : f32 to vector<1x256xf32>
    %165 = arith.mulf %8, %164 : vector<1x256xf32>
    %166 = arith.addf %162, %165 : vector<1x256xf32>
    %c26 = arith.constant 26 : index
    %167 = memref.load %arg5[%c26] : memref<32xf32, #tpu.memory_space<smem>>
    %168 = vector.broadcast %167 : f32 to vector<1x256xf32>
    %169 = arith.mulf %10, %168 : vector<1x256xf32>
    %170 = arith.addf %166, %169 : vector<1x256xf32>
    %c30 = arith.constant 30 : index
    %171 = memref.load %arg5[%c30] : memref<32xf32, #tpu.memory_space<smem>>
    %172 = vector.broadcast %171 : f32 to vector<1x256xf32>
    %173 = arith.mulf %12, %172 : vector<1x256xf32>
    %174 = arith.addf %170, %173 : vector<1x256xf32>
    %c6_31 = arith.constant 6 : index
    %175 = memref.load %arg6[%c6_31] : memref<8xf32, #tpu.memory_space<smem>>
    %176 = vector.broadcast %175 : f32 to vector<1x256xf32>
    %177 = arith.addf %174, %176 : vector<1x256xf32>
    %c19 = arith.constant 19 : index
    %178 = memref.load %arg5[%c19] : memref<32xf32, #tpu.memory_space<smem>>
    %179 = vector.broadcast %178 : f32 to vector<1x256xf32>
    %180 = arith.mulf %6, %179 : vector<1x256xf32>
    %c23 = arith.constant 23 : index
    %181 = memref.load %arg5[%c23] : memref<32xf32, #tpu.memory_space<smem>>
    %182 = vector.broadcast %181 : f32 to vector<1x256xf32>
    %183 = arith.mulf %8, %182 : vector<1x256xf32>
    %184 = arith.addf %180, %183 : vector<1x256xf32>
    %c27 = arith.constant 27 : index
    %185 = memref.load %arg5[%c27] : memref<32xf32, #tpu.memory_space<smem>>
    %186 = vector.broadcast %185 : f32 to vector<1x256xf32>
    %187 = arith.mulf %10, %186 : vector<1x256xf32>
    %188 = arith.addf %184, %187 : vector<1x256xf32>
    %c31 = arith.constant 31 : index
    %189 = memref.load %arg5[%c31] : memref<32xf32, #tpu.memory_space<smem>>
    %190 = vector.broadcast %189 : f32 to vector<1x256xf32>
    %191 = arith.mulf %12, %190 : vector<1x256xf32>
    %192 = arith.addf %188, %191 : vector<1x256xf32>
    %c7_32 = arith.constant 7 : index
    %193 = memref.load %arg6[%c7_32] : memref<8xf32, #tpu.memory_space<smem>>
    %194 = vector.broadcast %193 : f32 to vector<1x256xf32>
    %195 = arith.addf %192, %194 : vector<1x256xf32>
    %196 = arith.maximumf %141, %159 : vector<1x256xf32>
    %197 = arith.maximumf %196, %177 : vector<1x256xf32>
    %198 = arith.maximumf %197, %195 : vector<1x256xf32>
    %199 = arith.subf %141, %198 : vector<1x256xf32>
    %200 = math.exp %199 : vector<1x256xf32>
    %201 = arith.subf %159, %198 : vector<1x256xf32>
    %202 = math.exp %201 : vector<1x256xf32>
    %203 = arith.subf %177, %198 : vector<1x256xf32>
    %204 = math.exp %203 : vector<1x256xf32>
    %205 = arith.subf %195, %198 : vector<1x256xf32>
    %206 = math.exp %205 : vector<1x256xf32>
    %207 = arith.addf %200, %202 : vector<1x256xf32>
    %208 = arith.addf %207, %204 : vector<1x256xf32>
    %209 = arith.addf %208, %206 : vector<1x256xf32>
    %210 = tpu.reciprocal %209 {approx = true} : vector<1x256xf32> -> vector<1x256xf32>
    %211 = arith.mulf %200, %210 : vector<1x256xf32>
    %212 = arith.mulf %202, %210 : vector<1x256xf32>
    %213 = arith.mulf %204, %210 : vector<1x256xf32>
    %214 = arith.mulf %206, %210 : vector<1x256xf32>
    %c0_33 = arith.constant 0 : index
    %215 = memref.load %arg7[%c0_33] : memref<8xf32, #tpu.memory_space<smem>>
    %216 = vector.broadcast %215 : f32 to vector<1x256xf32>
    %217 = arith.mulf %216, %120 : vector<1x256xf32>
    %c4_34 = arith.constant 4 : index
    %218 = memref.load %arg7[%c4_34] : memref<8xf32, #tpu.memory_space<smem>>
    %219 = vector.broadcast %218 : f32 to vector<1x256xf32>
    %220 = arith.mulf %219, %211 : vector<1x256xf32>
    %221 = arith.addf %217, %220 : vector<1x256xf32>
    %c1_35 = arith.constant 1 : index
    %222 = memref.load %arg7[%c1_35] : memref<8xf32, #tpu.memory_space<smem>>
    %223 = vector.broadcast %222 : f32 to vector<1x256xf32>
    %224 = arith.mulf %223, %121 : vector<1x256xf32>
    %c5_36 = arith.constant 5 : index
    %225 = memref.load %arg7[%c5_36] : memref<8xf32, #tpu.memory_space<smem>>
    %226 = vector.broadcast %225 : f32 to vector<1x256xf32>
    %227 = arith.mulf %226, %212 : vector<1x256xf32>
    %228 = arith.addf %224, %227 : vector<1x256xf32>
    %c2_37 = arith.constant 2 : index
    %229 = memref.load %arg7[%c2_37] : memref<8xf32, #tpu.memory_space<smem>>
    %230 = vector.broadcast %229 : f32 to vector<1x256xf32>
    %231 = arith.mulf %230, %122 : vector<1x256xf32>
    %c6_38 = arith.constant 6 : index
    %232 = memref.load %arg7[%c6_38] : memref<8xf32, #tpu.memory_space<smem>>
    %233 = vector.broadcast %232 : f32 to vector<1x256xf32>
    %234 = arith.mulf %233, %213 : vector<1x256xf32>
    %235 = arith.addf %231, %234 : vector<1x256xf32>
    %c3_39 = arith.constant 3 : index
    %236 = memref.load %arg7[%c3_39] : memref<8xf32, #tpu.memory_space<smem>>
    %237 = vector.broadcast %236 : f32 to vector<1x256xf32>
    %238 = arith.mulf %237, %123 : vector<1x256xf32>
    %c7_40 = arith.constant 7 : index
    %239 = memref.load %arg7[%c7_40] : memref<8xf32, #tpu.memory_space<smem>>
    %240 = vector.broadcast %239 : f32 to vector<1x256xf32>
    %241 = arith.mulf %240, %214 : vector<1x256xf32>
    %242 = arith.addf %238, %241 : vector<1x256xf32>
    %243 = arith.mulf %221, %120 : vector<1x256xf32>
    %244 = arith.mulf %228, %121 : vector<1x256xf32>
    %245 = arith.addf %243, %244 : vector<1x256xf32>
    %246 = arith.mulf %235, %122 : vector<1x256xf32>
    %247 = arith.addf %245, %246 : vector<1x256xf32>
    %248 = arith.mulf %242, %123 : vector<1x256xf32>
    %249 = arith.addf %247, %248 : vector<1x256xf32>
    %250 = arith.subf %221, %249 : vector<1x256xf32>
    %251 = arith.mulf %120, %250 : vector<1x256xf32>
    %252 = arith.subf %228, %249 : vector<1x256xf32>
    %253 = arith.mulf %121, %252 : vector<1x256xf32>
    %254 = arith.subf %235, %249 : vector<1x256xf32>
    %255 = arith.mulf %122, %254 : vector<1x256xf32>
    %256 = arith.subf %242, %249 : vector<1x256xf32>
    %257 = arith.mulf %123, %256 : vector<1x256xf32>
    %c0_41 = arith.constant 0 : index
    %258 = memref.load %arg5[%c0_41] : memref<32xf32, #tpu.memory_space<smem>>
    %259 = vector.broadcast %258 : f32 to vector<1x256xf32>
    %260 = arith.mulf %251, %259 : vector<1x256xf32>
    %c1_42 = arith.constant 1 : index
    %261 = memref.load %arg5[%c1_42] : memref<32xf32, #tpu.memory_space<smem>>
    %262 = vector.broadcast %261 : f32 to vector<1x256xf32>
    %263 = arith.mulf %253, %262 : vector<1x256xf32>
    %264 = arith.addf %260, %263 : vector<1x256xf32>
    %c2_43 = arith.constant 2 : index
    %265 = memref.load %arg5[%c2_43] : memref<32xf32, #tpu.memory_space<smem>>
    %266 = vector.broadcast %265 : f32 to vector<1x256xf32>
    %267 = arith.mulf %255, %266 : vector<1x256xf32>
    %268 = arith.addf %264, %267 : vector<1x256xf32>
    %c3_44 = arith.constant 3 : index
    %269 = memref.load %arg5[%c3_44] : memref<32xf32, #tpu.memory_space<smem>>
    %270 = vector.broadcast %269 : f32 to vector<1x256xf32>
    %271 = arith.mulf %257, %270 : vector<1x256xf32>
    %272 = arith.addf %268, %271 : vector<1x256xf32>
    %c0_45 = arith.constant 0 : index
    %c0_46 = arith.constant 0 : index
    %c0_47 = arith.constant 0 : index
    %273 = vector.load %arg8[%c0_45, %c0_46, %c0_47] : memref<1x4x256xf32, #tpu.memory_space<vmem>>, vector<1x1x256xf32>
    %274 = vector.shape_cast %273 : vector<1x1x256xf32> to vector<1x256xf32>
    %275 = vector.shape_cast %272 : vector<1x256xf32> to vector<1x1x256xf32>
    tpu.vector_store %arg8[%c0_45, %c0_46, %c0_47], %275 {strides = array<i32>} : memref<1x4x256xf32, #tpu.memory_space<vmem>>, vector<1x1x256xf32>,
    %276 = arith.mulf %272, %272 : vector<1x256xf32>
    %c4_48 = arith.constant 4 : index
    %277 = memref.load %arg5[%c4_48] : memref<32xf32, #tpu.memory_space<smem>>
    %278 = vector.broadcast %277 : f32 to vector<1x256xf32>
    %279 = arith.mulf %251, %278 : vector<1x256xf32>
    %c5_49 = arith.constant 5 : index
    %280 = memref.load %arg5[%c5_49] : memref<32xf32, #tpu.memory_space<smem>>
    %281 = vector.broadcast %280 : f32 to vector<1x256xf32>
    %282 = arith.mulf %253, %281 : vector<1x256xf32>
    %283 = arith.addf %279, %282 : vector<1x256xf32>
    %c6_50 = arith.constant 6 : index
    %284 = memref.load %arg5[%c6_50] : memref<32xf32, #tpu.memory_space<smem>>
    %285 = vector.broadcast %284 : f32 to vector<1x256xf32>
    %286 = arith.mulf %255, %285 : vector<1x256xf32>
    %287 = arith.addf %283, %286 : vector<1x256xf32>
    %c7_51 = arith.constant 7 : index
    %288 = memref.load %arg5[%c7_51] : memref<32xf32, #tpu.memory_space<smem>>
    %289 = vector.broadcast %288 : f32 to vector<1x256xf32>
    %290 = arith.mulf %257, %289 : vector<1x256xf32>
    %291 = arith.addf %287, %290 : vector<1x256xf32>
    %c0_52 = arith.constant 0 : index
    %c1_53 = arith.constant 1 : index
    %c0_54 = arith.constant 0 : index
    %292 = vector.load %arg8[%c0_52, %c1_53, %c0_54] : memref<1x4x256xf32, #tpu.memory_space<vmem>>, vector<1x1x256xf32>
    %293 = vector.shape_cast %292 : vector<1x1x256xf32> to vector<1x256xf32>
    %294 = vector.shape_cast %291 : vector<1x256xf32> to vector<1x1x256xf32>
    tpu.vector_store %arg8[%c0_52, %c1_53, %c0_54], %294 {strides = array<i32>} : memref<1x4x256xf32, #tpu.memory_space<vmem>>, vector<1x1x256xf32>,
    %295 = arith.mulf %291, %291 : vector<1x256xf32>
    %296 = arith.addf %276, %295 : vector<1x256xf32>
    %c8_55 = arith.constant 8 : index
    %297 = memref.load %arg5[%c8_55] : memref<32xf32, #tpu.memory_space<smem>>
    %298 = vector.broadcast %297 : f32 to vector<1x256xf32>
    %299 = arith.mulf %251, %298 : vector<1x256xf32>
    %c9_56 = arith.constant 9 : index
    %300 = memref.load %arg5[%c9_56] : memref<32xf32, #tpu.memory_space<smem>>
    %301 = vector.broadcast %300 : f32 to vector<1x256xf32>
    %302 = arith.mulf %253, %301 : vector<1x256xf32>
    %303 = arith.addf %299, %302 : vector<1x256xf32>
    %c10_57 = arith.constant 10 : index
    %304 = memref.load %arg5[%c10_57] : memref<32xf32, #tpu.memory_space<smem>>
    %305 = vector.broadcast %304 : f32 to vector<1x256xf32>
    %306 = arith.mulf %255, %305 : vector<1x256xf32>
    %307 = arith.addf %303, %306 : vector<1x256xf32>
    %c11_58 = arith.constant 11 : index
    %308 = memref.load %arg5[%c11_58] : memref<32xf32, #tpu.memory_space<smem>>
    %309 = vector.broadcast %308 : f32 to vector<1x256xf32>
    %310 = arith.mulf %257, %309 : vector<1x256xf32>
    %311 = arith.addf %307, %310 : vector<1x256xf32>
    %c0_59 = arith.constant 0 : index
    %c2_60 = arith.constant 2 : index
    %c0_61 = arith.constant 0 : index
    %312 = vector.load %arg8[%c0_59, %c2_60, %c0_61] : memref<1x4x256xf32, #tpu.memory_space<vmem>>, vector<1x1x256xf32>
    %313 = vector.shape_cast %312 : vector<1x1x256xf32> to vector<1x256xf32>
    %314 = vector.shape_cast %311 : vector<1x256xf32> to vector<1x1x256xf32>
    tpu.vector_store %arg8[%c0_59, %c2_60, %c0_61], %314 {strides = array<i32>} : memref<1x4x256xf32, #tpu.memory_space<vmem>>, vector<1x1x256xf32>,
    %315 = arith.mulf %311, %311 : vector<1x256xf32>
    %316 = arith.addf %296, %315 : vector<1x256xf32>
    %c12_62 = arith.constant 12 : index
    %317 = memref.load %arg5[%c12_62] : memref<32xf32, #tpu.memory_space<smem>>
    %318 = vector.broadcast %317 : f32 to vector<1x256xf32>
    %319 = arith.mulf %251, %318 : vector<1x256xf32>
    %c13_63 = arith.constant 13 : index
    %320 = memref.load %arg5[%c13_63] : memref<32xf32, #tpu.memory_space<smem>>
    %321 = vector.broadcast %320 : f32 to vector<1x256xf32>
    %322 = arith.mulf %253, %321 : vector<1x256xf32>
    %323 = arith.addf %319, %322 : vector<1x256xf32>
    %c14_64 = arith.constant 14 : index
    %324 = memref.load %arg5[%c14_64] : memref<32xf32, #tpu.memory_space<smem>>
    %325 = vector.broadcast %324 : f32 to vector<1x256xf32>
    %326 = arith.mulf %255, %325 : vector<1x256xf32>
    %327 = arith.addf %323, %326 : vector<1x256xf32>
    %c15_65 = arith.constant 15 : index
    %328 = memref.load %arg5[%c15_65] : memref<32xf32, #tpu.memory_space<smem>>
    %329 = vector.broadcast %328 : f32 to vector<1x256xf32>
    %330 = arith.mulf %257, %329 : vector<1x256xf32>
    %331 = arith.addf %327, %330 : vector<1x256xf32>
    %c0_66 = arith.constant 0 : index
    %c3_67 = arith.constant 3 : index
    %c0_68 = arith.constant 0 : index
    %332 = vector.load %arg8[%c0_66, %c3_67, %c0_68] : memref<1x4x256xf32, #tpu.memory_space<vmem>>, vector<1x1x256xf32>
    %333 = vector.shape_cast %332 : vector<1x1x256xf32> to vector<1x256xf32>
    %334 = vector.shape_cast %331 : vector<1x256xf32> to vector<1x1x256xf32>
    tpu.vector_store %arg8[%c0_66, %c3_67, %c0_68], %334 {strides = array<i32>} : memref<1x4x256xf32, #tpu.memory_space<vmem>>, vector<1x1x256xf32>,
    %335 = arith.mulf %331, %331 : vector<1x256xf32>
    %336 = arith.addf %316, %335 : vector<1x256xf32>
    %c0_69 = arith.constant 0 : index
    %337 = memref.load %arg10[%c0_69] : memref<1xf32, #tpu.memory_space<smem>>
    %338 = vector.shape_cast %336 : vector<1x256xf32> to vector<1x1x256xf32>
    %cst = arith.constant dense<0.000000e+00> : vector<1xf32>
    %339 = vector.multi_reduction <add>, %338, %cst [1, 2] : vector<1x1x256xf32> to vector<1xf32>
    %340 = vector.shape_cast %339 : vector<1xf32> to vector<1x1x1xf32>
    %341 = vector.extract %340[0, 0, 0] : f32 from vector<1x1x1xf32>
    %342 = arith.addf %337, %341 : f32
    %c0_70 = arith.constant 0 : index
    %343 = memref.load %arg10[%c0_70] : memref<1xf32, #tpu.memory_space<smem>>
    memref.store %342, %arg10[%c0_70] : memref<1xf32, #tpu.memory_space<smem>>
    %c0_i32_71 = arith.constant 0 : i32
    %344 = arith.cmpi eq, %arg1, %c0_i32_71 : i32
    %345 = arith.extui %344 : i1 to i32
    %c0_i32_72 = arith.constant 0 : i32
    %346 = arith.cmpi ne, %345, %c0_i32_72 : i32
    scf.if %346 {
      %c0_73 = arith.constant 0 : index
      %347 = memref.load %arg10[%c0_73] : memref<1xf32, #tpu.memory_space<smem>>
      %348 = arith.index_cast %arg0 : i32 to index
      %349 = memref.load %arg9[%348] : memref<2xf32, #tpu.memory_space<smem>>
      memref.store %347, %arg9[%348] : memref<2xf32, #tpu.memory_space<smem>>
    } else {
    }
    return
  }
  func.func @transform_0(%arg0: i32, %arg1: i32) -> (i32, i32, i32) {
    %c0_i32 = arith.constant 0 : i32
    %c0_i32_0 = arith.constant 0 : i32
    return %arg0, %c0_i32, %arg1 : i32, i32, i32
  }
  func.func @transform_1(%arg0: i32, %arg1: i32) -> (i32, i32, i32) {
    %c0_i32 = arith.constant 0 : i32
    %c0_i32_0 = arith.constant 0 : i32
    return %arg0, %c0_i32, %arg1 : i32, i32, i32
  }
  func.func @transform_2(%arg0: i32, %arg1: i32) -> i32 {
    %c0_i32 = arith.constant 0 : i32
    %c0_i32_0 = arith.constant 0 : i32
    return %c0_i32 : i32
  }
  func.func @transform_3(%arg0: i32, %arg1: i32) -> i32 {
    %c0_i32 = arith.constant 0 : i32
    %c0_i32_0 = arith.constant 0 : i32
    return %c0_i32 : i32
  }
  func.func @transform_4(%arg0: i32, %arg1: i32) -> i32 {
    %c0_i32 = arith.constant 0 : i32
    %c0_i32_0 = arith.constant 0 : i32
    return %c0_i32 : i32
  }
  func.func @transform_5(%arg0: i32, %arg1: i32) -> i32 {
    %c0_i32 = arith.constant 0 : i32
    %c0_i32_0 = arith.constant 0 : i32
    return %c0_i32 : i32
  }
  func.func @transform_6(%arg0: i32, %arg1: i32) -> (i32, i32, i32) {
    %c0_i32 = arith.constant 0 : i32
    %c0_i32_0 = arith.constant 0 : i32
    return %arg0, %c0_i32, %arg1 : i32, i32, i32
  }
  func.func @transform_7(%arg0: i32, %arg1: i32) -> i32 {
    %c0_i32 = arith.constant 0 : i32
    %c0_i32_0 = arith.constant 0 : i32
    return %c0_i32 : i32
  }
}

module attributes {stable_mosaic.version = 11 : i64} {
  func.func @kernel(%arg0: i32, %arg1: i32, %arg2: memref<1x4x256xf32, #tpu.memory_space<vmem>>, %arg3: memref<1x4x256xf32, #tpu.memory_space<vmem>>, %arg4: memref<2xf32, #tpu.memory_space<smem>>, %arg5: memref<32xf32, #tpu.memory_space<smem>>, %arg6: memref<8xf32, #tpu.memory_space<smem>>, %arg7: memref<12xf32, #tpu.memory_space<smem>>, %arg8: memref<12xf32, #tpu.memory_space<smem>>) attributes {dimension_semantics = [#tpu.dimension_semantics<arbitrary>, #tpu.dimension_semantics<arbitrary>], iteration_bounds = array<i64: 2, 1>, scalar_prefetch = 0 : i64, scratch_operands = 1 : i64, tpu.core_type = #tpu.core_type<tc>, window_params = [{transform_indices = @transform_0, window_bounds = array<i64: 1, 4, 256>}, {transform_indices = @transform_1, window_bounds = array<i64: 1, 4, 256>}, {transform_indices = @transform_2, window_bounds = array<i64: 2>}, {transform_indices = @transform_3, window_bounds = array<i64: 32>}, {transform_indices = @transform_4, window_bounds = array<i64: 8>}, {transform_indices = @transform_5, window_bounds = array<i64: 12>}]} {
    %c0_i32 = arith.constant 0 : i32
    %0 = arith.cmpi eq, %arg0, %c0_i32 : i32
    %c0_i32_0 = arith.constant 0 : i32
    %1 = arith.cmpi eq, %arg1, %c0_i32_0 : i32
    %2 = arith.andi %0, %1 : i1
    %3 = arith.extui %2 : i1 to i32
    %c0_i32_1 = arith.constant 0 : i32
    %4 = arith.cmpi ne, %3, %c0_i32_1 : i32
    scf.if %4 {
      %cst_71 = arith.constant 0.000000e+00 : f32
      %c0_72 = arith.constant 0 : index
      %318 = memref.load %arg8[%c0_72] : memref<12xf32, #tpu.memory_space<smem>>
      memref.store %cst_71, %arg8[%c0_72] : memref<12xf32, #tpu.memory_space<smem>>
      %cst_73 = arith.constant 0.000000e+00 : f32
      %c1_74 = arith.constant 1 : index
      %319 = memref.load %arg8[%c1_74] : memref<12xf32, #tpu.memory_space<smem>>
      memref.store %cst_73, %arg8[%c1_74] : memref<12xf32, #tpu.memory_space<smem>>
      %cst_75 = arith.constant 0.000000e+00 : f32
      %c2_76 = arith.constant 2 : index
      %320 = memref.load %arg8[%c2_76] : memref<12xf32, #tpu.memory_space<smem>>
      memref.store %cst_75, %arg8[%c2_76] : memref<12xf32, #tpu.memory_space<smem>>
      %cst_77 = arith.constant 0.000000e+00 : f32
      %c3_78 = arith.constant 3 : index
      %321 = memref.load %arg8[%c3_78] : memref<12xf32, #tpu.memory_space<smem>>
      memref.store %cst_77, %arg8[%c3_78] : memref<12xf32, #tpu.memory_space<smem>>
      %cst_79 = arith.constant 0.000000e+00 : f32
      %c4_80 = arith.constant 4 : index
      %322 = memref.load %arg8[%c4_80] : memref<12xf32, #tpu.memory_space<smem>>
      memref.store %cst_79, %arg8[%c4_80] : memref<12xf32, #tpu.memory_space<smem>>
      %cst_81 = arith.constant 0.000000e+00 : f32
      %c5_82 = arith.constant 5 : index
      %323 = memref.load %arg8[%c5_82] : memref<12xf32, #tpu.memory_space<smem>>
      memref.store %cst_81, %arg8[%c5_82] : memref<12xf32, #tpu.memory_space<smem>>
      %cst_83 = arith.constant 0.000000e+00 : f32
      %c6_84 = arith.constant 6 : index
      %324 = memref.load %arg8[%c6_84] : memref<12xf32, #tpu.memory_space<smem>>
      memref.store %cst_83, %arg8[%c6_84] : memref<12xf32, #tpu.memory_space<smem>>
      %cst_85 = arith.constant 0.000000e+00 : f32
      %c7_86 = arith.constant 7 : index
      %325 = memref.load %arg8[%c7_86] : memref<12xf32, #tpu.memory_space<smem>>
      memref.store %cst_85, %arg8[%c7_86] : memref<12xf32, #tpu.memory_space<smem>>
      %cst_87 = arith.constant 0.000000e+00 : f32
      %c8_88 = arith.constant 8 : index
      %326 = memref.load %arg8[%c8_88] : memref<12xf32, #tpu.memory_space<smem>>
      memref.store %cst_87, %arg8[%c8_88] : memref<12xf32, #tpu.memory_space<smem>>
      %cst_89 = arith.constant 0.000000e+00 : f32
      %c9_90 = arith.constant 9 : index
      %327 = memref.load %arg8[%c9_90] : memref<12xf32, #tpu.memory_space<smem>>
      memref.store %cst_89, %arg8[%c9_90] : memref<12xf32, #tpu.memory_space<smem>>
      %cst_91 = arith.constant 0.000000e+00 : f32
      %c10_92 = arith.constant 10 : index
      %328 = memref.load %arg8[%c10_92] : memref<12xf32, #tpu.memory_space<smem>>
      memref.store %cst_91, %arg8[%c10_92] : memref<12xf32, #tpu.memory_space<smem>>
      %cst_93 = arith.constant 0.000000e+00 : f32
      %c11_94 = arith.constant 11 : index
      %329 = memref.load %arg8[%c11_94] : memref<12xf32, #tpu.memory_space<smem>>
      memref.store %cst_93, %arg8[%c11_94] : memref<12xf32, #tpu.memory_space<smem>>
    } else {
    }
    %5 = arith.index_cast %arg0 : i32 to index
    %6 = memref.load %arg4[%5] : memref<2xf32, #tpu.memory_space<smem>>
    %c0 = arith.constant 0 : index
    %c0_2 = arith.constant 0 : index
    %c0_3 = arith.constant 0 : index
    %7 = vector.load %arg2[%c0, %c0_2, %c0_3] : memref<1x4x256xf32, #tpu.memory_space<vmem>>, vector<1x1x256xf32>
    %8 = vector.shape_cast %7 : vector<1x1x256xf32> to vector<1x256xf32>
    %c0_4 = arith.constant 0 : index
    %c1 = arith.constant 1 : index
    %c0_5 = arith.constant 0 : index
    %9 = vector.load %arg2[%c0_4, %c1, %c0_5] : memref<1x4x256xf32, #tpu.memory_space<vmem>>, vector<1x1x256xf32>
    %10 = vector.shape_cast %9 : vector<1x1x256xf32> to vector<1x256xf32>
    %c0_6 = arith.constant 0 : index
    %c2 = arith.constant 2 : index
    %c0_7 = arith.constant 0 : index
    %11 = vector.load %arg2[%c0_6, %c2, %c0_7] : memref<1x4x256xf32, #tpu.memory_space<vmem>>, vector<1x1x256xf32>
    %12 = vector.shape_cast %11 : vector<1x1x256xf32> to vector<1x256xf32>
    %c0_8 = arith.constant 0 : index
    %c3 = arith.constant 3 : index
    %c0_9 = arith.constant 0 : index
    %13 = vector.load %arg2[%c0_8, %c3, %c0_9] : memref<1x4x256xf32, #tpu.memory_space<vmem>>, vector<1x1x256xf32>
    %14 = vector.shape_cast %13 : vector<1x1x256xf32> to vector<1x256xf32>
    %c0_10 = arith.constant 0 : index
    %c0_11 = arith.constant 0 : index
    %c0_12 = arith.constant 0 : index
    %15 = vector.load %arg3[%c0_10, %c0_11, %c0_12] : memref<1x4x256xf32, #tpu.memory_space<vmem>>, vector<1x1x256xf32>
    %16 = vector.shape_cast %15 : vector<1x1x256xf32> to vector<1x256xf32>
    %17 = vector.broadcast %6 : f32 to vector<1x256xf32>
    %18 = arith.mulf %17, %16 : vector<1x256xf32>
    %19 = arith.addf %8, %18 : vector<1x256xf32>
    %c0_13 = arith.constant 0 : index
    %c1_14 = arith.constant 1 : index
    %c0_15 = arith.constant 0 : index
    %20 = vector.load %arg3[%c0_13, %c1_14, %c0_15] : memref<1x4x256xf32, #tpu.memory_space<vmem>>, vector<1x1x256xf32>
    %21 = vector.shape_cast %20 : vector<1x1x256xf32> to vector<1x256xf32>
    %22 = vector.broadcast %6 : f32 to vector<1x256xf32>
    %23 = arith.mulf %22, %21 : vector<1x256xf32>
    %24 = arith.addf %10, %23 : vector<1x256xf32>
    %c0_16 = arith.constant 0 : index
    %c2_17 = arith.constant 2 : index
    %c0_18 = arith.constant 0 : index
    %25 = vector.load %arg3[%c0_16, %c2_17, %c0_18] : memref<1x4x256xf32, #tpu.memory_space<vmem>>, vector<1x1x256xf32>
    %26 = vector.shape_cast %25 : vector<1x1x256xf32> to vector<1x256xf32>
    %27 = vector.broadcast %6 : f32 to vector<1x256xf32>
    %28 = arith.mulf %27, %26 : vector<1x256xf32>
    %29 = arith.addf %12, %28 : vector<1x256xf32>
    %c0_19 = arith.constant 0 : index
    %c3_20 = arith.constant 3 : index
    %c0_21 = arith.constant 0 : index
    %30 = vector.load %arg3[%c0_19, %c3_20, %c0_21] : memref<1x4x256xf32, #tpu.memory_space<vmem>>, vector<1x1x256xf32>
    %31 = vector.shape_cast %30 : vector<1x1x256xf32> to vector<1x256xf32>
    %32 = vector.broadcast %6 : f32 to vector<1x256xf32>
    %33 = arith.mulf %32, %31 : vector<1x256xf32>
    %34 = arith.addf %14, %33 : vector<1x256xf32>
    %c0_22 = arith.constant 0 : index
    %35 = memref.load %arg5[%c0_22] : memref<32xf32, #tpu.memory_space<smem>>
    %36 = vector.broadcast %35 : f32 to vector<1x256xf32>
    %37 = arith.mulf %19, %36 : vector<1x256xf32>
    %c4 = arith.constant 4 : index
    %38 = memref.load %arg5[%c4] : memref<32xf32, #tpu.memory_space<smem>>
    %39 = vector.broadcast %38 : f32 to vector<1x256xf32>
    %40 = arith.mulf %24, %39 : vector<1x256xf32>
    %41 = arith.addf %37, %40 : vector<1x256xf32>
    %c8 = arith.constant 8 : index
    %42 = memref.load %arg5[%c8] : memref<32xf32, #tpu.memory_space<smem>>
    %43 = vector.broadcast %42 : f32 to vector<1x256xf32>
    %44 = arith.mulf %29, %43 : vector<1x256xf32>
    %45 = arith.addf %41, %44 : vector<1x256xf32>
    %c12 = arith.constant 12 : index
    %46 = memref.load %arg5[%c12] : memref<32xf32, #tpu.memory_space<smem>>
    %47 = vector.broadcast %46 : f32 to vector<1x256xf32>
    %48 = arith.mulf %34, %47 : vector<1x256xf32>
    %49 = arith.addf %45, %48 : vector<1x256xf32>
    %c0_23 = arith.constant 0 : index
    %50 = memref.load %arg6[%c0_23] : memref<8xf32, #tpu.memory_space<smem>>
    %51 = vector.broadcast %50 : f32 to vector<1x256xf32>
    %52 = arith.addf %49, %51 : vector<1x256xf32>
    %c1_24 = arith.constant 1 : index
    %53 = memref.load %arg5[%c1_24] : memref<32xf32, #tpu.memory_space<smem>>
    %54 = vector.broadcast %53 : f32 to vector<1x256xf32>
    %55 = arith.mulf %19, %54 : vector<1x256xf32>
    %c5 = arith.constant 5 : index
    %56 = memref.load %arg5[%c5] : memref<32xf32, #tpu.memory_space<smem>>
    %57 = vector.broadcast %56 : f32 to vector<1x256xf32>
    %58 = arith.mulf %24, %57 : vector<1x256xf32>
    %59 = arith.addf %55, %58 : vector<1x256xf32>
    %c9 = arith.constant 9 : index
    %60 = memref.load %arg5[%c9] : memref<32xf32, #tpu.memory_space<smem>>
    %61 = vector.broadcast %60 : f32 to vector<1x256xf32>
    %62 = arith.mulf %29, %61 : vector<1x256xf32>
    %63 = arith.addf %59, %62 : vector<1x256xf32>
    %c13 = arith.constant 13 : index
    %64 = memref.load %arg5[%c13] : memref<32xf32, #tpu.memory_space<smem>>
    %65 = vector.broadcast %64 : f32 to vector<1x256xf32>
    %66 = arith.mulf %34, %65 : vector<1x256xf32>
    %67 = arith.addf %63, %66 : vector<1x256xf32>
    %c1_25 = arith.constant 1 : index
    %68 = memref.load %arg6[%c1_25] : memref<8xf32, #tpu.memory_space<smem>>
    %69 = vector.broadcast %68 : f32 to vector<1x256xf32>
    %70 = arith.addf %67, %69 : vector<1x256xf32>
    %c2_26 = arith.constant 2 : index
    %71 = memref.load %arg5[%c2_26] : memref<32xf32, #tpu.memory_space<smem>>
    %72 = vector.broadcast %71 : f32 to vector<1x256xf32>
    %73 = arith.mulf %19, %72 : vector<1x256xf32>
    %c6 = arith.constant 6 : index
    %74 = memref.load %arg5[%c6] : memref<32xf32, #tpu.memory_space<smem>>
    %75 = vector.broadcast %74 : f32 to vector<1x256xf32>
    %76 = arith.mulf %24, %75 : vector<1x256xf32>
    %77 = arith.addf %73, %76 : vector<1x256xf32>
    %c10 = arith.constant 10 : index
    %78 = memref.load %arg5[%c10] : memref<32xf32, #tpu.memory_space<smem>>
    %79 = vector.broadcast %78 : f32 to vector<1x256xf32>
    %80 = arith.mulf %29, %79 : vector<1x256xf32>
    %81 = arith.addf %77, %80 : vector<1x256xf32>
    %c14 = arith.constant 14 : index
    %82 = memref.load %arg5[%c14] : memref<32xf32, #tpu.memory_space<smem>>
    %83 = vector.broadcast %82 : f32 to vector<1x256xf32>
    %84 = arith.mulf %34, %83 : vector<1x256xf32>
    %85 = arith.addf %81, %84 : vector<1x256xf32>
    %c2_27 = arith.constant 2 : index
    %86 = memref.load %arg6[%c2_27] : memref<8xf32, #tpu.memory_space<smem>>
    %87 = vector.broadcast %86 : f32 to vector<1x256xf32>
    %88 = arith.addf %85, %87 : vector<1x256xf32>
    %c3_28 = arith.constant 3 : index
    %89 = memref.load %arg5[%c3_28] : memref<32xf32, #tpu.memory_space<smem>>
    %90 = vector.broadcast %89 : f32 to vector<1x256xf32>
    %91 = arith.mulf %19, %90 : vector<1x256xf32>
    %c7 = arith.constant 7 : index
    %92 = memref.load %arg5[%c7] : memref<32xf32, #tpu.memory_space<smem>>
    %93 = vector.broadcast %92 : f32 to vector<1x256xf32>
    %94 = arith.mulf %24, %93 : vector<1x256xf32>
    %95 = arith.addf %91, %94 : vector<1x256xf32>
    %c11 = arith.constant 11 : index
    %96 = memref.load %arg5[%c11] : memref<32xf32, #tpu.memory_space<smem>>
    %97 = vector.broadcast %96 : f32 to vector<1x256xf32>
    %98 = arith.mulf %29, %97 : vector<1x256xf32>
    %99 = arith.addf %95, %98 : vector<1x256xf32>
    %c15 = arith.constant 15 : index
    %100 = memref.load %arg5[%c15] : memref<32xf32, #tpu.memory_space<smem>>
    %101 = vector.broadcast %100 : f32 to vector<1x256xf32>
    %102 = arith.mulf %34, %101 : vector<1x256xf32>
    %103 = arith.addf %99, %102 : vector<1x256xf32>
    %c3_29 = arith.constant 3 : index
    %104 = memref.load %arg6[%c3_29] : memref<8xf32, #tpu.memory_space<smem>>
    %105 = vector.broadcast %104 : f32 to vector<1x256xf32>
    %106 = arith.addf %103, %105 : vector<1x256xf32>
    %107 = arith.maximumf %52, %70 : vector<1x256xf32>
    %108 = arith.maximumf %107, %88 : vector<1x256xf32>
    %109 = arith.maximumf %108, %106 : vector<1x256xf32>
    %110 = arith.subf %52, %109 : vector<1x256xf32>
    %111 = math.exp %110 : vector<1x256xf32>
    %112 = arith.subf %70, %109 : vector<1x256xf32>
    %113 = math.exp %112 : vector<1x256xf32>
    %114 = arith.subf %88, %109 : vector<1x256xf32>
    %115 = math.exp %114 : vector<1x256xf32>
    %116 = arith.subf %106, %109 : vector<1x256xf32>
    %117 = math.exp %116 : vector<1x256xf32>
    %118 = arith.addf %111, %113 : vector<1x256xf32>
    %119 = arith.addf %118, %115 : vector<1x256xf32>
    %120 = arith.addf %119, %117 : vector<1x256xf32>
    %121 = tpu.reciprocal %120 {approx = true} : vector<1x256xf32> -> vector<1x256xf32>
    %122 = arith.mulf %111, %121 : vector<1x256xf32>
    %123 = arith.mulf %113, %121 : vector<1x256xf32>
    %124 = arith.mulf %115, %121 : vector<1x256xf32>
    %125 = arith.mulf %117, %121 : vector<1x256xf32>
    %c16 = arith.constant 16 : index
    %126 = memref.load %arg5[%c16] : memref<32xf32, #tpu.memory_space<smem>>
    %127 = vector.broadcast %126 : f32 to vector<1x256xf32>
    %128 = arith.mulf %8, %127 : vector<1x256xf32>
    %c20 = arith.constant 20 : index
    %129 = memref.load %arg5[%c20] : memref<32xf32, #tpu.memory_space<smem>>
    %130 = vector.broadcast %129 : f32 to vector<1x256xf32>
    %131 = arith.mulf %10, %130 : vector<1x256xf32>
    %132 = arith.addf %128, %131 : vector<1x256xf32>
    %c24 = arith.constant 24 : index
    %133 = memref.load %arg5[%c24] : memref<32xf32, #tpu.memory_space<smem>>
    %134 = vector.broadcast %133 : f32 to vector<1x256xf32>
    %135 = arith.mulf %12, %134 : vector<1x256xf32>
    %136 = arith.addf %132, %135 : vector<1x256xf32>
    %c28 = arith.constant 28 : index
    %137 = memref.load %arg5[%c28] : memref<32xf32, #tpu.memory_space<smem>>
    %138 = vector.broadcast %137 : f32 to vector<1x256xf32>
    %139 = arith.mulf %14, %138 : vector<1x256xf32>
    %140 = arith.addf %136, %139 : vector<1x256xf32>
    %c4_30 = arith.constant 4 : index
    %141 = memref.load %arg6[%c4_30] : memref<8xf32, #tpu.memory_space<smem>>
    %142 = vector.broadcast %141 : f32 to vector<1x256xf32>
    %143 = arith.addf %140, %142 : vector<1x256xf32>
    %c17 = arith.constant 17 : index
    %144 = memref.load %arg5[%c17] : memref<32xf32, #tpu.memory_space<smem>>
    %145 = vector.broadcast %144 : f32 to vector<1x256xf32>
    %146 = arith.mulf %8, %145 : vector<1x256xf32>
    %c21 = arith.constant 21 : index
    %147 = memref.load %arg5[%c21] : memref<32xf32, #tpu.memory_space<smem>>
    %148 = vector.broadcast %147 : f32 to vector<1x256xf32>
    %149 = arith.mulf %10, %148 : vector<1x256xf32>
    %150 = arith.addf %146, %149 : vector<1x256xf32>
    %c25 = arith.constant 25 : index
    %151 = memref.load %arg5[%c25] : memref<32xf32, #tpu.memory_space<smem>>
    %152 = vector.broadcast %151 : f32 to vector<1x256xf32>
    %153 = arith.mulf %12, %152 : vector<1x256xf32>
    %154 = arith.addf %150, %153 : vector<1x256xf32>
    %c29 = arith.constant 29 : index
    %155 = memref.load %arg5[%c29] : memref<32xf32, #tpu.memory_space<smem>>
    %156 = vector.broadcast %155 : f32 to vector<1x256xf32>
    %157 = arith.mulf %14, %156 : vector<1x256xf32>
    %158 = arith.addf %154, %157 : vector<1x256xf32>
    %c5_31 = arith.constant 5 : index
    %159 = memref.load %arg6[%c5_31] : memref<8xf32, #tpu.memory_space<smem>>
    %160 = vector.broadcast %159 : f32 to vector<1x256xf32>
    %161 = arith.addf %158, %160 : vector<1x256xf32>
    %c18 = arith.constant 18 : index
    %162 = memref.load %arg5[%c18] : memref<32xf32, #tpu.memory_space<smem>>
    %163 = vector.broadcast %162 : f32 to vector<1x256xf32>
    %164 = arith.mulf %8, %163 : vector<1x256xf32>
    %c22 = arith.constant 22 : index
    %165 = memref.load %arg5[%c22] : memref<32xf32, #tpu.memory_space<smem>>
    %166 = vector.broadcast %165 : f32 to vector<1x256xf32>
    %167 = arith.mulf %10, %166 : vector<1x256xf32>
    %168 = arith.addf %164, %167 : vector<1x256xf32>
    %c26 = arith.constant 26 : index
    %169 = memref.load %arg5[%c26] : memref<32xf32, #tpu.memory_space<smem>>
    %170 = vector.broadcast %169 : f32 to vector<1x256xf32>
    %171 = arith.mulf %12, %170 : vector<1x256xf32>
    %172 = arith.addf %168, %171 : vector<1x256xf32>
    %c30 = arith.constant 30 : index
    %173 = memref.load %arg5[%c30] : memref<32xf32, #tpu.memory_space<smem>>
    %174 = vector.broadcast %173 : f32 to vector<1x256xf32>
    %175 = arith.mulf %14, %174 : vector<1x256xf32>
    %176 = arith.addf %172, %175 : vector<1x256xf32>
    %c6_32 = arith.constant 6 : index
    %177 = memref.load %arg6[%c6_32] : memref<8xf32, #tpu.memory_space<smem>>
    %178 = vector.broadcast %177 : f32 to vector<1x256xf32>
    %179 = arith.addf %176, %178 : vector<1x256xf32>
    %c19 = arith.constant 19 : index
    %180 = memref.load %arg5[%c19] : memref<32xf32, #tpu.memory_space<smem>>
    %181 = vector.broadcast %180 : f32 to vector<1x256xf32>
    %182 = arith.mulf %8, %181 : vector<1x256xf32>
    %c23 = arith.constant 23 : index
    %183 = memref.load %arg5[%c23] : memref<32xf32, #tpu.memory_space<smem>>
    %184 = vector.broadcast %183 : f32 to vector<1x256xf32>
    %185 = arith.mulf %10, %184 : vector<1x256xf32>
    %186 = arith.addf %182, %185 : vector<1x256xf32>
    %c27 = arith.constant 27 : index
    %187 = memref.load %arg5[%c27] : memref<32xf32, #tpu.memory_space<smem>>
    %188 = vector.broadcast %187 : f32 to vector<1x256xf32>
    %189 = arith.mulf %12, %188 : vector<1x256xf32>
    %190 = arith.addf %186, %189 : vector<1x256xf32>
    %c31 = arith.constant 31 : index
    %191 = memref.load %arg5[%c31] : memref<32xf32, #tpu.memory_space<smem>>
    %192 = vector.broadcast %191 : f32 to vector<1x256xf32>
    %193 = arith.mulf %14, %192 : vector<1x256xf32>
    %194 = arith.addf %190, %193 : vector<1x256xf32>
    %c7_33 = arith.constant 7 : index
    %195 = memref.load %arg6[%c7_33] : memref<8xf32, #tpu.memory_space<smem>>
    %196 = vector.broadcast %195 : f32 to vector<1x256xf32>
    %197 = arith.addf %194, %196 : vector<1x256xf32>
    %198 = arith.maximumf %143, %161 : vector<1x256xf32>
    %199 = arith.maximumf %198, %179 : vector<1x256xf32>
    %200 = arith.maximumf %199, %197 : vector<1x256xf32>
    %201 = arith.subf %143, %200 : vector<1x256xf32>
    %202 = math.exp %201 : vector<1x256xf32>
    %203 = arith.subf %161, %200 : vector<1x256xf32>
    %204 = math.exp %203 : vector<1x256xf32>
    %205 = arith.subf %179, %200 : vector<1x256xf32>
    %206 = math.exp %205 : vector<1x256xf32>
    %207 = arith.subf %197, %200 : vector<1x256xf32>
    %208 = math.exp %207 : vector<1x256xf32>
    %209 = arith.addf %202, %204 : vector<1x256xf32>
    %210 = arith.addf %209, %206 : vector<1x256xf32>
    %211 = arith.addf %210, %208 : vector<1x256xf32>
    %212 = tpu.reciprocal %211 {approx = true} : vector<1x256xf32> -> vector<1x256xf32>
    %213 = arith.mulf %202, %212 : vector<1x256xf32>
    %214 = arith.mulf %204, %212 : vector<1x256xf32>
    %215 = arith.mulf %206, %212 : vector<1x256xf32>
    %216 = arith.mulf %208, %212 : vector<1x256xf32>
    %c0_34 = arith.constant 0 : index
    %217 = memref.load %arg8[%c0_34] : memref<12xf32, #tpu.memory_space<smem>>
    %218 = arith.mulf %122, %213 : vector<1x256xf32>
    %219 = vector.shape_cast %218 : vector<1x256xf32> to vector<1x1x256xf32>
    %cst = arith.constant dense<0.000000e+00> : vector<1xf32>
    %220 = vector.multi_reduction <add>, %219, %cst [1, 2] : vector<1x1x256xf32> to vector<1xf32>
    %221 = vector.shape_cast %220 : vector<1xf32> to vector<1x1x1xf32>
    %222 = vector.extract %221[0, 0, 0] : f32 from vector<1x1x1xf32>
    %223 = arith.addf %217, %222 : f32
    %c0_35 = arith.constant 0 : index
    %224 = memref.load %arg8[%c0_35] : memref<12xf32, #tpu.memory_space<smem>>
    memref.store %223, %arg8[%c0_35] : memref<12xf32, #tpu.memory_space<smem>>
    %c4_36 = arith.constant 4 : index
    %225 = memref.load %arg8[%c4_36] : memref<12xf32, #tpu.memory_space<smem>>
    %226 = arith.mulf %122, %122 : vector<1x256xf32>
    %227 = vector.shape_cast %226 : vector<1x256xf32> to vector<1x1x256xf32>
    %cst_37 = arith.constant dense<0.000000e+00> : vector<1xf32>
    %228 = vector.multi_reduction <add>, %227, %cst_37 [1, 2] : vector<1x1x256xf32> to vector<1xf32>
    %229 = vector.shape_cast %228 : vector<1xf32> to vector<1x1x1xf32>
    %230 = vector.extract %229[0, 0, 0] : f32 from vector<1x1x1xf32>
    %231 = arith.addf %225, %230 : f32
    %c4_38 = arith.constant 4 : index
    %232 = memref.load %arg8[%c4_38] : memref<12xf32, #tpu.memory_space<smem>>
    memref.store %231, %arg8[%c4_38] : memref<12xf32, #tpu.memory_space<smem>>
    %c8_39 = arith.constant 8 : index
    %233 = memref.load %arg8[%c8_39] : memref<12xf32, #tpu.memory_space<smem>>
    %234 = arith.mulf %213, %213 : vector<1x256xf32>
    %235 = vector.shape_cast %234 : vector<1x256xf32> to vector<1x1x256xf32>
    %cst_40 = arith.constant dense<0.000000e+00> : vector<1xf32>
    %236 = vector.multi_reduction <add>, %235, %cst_40 [1, 2] : vector<1x1x256xf32> to vector<1xf32>
    %237 = vector.shape_cast %236 : vector<1xf32> to vector<1x1x1xf32>
    %238 = vector.extract %237[0, 0, 0] : f32 from vector<1x1x1xf32>
    %239 = arith.addf %233, %238 : f32
    %c8_41 = arith.constant 8 : index
    %240 = memref.load %arg8[%c8_41] : memref<12xf32, #tpu.memory_space<smem>>
    memref.store %239, %arg8[%c8_41] : memref<12xf32, #tpu.memory_space<smem>>
    %c1_42 = arith.constant 1 : index
    %241 = memref.load %arg8[%c1_42] : memref<12xf32, #tpu.memory_space<smem>>
    %242 = arith.mulf %123, %214 : vector<1x256xf32>
    %243 = vector.shape_cast %242 : vector<1x256xf32> to vector<1x1x256xf32>
    %cst_43 = arith.constant dense<0.000000e+00> : vector<1xf32>
    %244 = vector.multi_reduction <add>, %243, %cst_43 [1, 2] : vector<1x1x256xf32> to vector<1xf32>
    %245 = vector.shape_cast %244 : vector<1xf32> to vector<1x1x1xf32>
    %246 = vector.extract %245[0, 0, 0] : f32 from vector<1x1x1xf32>
    %247 = arith.addf %241, %246 : f32
    %c1_44 = arith.constant 1 : index
    %248 = memref.load %arg8[%c1_44] : memref<12xf32, #tpu.memory_space<smem>>
    memref.store %247, %arg8[%c1_44] : memref<12xf32, #tpu.memory_space<smem>>
    %c5_45 = arith.constant 5 : index
    %249 = memref.load %arg8[%c5_45] : memref<12xf32, #tpu.memory_space<smem>>
    %250 = arith.mulf %123, %123 : vector<1x256xf32>
    %251 = vector.shape_cast %250 : vector<1x256xf32> to vector<1x1x256xf32>
    %cst_46 = arith.constant dense<0.000000e+00> : vector<1xf32>
    %252 = vector.multi_reduction <add>, %251, %cst_46 [1, 2] : vector<1x1x256xf32> to vector<1xf32>
    %253 = vector.shape_cast %252 : vector<1xf32> to vector<1x1x1xf32>
    %254 = vector.extract %253[0, 0, 0] : f32 from vector<1x1x1xf32>
    %255 = arith.addf %249, %254 : f32
    %c5_47 = arith.constant 5 : index
    %256 = memref.load %arg8[%c5_47] : memref<12xf32, #tpu.memory_space<smem>>
    memref.store %255, %arg8[%c5_47] : memref<12xf32, #tpu.memory_space<smem>>
    %c9_48 = arith.constant 9 : index
    %257 = memref.load %arg8[%c9_48] : memref<12xf32, #tpu.memory_space<smem>>
    %258 = arith.mulf %214, %214 : vector<1x256xf32>
    %259 = vector.shape_cast %258 : vector<1x256xf32> to vector<1x1x256xf32>
    %cst_49 = arith.constant dense<0.000000e+00> : vector<1xf32>
    %260 = vector.multi_reduction <add>, %259, %cst_49 [1, 2] : vector<1x1x256xf32> to vector<1xf32>
    %261 = vector.shape_cast %260 : vector<1xf32> to vector<1x1x1xf32>
    %262 = vector.extract %261[0, 0, 0] : f32 from vector<1x1x1xf32>
    %263 = arith.addf %257, %262 : f32
    %c9_50 = arith.constant 9 : index
    %264 = memref.load %arg8[%c9_50] : memref<12xf32, #tpu.memory_space<smem>>
    memref.store %263, %arg8[%c9_50] : memref<12xf32, #tpu.memory_space<smem>>
    %c2_51 = arith.constant 2 : index
    %265 = memref.load %arg8[%c2_51] : memref<12xf32, #tpu.memory_space<smem>>
    %266 = arith.mulf %124, %215 : vector<1x256xf32>
    %267 = vector.shape_cast %266 : vector<1x256xf32> to vector<1x1x256xf32>
    %cst_52 = arith.constant dense<0.000000e+00> : vector<1xf32>
    %268 = vector.multi_reduction <add>, %267, %cst_52 [1, 2] : vector<1x1x256xf32> to vector<1xf32>
    %269 = vector.shape_cast %268 : vector<1xf32> to vector<1x1x1xf32>
    %270 = vector.extract %269[0, 0, 0] : f32 from vector<1x1x1xf32>
    %271 = arith.addf %265, %270 : f32
    %c2_53 = arith.constant 2 : index
    %272 = memref.load %arg8[%c2_53] : memref<12xf32, #tpu.memory_space<smem>>
    memref.store %271, %arg8[%c2_53] : memref<12xf32, #tpu.memory_space<smem>>
    %c6_54 = arith.constant 6 : index
    %273 = memref.load %arg8[%c6_54] : memref<12xf32, #tpu.memory_space<smem>>
    %274 = arith.mulf %124, %124 : vector<1x256xf32>
    %275 = vector.shape_cast %274 : vector<1x256xf32> to vector<1x1x256xf32>
    %cst_55 = arith.constant dense<0.000000e+00> : vector<1xf32>
    %276 = vector.multi_reduction <add>, %275, %cst_55 [1, 2] : vector<1x1x256xf32> to vector<1xf32>
    %277 = vector.shape_cast %276 : vector<1xf32> to vector<1x1x1xf32>
    %278 = vector.extract %277[0, 0, 0] : f32 from vector<1x1x1xf32>
    %279 = arith.addf %273, %278 : f32
    %c6_56 = arith.constant 6 : index
    %280 = memref.load %arg8[%c6_56] : memref<12xf32, #tpu.memory_space<smem>>
    memref.store %279, %arg8[%c6_56] : memref<12xf32, #tpu.memory_space<smem>>
    %c10_57 = arith.constant 10 : index
    %281 = memref.load %arg8[%c10_57] : memref<12xf32, #tpu.memory_space<smem>>
    %282 = arith.mulf %215, %215 : vector<1x256xf32>
    %283 = vector.shape_cast %282 : vector<1x256xf32> to vector<1x1x256xf32>
    %cst_58 = arith.constant dense<0.000000e+00> : vector<1xf32>
    %284 = vector.multi_reduction <add>, %283, %cst_58 [1, 2] : vector<1x1x256xf32> to vector<1xf32>
    %285 = vector.shape_cast %284 : vector<1xf32> to vector<1x1x1xf32>
    %286 = vector.extract %285[0, 0, 0] : f32 from vector<1x1x1xf32>
    %287 = arith.addf %281, %286 : f32
    %c10_59 = arith.constant 10 : index
    %288 = memref.load %arg8[%c10_59] : memref<12xf32, #tpu.memory_space<smem>>
    memref.store %287, %arg8[%c10_59] : memref<12xf32, #tpu.memory_space<smem>>
    %c3_60 = arith.constant 3 : index
    %289 = memref.load %arg8[%c3_60] : memref<12xf32, #tpu.memory_space<smem>>
    %290 = arith.mulf %125, %216 : vector<1x256xf32>
    %291 = vector.shape_cast %290 : vector<1x256xf32> to vector<1x1x256xf32>
    %cst_61 = arith.constant dense<0.000000e+00> : vector<1xf32>
    %292 = vector.multi_reduction <add>, %291, %cst_61 [1, 2] : vector<1x1x256xf32> to vector<1xf32>
    %293 = vector.shape_cast %292 : vector<1xf32> to vector<1x1x1xf32>
    %294 = vector.extract %293[0, 0, 0] : f32 from vector<1x1x1xf32>
    %295 = arith.addf %289, %294 : f32
    %c3_62 = arith.constant 3 : index
    %296 = memref.load %arg8[%c3_62] : memref<12xf32, #tpu.memory_space<smem>>
    memref.store %295, %arg8[%c3_62] : memref<12xf32, #tpu.memory_space<smem>>
    %c7_63 = arith.constant 7 : index
    %297 = memref.load %arg8[%c7_63] : memref<12xf32, #tpu.memory_space<smem>>
    %298 = arith.mulf %125, %125 : vector<1x256xf32>
    %299 = vector.shape_cast %298 : vector<1x256xf32> to vector<1x1x256xf32>
    %cst_64 = arith.constant dense<0.000000e+00> : vector<1xf32>
    %300 = vector.multi_reduction <add>, %299, %cst_64 [1, 2] : vector<1x1x256xf32> to vector<1xf32>
    %301 = vector.shape_cast %300 : vector<1xf32> to vector<1x1x1xf32>
    %302 = vector.extract %301[0, 0, 0] : f32 from vector<1x1x1xf32>
    %303 = arith.addf %297, %302 : f32
    %c7_65 = arith.constant 7 : index
    %304 = memref.load %arg8[%c7_65] : memref<12xf32, #tpu.memory_space<smem>>
    memref.store %303, %arg8[%c7_65] : memref<12xf32, #tpu.memory_space<smem>>
    %c11_66 = arith.constant 11 : index
    %305 = memref.load %arg8[%c11_66] : memref<12xf32, #tpu.memory_space<smem>>
    %306 = arith.mulf %216, %216 : vector<1x256xf32>
    %307 = vector.shape_cast %306 : vector<1x256xf32> to vector<1x1x256xf32>
    %cst_67 = arith.constant dense<0.000000e+00> : vector<1xf32>
    %308 = vector.multi_reduction <add>, %307, %cst_67 [1, 2] : vector<1x1x256xf32> to vector<1xf32>
    %309 = vector.shape_cast %308 : vector<1xf32> to vector<1x1x1xf32>
    %310 = vector.extract %309[0, 0, 0] : f32 from vector<1x1x1xf32>
    %311 = arith.addf %305, %310 : f32
    %c11_68 = arith.constant 11 : index
    %312 = memref.load %arg8[%c11_68] : memref<12xf32, #tpu.memory_space<smem>>
    memref.store %311, %arg8[%c11_68] : memref<12xf32, #tpu.memory_space<smem>>
    %c1_i32 = arith.constant 1 : i32
    %313 = arith.cmpi eq, %arg0, %c1_i32 : i32
    %c0_i32_69 = arith.constant 0 : i32
    %314 = arith.cmpi eq, %arg1, %c0_i32_69 : i32
    %315 = arith.andi %313, %314 : i1
    %316 = arith.extui %315 : i1 to i32
    %c0_i32_70 = arith.constant 0 : i32
    %317 = arith.cmpi ne, %316, %c0_i32_70 : i32
    scf.if %317 {
      %c0_71 = arith.constant 0 : index
      %318 = memref.load %arg8[%c0_71] : memref<12xf32, #tpu.memory_space<smem>>
      %c0_72 = arith.constant 0 : index
      %319 = memref.load %arg7[%c0_72] : memref<12xf32, #tpu.memory_space<smem>>
      memref.store %318, %arg7[%c0_72] : memref<12xf32, #tpu.memory_space<smem>>
      %c1_73 = arith.constant 1 : index
      %320 = memref.load %arg8[%c1_73] : memref<12xf32, #tpu.memory_space<smem>>
      %c1_74 = arith.constant 1 : index
      %321 = memref.load %arg7[%c1_74] : memref<12xf32, #tpu.memory_space<smem>>
      memref.store %320, %arg7[%c1_74] : memref<12xf32, #tpu.memory_space<smem>>
      %c2_75 = arith.constant 2 : index
      %322 = memref.load %arg8[%c2_75] : memref<12xf32, #tpu.memory_space<smem>>
      %c2_76 = arith.constant 2 : index
      %323 = memref.load %arg7[%c2_76] : memref<12xf32, #tpu.memory_space<smem>>
      memref.store %322, %arg7[%c2_76] : memref<12xf32, #tpu.memory_space<smem>>
      %c3_77 = arith.constant 3 : index
      %324 = memref.load %arg8[%c3_77] : memref<12xf32, #tpu.memory_space<smem>>
      %c3_78 = arith.constant 3 : index
      %325 = memref.load %arg7[%c3_78] : memref<12xf32, #tpu.memory_space<smem>>
      memref.store %324, %arg7[%c3_78] : memref<12xf32, #tpu.memory_space<smem>>
      %c4_79 = arith.constant 4 : index
      %326 = memref.load %arg8[%c4_79] : memref<12xf32, #tpu.memory_space<smem>>
      %c4_80 = arith.constant 4 : index
      %327 = memref.load %arg7[%c4_80] : memref<12xf32, #tpu.memory_space<smem>>
      memref.store %326, %arg7[%c4_80] : memref<12xf32, #tpu.memory_space<smem>>
      %c5_81 = arith.constant 5 : index
      %328 = memref.load %arg8[%c5_81] : memref<12xf32, #tpu.memory_space<smem>>
      %c5_82 = arith.constant 5 : index
      %329 = memref.load %arg7[%c5_82] : memref<12xf32, #tpu.memory_space<smem>>
      memref.store %328, %arg7[%c5_82] : memref<12xf32, #tpu.memory_space<smem>>
      %c6_83 = arith.constant 6 : index
      %330 = memref.load %arg8[%c6_83] : memref<12xf32, #tpu.memory_space<smem>>
      %c6_84 = arith.constant 6 : index
      %331 = memref.load %arg7[%c6_84] : memref<12xf32, #tpu.memory_space<smem>>
      memref.store %330, %arg7[%c6_84] : memref<12xf32, #tpu.memory_space<smem>>
      %c7_85 = arith.constant 7 : index
      %332 = memref.load %arg8[%c7_85] : memref<12xf32, #tpu.memory_space<smem>>
      %c7_86 = arith.constant 7 : index
      %333 = memref.load %arg7[%c7_86] : memref<12xf32, #tpu.memory_space<smem>>
      memref.store %332, %arg7[%c7_86] : memref<12xf32, #tpu.memory_space<smem>>
      %c8_87 = arith.constant 8 : index
      %334 = memref.load %arg8[%c8_87] : memref<12xf32, #tpu.memory_space<smem>>
      %c8_88 = arith.constant 8 : index
      %335 = memref.load %arg7[%c8_88] : memref<12xf32, #tpu.memory_space<smem>>
      memref.store %334, %arg7[%c8_88] : memref<12xf32, #tpu.memory_space<smem>>
      %c9_89 = arith.constant 9 : index
      %336 = memref.load %arg8[%c9_89] : memref<12xf32, #tpu.memory_space<smem>>
      %c9_90 = arith.constant 9 : index
      %337 = memref.load %arg7[%c9_90] : memref<12xf32, #tpu.memory_space<smem>>
      memref.store %336, %arg7[%c9_90] : memref<12xf32, #tpu.memory_space<smem>>
      %c10_91 = arith.constant 10 : index
      %338 = memref.load %arg8[%c10_91] : memref<12xf32, #tpu.memory_space<smem>>
      %c10_92 = arith.constant 10 : index
      %339 = memref.load %arg7[%c10_92] : memref<12xf32, #tpu.memory_space<smem>>
      memref.store %338, %arg7[%c10_92] : memref<12xf32, #tpu.memory_space<smem>>
      %c11_93 = arith.constant 11 : index
      %340 = memref.load %arg8[%c11_93] : memref<12xf32, #tpu.memory_space<smem>>
      %c11_94 = arith.constant 11 : index
      %341 = memref.load %arg7[%c11_94] : memref<12xf32, #tpu.memory_space<smem>>
      memref.store %340, %arg7[%c11_94] : memref<12xf32, #tpu.memory_space<smem>>
    } else {
    }
    return
  }
  func.func @transform_0(%arg0: i32, %arg1: i32) -> (i32, i32, i32) {
    %c0_i32 = arith.constant 0 : i32
    %c0_i32_0 = arith.constant 0 : i32
    return %arg0, %c0_i32, %arg1 : i32, i32, i32
  }
  func.func @transform_1(%arg0: i32, %arg1: i32) -> (i32, i32, i32) {
    %c0_i32 = arith.constant 0 : i32
    %c0_i32_0 = arith.constant 0 : i32
    return %arg0, %c0_i32, %arg1 : i32, i32, i32
  }
  func.func @transform_2(%arg0: i32, %arg1: i32) -> i32 {
    %c0_i32 = arith.constant 0 : i32
    %c0_i32_0 = arith.constant 0 : i32
    return %c0_i32 : i32
  }
  func.func @transform_3(%arg0: i32, %arg1: i32) -> i32 {
    %c0_i32 = arith.constant 0 : i32
    %c0_i32_0 = arith.constant 0 : i32
    return %c0_i32 : i32
  }
  func.func @transform_4(%arg0: i32, %arg1: i32) -> i32 {
    %c0_i32 = arith.constant 0 : i32
    %c0_i32_0 = arith.constant 0 : i32
    return %c0_i32 : i32
  }
  func.func @transform_5(%arg0: i32, %arg1: i32) -> i32 {
    %c0_i32 = arith.constant 0 : i32
    %c0_i32_0 = arith.constant 0 : i32
    return %c0_i32 : i32
  }
}

</mosaic_0001>

<bundles_post_ra>
// kernel: vat2d_v1.4
= control target key start
LH: loop header
LB: loop body
LE: loop exit
PB: predicated region body
PF: predicated region fallthrough
CT: control target
= control target key end

     0   :  { %6 = vsyncpa [#allocation4], 0  ;;  %s328_s6 = smov 0   ;;  %s330_s7 = smov 0   ;;  %s369_s0 = inlined_call_operand.vmem [shape: f32[2,4,256], index: 0, kind: input, shape index: {}]   ;;  %s370_s1 = inlined_call_operand.vmem [shape: f32[2], index: 1, kind: output, shape index: {}]  }
   0x1   :  { %s332_s8 = smov 0  }
   0x2 LB: > { %s231_s9 = sadd.s32 4294967295, %s315_s8   ;;  %s24_s10 = sadd.s32 1, %s311_s7  ;;  %s315_s8 = sphi %s332_s8, %s12_s8   ;;  %s311_s7 = sphi %s330_s7, %s372_s7   ;;  %s307_s6 = sphi %s328_s6, %s371_s6  }
   0x3   : > { %p26_p0 = scmp.ge.s32.totalorder %s24_s10, 2  ;;  %p234_p1 = scmp.ge.s32.totalorder %s315_s8, 1 }
   0x4   : > { %p102_p2 = scmp.lt.s32.totalorder %s315_s8, 3 }
   0x5   : > { %s374_s10 = smov (%p26_p0, %s24_s10), 0 }
   0x6   : > { %p103_p3 = pnand %p234_p1, %p102_p2 }
   0x7   : > { %p122_p4 = scmp.lt.s32.totalorder (!%p103_p3), %s307_s6, 1  ;;  %s174_s18 = sshll.u32 (!%p103_p3), %s370_s1, 4  ;;  %s175_s18 = int_to_ptr.vmem [resolvable:$true] %s174_s18 }
   0x8   : > { %106 = sbr.rel (%p103_p3) target bundleno = 214 (0xd6), region = 24  ;;  %p248_p5 = scmp.eq.s32.totalorder (!%p103_p3), %s231_s9, 1 }
   0x9   : > { %s166_s20 = scalar_lea.smem (!%p103_p3), [#allocation3], %s307_s6  ;;  %s317_s21 = smov (!%p103_p3), [#allocation3]  }
   0xd   : > { %s123_s11 = scalar_select %p122_p4, %s307_s6, 1  ;;  %vm146_vm0 = vcmask 1043456  }
   0xf   : > { %s241_s12 = sshll.u32 %s123_s11, 3 }
  0x10   : > { %s129_s15 = scalar_lea.vmem %s369_s0, %s241_s12 }
  0x11   : > { %v137_v0 = vld [vmem:[%s129_s15] sm:$0xff] }
  0x12   : > { %v138_v1 = vmul.f32 %v137_v0, %v137_v0 }
  0x14   : > { %141 = vst [vmem:[#allocation1] ss:$2 sm:$0xff] %v138_v1 }
  0x1b   : > { %v142_v2 = vld.sshfl [vmem:[#allocation1] sm:$0xff pattern:$0x75316420]  ;;  %v143_v3 = vld.sshfl [vmem:[#allocation1 + $0x8] sm:$0xff pattern:$0x75316420] }
  0x1c   : > { %v147_v4 = vsel %vm146_vm0, %v142_v2, 0.0  ;;  %v148_v5 = vsel %vm146_vm0, %v143_v3, 0.0 }
  0x1d   : > { %v149_v6 = vadd.f32 %v148_v5, %v147_v4 }
  0x1f   : > { %150 = vadd.xlane.f32.xlu0 %v149_v6 }
  0x92   : > { %v151_v7 = vpop.xlane.xlu0 %150 }
  0x93   : > { %v152_v8 = vrot.slane %v151_v7, 4 }
  0x95   : > { %v153_v9 = vadd.f32 %v152_v8, %v151_v7 }
  0x97   : > { %v154_v10 = vrot.slane %v153_v9, 2 }
  0x99   : > { %v155_v11 = vadd.f32 %v154_v10, %v153_v9 }
  0x9b   : > { %v156_v12 = vrot.slane %v155_v11, 1 }
  0x9d   : > { %v157_v13 = vadd.f32 %v156_v12, %v155_v11 }
  0x9f   : > { %242 = vpush %v157_v13 }
  0xd0   : > { %s243_s19 = spop %242 }
  0xd1   : > { %167 = sst [smem:[%s166_s20]] %s243_s19 }
  0xd2   : > { %245 = dma.smem_to_vmem (%p248_p5), %s317_s21, 16, %s175_s18, [#allocation4]  }
  0xd3   : > { %302 = dma.done.wait (%p248_p5), [#allocation4], 16  }
  0xd4   : > { %304 = vsyncadd (%p248_p5), [#allocation4], 4294967280 }
  0xd5   : > { %183 = sfence }
  0xd6 PF: > { %s12_s8 = sadd.s32 1, %s315_s8   ;;  %s371_s6 = smov %s311_s7 }
  0xd7   : > { %p9_p6 = scmp.ge.s32.totalorder %s12_s8, 4   ;;  %s372_s7 = smov %s374_s10 }
  0xd9   :  { %11 = sbr.rel (!%p9_p6) target bundleno = 2 (0x2), region = 62 }
  0xde   :  { %189 = vsyncpa [#allocation4], 1 }
  0xdf   :  { %191 = vsyncpa [#allocation4 + $0x1], 1 }

// kernel: vat2d_v1.6
= control target key start
LH: loop header
LB: loop body
LE: loop exit
PB: predicated region body
PF: predicated region fallthrough
CT: control target
= control target key end

     0   :  { %s1598_s0 = inlined_call_operand.vmem [shape: f32[2,4,256], index: 0, kind: input, shape index: {}]   ;;  %s1599_s1 = inlined_call_operand.vmem [shape: f32[2,4,256], index: 1, kind: input, shape index: {}]   ;;  %s1600_s2 = inlined_call_operand.vmem [shape: f32[2], index: 2, kind: input, shape index: {}]   ;;  %s1601_s3 = inlined_call_operand.vmem [shape: f32[32], index: 3, kind: input, shape index: {}]   ;;  %s1602_s4 = inlined_call_operand.vmem [shape: f32[8], index: 4, kind: input, shape index: {}]   ;;  %s1603_s5 = inlined_call_operand.vmem [shape: f32[8], index: 5, kind: input, shape index: {}]   ;;  %s1604_s6 = inlined_call_operand.vmem [shape: f32[2,4,256], index: 6, kind: output, shape index: {0}]   ;;  %s1605_s7 = inlined_call_operand.vmem [shape: f32[2], index: 7, kind: output, shape index: {1}]  }
   0x1   :  { %1608 = sst [smem:[#allocation18_spill]] %s1598_s0 }
   0x2   :  { %1609 = sst [smem:[#allocation19_spill]] %s1599_s1 }
   0x3   :  { %1610 = sst [smem:[#allocation20_spill]] %s1600_s2 }
   0x4   :  { %1611 = sst [smem:[#allocation21_spill]] %s1601_s3 }
   0x5   :  { %1612 = sst [smem:[#allocation22_spill]] %s1602_s4 }
   0x6   :  { %1613 = sst [smem:[#allocation23_spill]] %s1603_s5 }
   0x7   :  { %1614 = sst [smem:[#allocation24_spill]] %s1605_s7 }
   0x8   :  { %13 = vsyncpa [#allocation4], 0 }
   0x9   :  { %14 = vsyncpa [#allocation7], 0 }
   0xa   :  { %15 = vsyncpa [#allocation10], 0 }
   0xb   :  { %16 = vsyncpa [#allocation5], 0  ;;  %s1283_s24 = smov 0   ;;  %s1285_s25 = smov 0  }
   0xc   :  { %s1287_s26 = smov 0  }
   0xd LB: > { %1615 = sst [smem:[#allocation16_spill]] %s1232_s25  ;;  %s1606_s30 = sadd.s32 4294967295, %s1236_s26   ;;  %s1236_s26 = sphi %s1287_s26, %s22_s26   ;;  %s1232_s25 = sphi %s1285_s25, %s1631_s25   ;;  %s1228_s24 = sphi %s1283_s24, %s1630_s24  }
   0xe   : > { %s1616_s3 = sld [smem:[#allocation21_spill]]  ;;  %p940_p0 = scmp.ge.s32.totalorder %s1236_s26, 1 }
   0xf   : > { %p228_p1 = scmp.lt.s32.totalorder %s1236_s26, 3  ;;  %p1306_p2 = scmp.eq.s32.totalorder %s1606_s30, 0 }
  0x10   : > { %s34_s10 = sadd.s32 1, %s1232_s25  ;;  %s1619_s2 = sld [smem:[#allocation20_spill]] }
  0x11   : > { %p1310_p3 = pnand %p940_p0, %p228_p1  ;;  %p36_p6 = scmp.ge.s32.totalorder %s34_s10, 2 }
  0x12   : > { %s1621_s4 = sld [smem:[#allocation22_spill]]  ;;  %s1238_s18 = smov [#allocation6]  }
  0x13   : > { %p1052_p4 = pneg %p1310_p3  ;;  %s1633_s10 = smov (%p36_p6, %s34_s10), 0 }
  0x14   : > { %s250_s29 = sshll.u32 %s1616_s3, 4  ;;  %1622 = sst [smem:[#allocation17_spill]] %s1633_s10  ;;  %s251_s29 = int_to_ptr.vmem [resolvable:$true] %s250_s29 }
  0x15   : > { %p1322_p5 = pnand %p1306_p2, %p1052_p4  ;;  %s1239_s19 = smov [#allocation3]  }
  0x16   : > { %s240_s13 = sshll.u32 %s1619_s2, 4  ;;  %s1240_s20 = smov [#allocation8]   ;;  %s241_s13 = int_to_ptr.vmem [resolvable:$true] %s240_s13 }
  0x17   : > { %1058 = dma.vmem_to_smem (!%p1322_p5), %s251_s29, 16, %s1238_s18, [#allocation7]  }
  0x18   : > { %s260_s17 = sshll.u32 %s1621_s4, 4  ;;  %s1623_s5 = sld [smem:[#allocation23_spill]]  ;;  %s261_s17 = int_to_ptr.vmem [resolvable:$true] %s260_s17 }
  0x19   : > { %1055 = dma.vmem_to_smem (!%p1322_p5), %s241_s13, 16, %s1239_s19, [#allocation4]  }
  0x1a   : > { %1061 = dma.vmem_to_smem (!%p1322_p5), %s261_s17, 16, %s1240_s20, [#allocation7]  }
  0x1b   : > { %s1241_s27 = smov [#allocation9]   ;;  %309 = sbr.rel (%p1310_p3) target bundleno = 349 (0x15d), region = 44 }
  0x1e   : > { %s270_s23 = sshll.u32 %s1623_s5, 4  ;;  %s271_s23 = int_to_ptr.vmem [resolvable:$true] %s270_s23 }
  0x1f   : > { %1064 = dma.vmem_to_smem (!%p1322_p5), %s271_s23, 16, %s1241_s27, [#allocation10]  }
  0x20   : > { %1211 = dma.done.wait (%p1306_p2), [#allocation4], 16  }
  0x21   : > { %1213 = vsyncadd (%p1306_p2), [#allocation4], 4294967280 }
  0x22   : > { %1215 = dma.done.wait (%p1306_p2), [#allocation7], 32  }
  0x23   : > { %1217 = vsyncadd (%p1306_p2), [#allocation7], 4294967264 }
  0x24   : > { %1219 = dma.done.wait (%p1306_p2), [#allocation10], 16  }
  0x25   : > { %1221 = vsyncadd (%p1306_p2), [#allocation10], 4294967280 }
  0x26   : > { %331 = sfence }
  0x27   : > { %p376_p7 = scmp.lt.s32.totalorder %s1228_s24, 1  ;;  %s411_s28 = sld [smem:[#allocation3 + %s1228_s24]]  ;;  %vm744_vm1 = vcmask 1040384  }
  0x28   : > { %s1358_s29 = sld [smem:[#allocation6]] }
  0x29   : > { %s377_s9 = scalar_select %p376_p7, %s1228_s24, 1 }
  0x2a   : > { %s1361_s11 = sld [smem:[#allocation6 + $0x4]] }
  0x2b   : > { %s1363_s12 = sshll.u32 %s377_s9, 3  ;;  %s1365_s13 = sld [smem:[#allocation6 + $0x8]] }
  0x2c   : > { %s1624_s0 = sld [smem:[#allocation18_spill]] }
  0x2d   : > { %s1625_s1 = sld [smem:[#allocation19_spill]]  ;;  %v420_v1 = vstv %s411_s28 }
  0x2e   : > { %v436_v11 = vstv %s1358_s29  ;;  %s1383_s19 = sld [smem:[#allocation6 + $0xc]] }
  0x2f   : > { %s1387_s20 = sld [smem:[#allocation8]] }
  0x30   : > { %v439_v12 = vstv %s1361_s11  ;;  %s1392_s21 = sld [smem:[#allocation6 + $0x1]] }
  0x31   : > { %v443_v20 = vstv %s1365_s13  ;;  %s1401_s22 = sld [smem:[#allocation6 + $0x5]]  ;;  %s403_s13 = scalar_lea.vmem %s1604_s6, %s1363_s12 }
  0x32   : > { %s383_s15 = scalar_lea.vmem %s1624_s0, %s1363_s12  ;;  %s1403_s23 = sld [smem:[#allocation6 + $0x9]] }
  0x33   : > { %s393_s18 = scalar_lea.vmem %s1625_s1, %s1363_s12  ;;  %v1375_v0 = vld [vmem:[%s383_s15] ss:$4 sm:$0x3]  ;;  %v1377_v2 = vld [vmem:[%s383_s15 + $0x1] ss:$4 sm:$0x3] }
  0x34   : > { %v1379_v3 = vld [vmem:[%s383_s15 + $0x2] ss:$4 sm:$0x3]  ;;  %v419_v4 = vld [vmem:[%s393_s18] ss:$4 sm:$0x3]  ;;  %v447_v24 = vstv %s1383_s19 }
  0x35   : > { %v960_v5 = vld [vmem:[%s393_s18 + $0x1] ss:$4 sm:$0x3]  ;;  %v421_v6 = vmul.f32 %v420_v1, %v419_v4  ;;  %v961_v8 = vld [vmem:[%s393_s18 + $0x2] ss:$4 sm:$0x3]  ;;  %v451_v41 = vstv %s1387_s20 }
  0x36   : > { %v425_v7 = vmul.f32 %v960_v5, %v420_v1  ;;  %v962_v9 = vld [vmem:[%s393_s18 + $0x3] ss:$4 sm:$0x3]  ;;  %v429_v10 = vmul.f32 %v961_v8, %v420_v1  ;;  %s1405_s27 = sld [smem:[#allocation6 + $0xd]]  ;;  %v454_v25 = vstv %s1392_s21  ;;  %s1629_s21 = sadd.s32 4294967295, %s1236_s26  }
  0x37   : > { %v422_v13 = vadd.f32 %v421_v6, %v1375_v0  ;;  %v433_v16 = vmul.f32 %v962_v9, %v420_v1  ;;  %v1394_v17 = vld [vmem:[%s383_s15 + $0x3] ss:$4 sm:$0x3]  ;;  %s1411_s28 = sld [smem:[#allocation8 + $0x1]]  ;;  %v457_v27 = vstv %s1401_s22  ;;  %p1073_p8 = scmp.eq.s32.totalorder %s1629_s21, 1 }
  0x38   : > { %v426_v14 = vadd.f32 %v1377_v2, %v425_v7  ;;  %v1390_v15 = vadd.f32 %v1379_v3, %v429_v10  ;;  %s1414_s9 = sld [smem:[#allocation6 + $0x2]]  ;;  %v461_v31 = vstv %s1403_s23  ;;  %s764_s23 = scalar_lea.smem [#allocation11], %s1228_s24 }
  0x39   : > { %v437_v18 = vmul.f32 %v436_v11, %v422_v13  ;;  %v434_v21 = vadd.f32 %v1394_v17, %v433_v16  ;;  %s1417_s8 = sld [smem:[#allocation6 + $0x6]]  ;;  %v455_v26 = vmul.f32 %v454_v25, %v422_v13 }
  0x3a   : > { %v440_v19 = vmul.f32 %v439_v12, %v426_v14  ;;  %v444_v23 = vmul.f32 %v443_v20, %v1390_v15  ;;  %s1422_s14 = sld [smem:[#allocation6 + $0xa]]  ;;  %v458_v30 = vmul.f32 %v457_v27, %v426_v14  ;;  %v462_v32 = vmul.f32 %v461_v31, %v1390_v15 }
  0x3b   : > { %v448_v29 = vmul.f32 %v447_v24, %v434_v21  ;;  %s1429_s15 = sld [smem:[#allocation6 + $0xe]] }
  0x3c   : > { %v441_v22 = vadd.f32 %v440_v19, %v437_v18  ;;  %v465_v33 = vstv %s1405_s27  ;;  %s1435_s16 = sld [smem:[#allocation8 + $0x2]]  ;;  %v459_v34 = vadd.f32 %v458_v30, %v455_v26  ;;  %s1242_s27 = smov [#allocation11]  }
  0x3d   : > { %v466_v35 = vmul.f32 %v465_v33, %v434_v21  ;;  %s1439_s17 = sld [smem:[#allocation6 + $0x3]]  ;;  %v469_v42 = vstv %s1411_s28 }
  0x3e   : > { %v445_v28 = vadd.f32 %v444_v23, %v441_v22  ;;  %v472_v36 = vstv %s1414_s9  ;;  %s1442_s18 = sld [smem:[#allocation6 + $0x7]]  ;;  %v463_v38 = vadd.f32 %v462_v32, %v459_v34 }
  0x3f   : > { %v473_v39 = vmul.f32 %v472_v36, %v422_v13  ;;  %v475_v40 = vstv %s1417_s8  ;;  %s1447_s30 = sld [smem:[#allocation6 + $0xb]] }
  0x40   : > { %v449_v37 = vadd.f32 %v448_v29, %v445_v28  ;;  %v476_v43 = vmul.f32 %v475_v40, %v426_v14  ;;  %v479_v44 = vstv %s1422_s14  ;;  %s1454_s0 = sld [smem:[#allocation6 + $0xf]]  ;;  %v467_v45 = vadd.f32 %v466_v35, %v463_v38 }
  0x41   : > { %v480_v46 = vmul.f32 %v479_v44, %v1390_v15  ;;  %v483_v47 = vstv %s1429_s15  ;;  %s1460_s1 = sld [smem:[#allocation8 + $0x3]] }
  0x42   : > { %v477_v48 = vadd.f32 %v476_v43, %v473_v39  ;;  %v484_v49 = vmul.f32 %v483_v47, %v434_v21  ;;  %s981_s20 = sld [smem:[#allocation6 + $0x10]]  ;;  %v1464_v50 = vadd.f32 %v451_v41, %v449_v37  ;;  %v1466_v51 = vadd.f32 %v469_v42, %v467_v45 }
  0x43   : > { %v490_v52 = vstv %s1439_s17  ;;  %s982_s28 = sld [smem:[#allocation6 + $0x14]]  ;;  %v487_v56 = vstv %s1435_s16 }
  0x44   : > { %v481_v53 = vadd.f32 %v480_v46, %v477_v48  ;;  %v491_v54 = vmul.f32 %v490_v52, %v422_v13  ;;  %v493_v55 = vstv %s1442_s18  ;;  %s983_s2 = sld [smem:[#allocation6 + $0x18]]  ;;  %v507_v1 = vmax.f32 %v1464_v50, %v1466_v51 }
  0x45   : > { %v494_v57 = vmul.f32 %v493_v55, %v426_v14  ;;  %v497_v58 = vstv %s1447_s30  ;;  %s1476_s3 = sld [smem:[#allocation6 + $0x1c]] }
  0x46   : > { %v485_v59 = vadd.f32 %v484_v49, %v481_v53  ;;  %v498_v60 = vmul.f32 %v497_v58, %v1390_v15  ;;  %v501_v61 = vstv %s1454_s0  ;;  %s1482_s4 = sld [smem:[#allocation8 + $0x4]] }
  0x47   : > { %v495_v62 = vadd.f32 %v494_v57, %v491_v54  ;;  %v502_v63 = vmul.f32 %v501_v61, %v434_v21  ;;  %s986_s16 = sld [smem:[#allocation6 + $0x11]]  ;;  %v505_v9 = vstv %s1460_s1 }
  0x48   : > { %v1488_v4 = vadd.f32 %v487_v56, %v485_v59  ;;  %v531_v5 = vstv %s981_s20  ;;  %s987_s5 = sld [smem:[#allocation6 + $0x15]] }
  0x49   : > { %v499_v6 = vadd.f32 %v498_v60, %v495_v62  ;;  %v532_v7 = vmul.f32 %v531_v5, %v1375_v0  ;;  %v534_v8 = vstv %s982_s28  ;;  %s988_s10 = sld [smem:[#allocation6 + $0x19]] }
  0x4a   : > { %v535_v10 = vmul.f32 %v1377_v2, %v534_v8  ;;  %v538_v13 = vstv %s983_s2  ;;  %s989_s25 = sld [smem:[#allocation6 + $0x1d]]  ;;  %v508_v15 = vmax.f32 %v507_v1, %v1488_v4 }
  0x4b   : > { %v503_v14 = vadd.f32 %v502_v63, %v499_v6  ;;  %v539_v16 = vmul.f32 %v1379_v3, %v538_v13  ;;  %v542_v18 = vstv %s1476_s3  ;;  %s1496_s7 = sld [smem:[#allocation8 + $0x5]] }
  0x4c   : > { %v536_v19 = vadd.f32 %v535_v10, %v532_v7  ;;  %s991_s20 = sld [smem:[#allocation6 + $0x12]]  ;;  %v543_v26 = vmul.f32 %v1394_v17, %v542_v18  ;;  %v546_v45 = vstv %s1482_s4 }
  0x4d   : > { %v1498_v21 = vadd.f32 %v505_v9, %v503_v14  ;;  %v549_v22 = vstv %s986_s16  ;;  %s992_s28 = sld [smem:[#allocation6 + $0x16]] }
  0x4e   : > { %v540_v23 = vadd.f32 %v539_v16, %v536_v19  ;;  %v550_v28 = vmul.f32 %v549_v22, %v1375_v0  ;;  %v552_v29 = vstv %s987_s5  ;;  %s993_s1 = sld [smem:[#allocation6 + $0x1a]] }
  0x4f   : > { %v509_v30 = vmax.f32 %v508_v15, %v1498_v21  ;;  %v553_v32 = vmul.f32 %v1377_v2, %v552_v29  ;;  %v556_v34 = vstv %s988_s10  ;;  %s994_s2 = sld [smem:[#allocation6 + $0x1e]] }
  0x50   : > { %v557_v35 = vmul.f32 %v1379_v3, %v556_v34  ;;  %v560_v37 = vstv %s989_s25  ;;  %s1505_s3 = sld [smem:[#allocation8 + $0x6]]  ;;  %v544_v41 = vadd.f32 %v543_v26, %v540_v23 }
  0x51   : > { %v510_v38 = vsub.f32 %v1464_v50, %v509_v30  ;;  %s996_s16 = sld [smem:[#allocation6 + $0x13]]  ;;  %v513_v39 = vsub.f32 %v1466_v51, %v509_v30  ;;  %v554_v42 = vadd.f32 %v553_v32, %v550_v28  ;;  %v561_v43 = vmul.f32 %v1394_v17, %v560_v37 }
  0x52   : > { %s997_s5 = sld [smem:[#allocation6 + $0x17]]  ;;  %v567_v46 = vstv %s991_s20  ;;  %v564_v49 = vstv %s1496_s7  ;;  %v547_v60 = vadd.f32 %v546_v45, %v544_v41  ;;  %v516_v7 = vsub.f32 %v1488_v4, %v509_v30 }
  0x53   : > { %v558_v48 = vadd.f32 %v557_v35, %v554_v42  ;;  %v568_v53 = vmul.f32 %v567_v46, %v1375_v0  ;;  %v570_v54 = vstv %s992_s28  ;;  %s998_s25 = sld [smem:[#allocation6 + $0x1b]]  ;;  %v511_v56 = vmul.f32 1.442695, %v510_v38 }
  0x54   : > { %v571_v57 = vmul.f32 %v1377_v2, %v570_v54  ;;  %v574_v50 = vstv %s993_s1  ;;  %s999_s10 = sld [smem:[#allocation6 + $0x1f]]  ;;  %v514_v51 = vmul.f32 1.442695, %v513_v39  ;;  %v517_v28 = vmul.f32 1.442695, %v516_v7 }
  0x55   : > { %v578_v59 = vstv %s994_s2  ;;  %v562_v62 = vadd.f32 %v561_v43, %v558_v48  ;;  %v575_v63 = vmul.f32 %v1379_v3, %v574_v50  ;;  %s1515_s4 = sld [smem:[#allocation8 + $0x7]]  ;;  %1104 = vpow2.f32 %v511_v56 }
  0x56   : > { %v572_v1 = vadd.f32 %v571_v57, %v568_v53  ;;  %v579_v5 = vmul.f32 %v1394_v17, %v578_v59  ;;  %1106 = vpow2.f32 %v514_v51  ;;  %v582_v15 = vstv %s1505_s3  ;;  %s1526_s7 = sld [smem:[#allocation9]] }
  0x57   : > { %v585_v6 = vstv %s996_s16  ;;  %v565_v8 = vadd.f32 %v564_v49, %v562_v62  ;;  %v519_v4 = vsub.f32 %v1498_v21, %v509_v30  ;;  %1108 = vpow2.f32 %v517_v28  ;;  %s1528_s20 = sld [smem:[#allocation9 + $0x4]] }
  0x58   : > { %v586_v9 = vmul.f32 %v585_v6, %v1375_v0  ;;  %v588_v10 = vstv %s997_s5  ;;  %v576_v13 = vadd.f32 %v575_v63, %v572_v1  ;;  %s1002_s28 = sld [smem:[#allocation9 + $0x1]] }
  0x59   : > { %v589_v14 = vmul.f32 %v1377_v2, %v588_v10  ;;  %v592_v16 = vstv %s998_s25  ;;  %v602_v18 = vmax.f32 %v547_v60, %v565_v8  ;;  %v520_v39 = vmul.f32 1.442695, %v519_v4  ;;  %s1530_s1 = sld [smem:[#allocation9 + $0x5]] }
  0x5a   : > { %v580_v19 = vadd.f32 %v579_v5, %v576_v13  ;;  %v593_v23 = vmul.f32 %v1379_v3, %v592_v16  ;;  %v596_v26 = vstv %s999_s10  ;;  %s1004_s2 = sld [smem:[#allocation9 + $0x2]] }
  0x5b   : > { %v590_v22 = vadd.f32 %v589_v14, %v586_v9  ;;  %v597_v0 = vmul.f32 %v1394_v17, %v596_v26  ;;  %v600_v34 = vstv %s1515_s4  ;;  %v1105_v35 = vpop.eup %1104  ;;  %1110 = vpow2.f32 %v520_v39  ;;  %s1006_s3 = sld [smem:[#allocation9 + $0x3]] }
  0x5c   : > { %v583_v29 = vadd.f32 %v582_v15, %v580_v19  ;;  %v1107_v38 = vpop.eup %1106  ;;  %s1005_s16 = sld [smem:[#allocation9 + $0x6]]  ;;  %v626_v10 = vstv %s1526_s7 }
  0x5d   : > { %v594_v32 = vadd.f32 %v593_v23, %v590_v22  ;;  %v522_v43 = vadd.f32 %v1107_v38, %v1105_v35  ;;  %v1109_v21 = vpop.eup %1108  ;;  %s1007_s5 = sld [smem:[#allocation9 + $0x7]]  ;;  %v629_v16 = vstv %s1528_s20 }
  0x5e   : > { %v603_v2 = vmax.f32 %v602_v18, %v583_v29  ;;  %v633_v13 = vstv %s1002_s28  ;;  %s1628_s12 = sld [smem:[#allocation24_spill]] }
  0x5f   : > { %v598_v37 = vadd.f32 %v597_v0, %v594_v32  ;;  %v523_v53 = vadd.f32 %v1109_v21, %v522_v43  ;;  %v636_v18 = vstv %s1530_s1 }
  0x60   : > { %v640_v14 = vstv %s1004_s2 }
  0x61   : > { %v601_v41 = vadd.f32 %v600_v34, %v598_v37  ;;  %v1111_v56 = vpop.eup %1110  ;;  %v647_v15 = vstv %s1006_s3 }
  0x62   : > { %v524_v57 = vadd.f32 %v1111_v56, %v523_v53  ;;  %v643_v19 = vstv %s1005_s16 }
  0x63   : > { %v604_v42 = vmax.f32 %v603_v2, %v601_v41  ;;  %v650_v22 = vstv %s1007_s5 }
  0x64   : > { %s785_s19 = sshll.u32 %s1628_s12, 4  ;;  %s786_s19 = int_to_ptr.vmem [resolvable:$true] %s785_s19 }
  0x65   : > { %v605_v3 = vsub.f32 %v547_v60, %v604_v42  ;;  %v608_v45 = vsub.f32 %v565_v8, %v604_v42  ;;  %v611_v46 = vsub.f32 %v583_v29, %v604_v42  ;;  %v614_v48 = vsub.f32 %v601_v41, %v604_v42 }
  0x67   : > { %v606_v30 = vmul.f32 1.442695, %v605_v3  ;;  %v609_v17 = vmul.f32 1.442695, %v608_v45  ;;  %v612_v49 = vmul.f32 1.442695, %v611_v46 }
  0x68   : > { %v615_v54 = vmul.f32 1.442695, %v614_v48 }
  0x69   : > { %1112 = vpow2.f32 %v606_v30 }
  0x6a   : > { %1114 = vpow2.f32 %v609_v17 }
  0x6b   : > { %1116 = vpow2.f32 %v612_v49 }
  0x6c   : > { %1118 = vpow2.f32 %v615_v54 }
  0x6d   : > { %1120 = vrcp.f32 %v524_v57 }
  0x6f   : > { %v1113_v50 = vpop.eup %1112 }
  0x70   : > { %v1115_v59 = vpop.eup %1114 }
  0x71   : > { %v1117_v51 = vpop.eup %1116  ;;  %v617_v60 = vadd.f32 %v1115_v59, %v1113_v50 }
  0x72   : > { %v1119_v62 = vpop.eup %1118 }
  0x73   : > { %v618_v63 = vadd.f32 %v1117_v51, %v617_v60  ;;  %v1121_v5 = vpop.eup %1120 }
  0x74   : > { %v526_v6 = vmul.f32 %v1121_v5, %v1105_v35  ;;  %v527_v7 = vmul.f32 %v1121_v5, %v1107_v38  ;;  %v528_v8 = vmul.f32 %v1121_v5, %v1109_v21  ;;  %v529_v9 = vmul.f32 %v1121_v5, %v1111_v56 }
  0x75   : > { %v619_v1 = vadd.f32 %v1119_v62, %v618_v63  ;;  %v675_v5 = vlaneseq }
  0x76   : > { %v627_v26 = vmul.f32 %v626_v10, %v526_v6  ;;  %v634_v28 = vmul.f32 %v633_v13, %v527_v7  ;;  %v641_v4 = vmul.f32 %v640_v14, %v528_v8  ;;  %v648_v0 = vmul.f32 %v647_v15, %v529_v9 }
  0x77   : > { %1122 = vrcp.f32 %v619_v1  ;;  %vm1569_vm0 = vcmp.lt.s32.totalorder %v675_v5, 256 }
  0x7d   : > { %v1123_v23 = vpop.eup %1122 }
  0x7e   : > { %v621_v29 = vmul.f32 %v1123_v23, %v1113_v50  ;;  %v622_v32 = vmul.f32 %v1123_v23, %v1115_v59  ;;  %v623_v34 = vmul.f32 %v1123_v23, %v1117_v51  ;;  %v624_v35 = vmul.f32 %v1123_v23, %v1119_v62 }
  0x80   : > { %v630_v37 = vmul.f32 %v629_v16, %v621_v29  ;;  %v637_v2 = vmul.f32 %v636_v18, %v622_v32  ;;  %v644_v38 = vmul.f32 %v643_v19, %v623_v34  ;;  %v651_v39 = vmul.f32 %v650_v22, %v624_v35 }
  0x82   : > { %v631_v41 = vadd.f32 %v630_v37, %v627_v26  ;;  %v638_v42 = vadd.f32 %v637_v2, %v634_v28  ;;  %v645_v43 = vadd.f32 %v644_v38, %v641_v4  ;;  %v652_v3 = vadd.f32 %v651_v39, %v648_v0 }
  0x84   : > { %v653_v45 = vmul.f32 %v631_v41, %v526_v6  ;;  %v654_v46 = vmul.f32 %v638_v42, %v527_v7  ;;  %v656_v48 = vmul.f32 %v645_v43, %v528_v8  ;;  %v658_v30 = vmul.f32 %v652_v3, %v529_v9 }
  0x86   : > { %v655_v21 = vadd.f32 %v654_v46, %v653_v45 }
  0x88   : > { %v657_v17 = vadd.f32 %v656_v48, %v655_v21 }
  0x8a   : > { %v659_v49 = vadd.f32 %v658_v30, %v657_v17 }
  0x8c   : > { %v660_v53 = vsub.f32 %v631_v41, %v659_v49  ;;  %v662_v54 = vsub.f32 %v638_v42, %v659_v49  ;;  %v664_v56 = vsub.f32 %v645_v43, %v659_v49  ;;  %v666_v57 = vsub.f32 %v652_v3, %v659_v49 }
  0x8e   : > { %v661_v50 = vmul.f32 %v660_v53, %v526_v6  ;;  %v663_v59 = vmul.f32 %v662_v54, %v527_v7  ;;  %v665_v51 = vmul.f32 %v664_v56, %v528_v8  ;;  %v667_v60 = vmul.f32 %v666_v57, %v529_v9 }
  0x90   : > { %v668_v62 = vmul.f32 %v661_v50, %v436_v11  ;;  %v669_v63 = vmul.f32 %v663_v59, %v454_v25  ;;  %v671_v1 = vmul.f32 %v665_v51, %v472_v36  ;;  %v673_v10 = vmul.f32 %v667_v60, %v490_v52 }
  0x91   : > { %v683_v6 = vmul.f32 %v661_v50, %v439_v12  ;;  %v686_v7 = vmul.f32 %v663_v59, %v457_v27  ;;  %v690_v8 = vmul.f32 %v665_v51, %v475_v40  ;;  %v702_v11 = vmul.f32 %v661_v50, %v443_v20 }
  0x92   : > { %v670_v9 = vadd.f32 %v669_v63, %v668_v62  ;;  %v705_v25 = vmul.f32 %v663_v59, %v461_v31  ;;  %v709_v36 = vmul.f32 %v665_v51, %v479_v44  ;;  %v694_v14 = vmul.f32 %v667_v60, %v493_v55 }
  0x93   : > { %v687_v13 = vadd.f32 %v686_v7, %v683_v6  ;;  %v721_v52 = vmul.f32 %v661_v50, %v447_v24  ;;  %v724_v15 = vmul.f32 %v663_v59, %v465_v33  ;;  %v713_v27 = vmul.f32 %v667_v60, %v497_v58 }
  0x94   : > { %v672_v12 = vadd.f32 %v671_v1, %v670_v9  ;;  %v706_v16 = vadd.f32 %v705_v25, %v702_v11  ;;  %v728_v40 = vmul.f32 %v665_v51, %v483_v47  ;;  %v732_v24 = vmul.f32 %v667_v60, %v501_v61 }
  0x95   : > { %v691_v31 = vadd.f32 %v690_v8, %v687_v13  ;;  %v725_v44 = vadd.f32 %v724_v15, %v721_v52 }
  0x96   : > { %v674_v55 = vadd.f32 %v673_v10, %v672_v12  ;;  %v710_v33 = vadd.f32 %v709_v36, %v706_v16 }
  0x97   : > { %v695_v18 = vadd.f32 %v694_v14, %v691_v31  ;;  %v729_v19 = vadd.f32 %v728_v40, %v725_v44 }
  0x98   : > { %679 = vst.msk [vmem:[%s403_s13] ss:$4 sm:$0x3] %vm1569_vm0, %v674_v55  ;;  %v680_v47 = vmul.f32 %v674_v55, %v674_v55  ;;  %v714_v58 = vadd.f32 %v713_v27, %v710_v33 }
  0x99   : > { %1012 = vst.msk [vmem:[%s403_s13 + $0x1] ss:$4 sm:$0x3] %vm1569_vm0, %v695_v18  ;;  %v698_v22 = vmul.f32 %v695_v18, %v695_v18  ;;  %v733_v23 = vadd.f32 %v732_v24, %v729_v19 }
  0x9a   : > { %1017 = vst.msk [vmem:[%s403_s13 + $0x2] ss:$4 sm:$0x3] %vm1569_vm0, %v714_v58  ;;  %v717_v26 = vmul.f32 %v714_v58, %v714_v58 }
  0x9b   : > { %v699_v28 = vadd.f32 %v698_v22, %v680_v47  ;;  %1022 = vst.msk [vmem:[%s403_s13 + $0x3] ss:$4 sm:$0x3] %vm1569_vm0, %v733_v23  ;;  %v736_v61 = vmul.f32 %v733_v23, %v733_v23 }
  0x9d   : > { %v718_v4 = vadd.f32 %v717_v26, %v699_v28 }
  0x9f   : > { %v737_v0 = vadd.f32 %v736_v61, %v718_v4 }
  0xa1   : > { %v740_v29 = vperm.slane %v737_v0, 0  ;;  %v741_v32 = vperm.slane %v737_v0, 1 }
  0xa3   : > { %v745_v34 = vsel %vm744_vm1, %v740_v29, 0.0  ;;  %v746_v35 = vsel %vm744_vm1, %v741_v32, 0.0 }
  0xa4   : > { %v747_v37 = vadd.f32 %v746_v35, %v745_v34 }
  0xa6   : > { %748 = vadd.xlane.f32.xlu0 %v747_v37 }
 0x119   : > { %v749_v2 = vpop.xlane.xlu0 %748 }
 0x11a   : > { %v750_v38 = vrot.slane %v749_v2, 4 }
 0x11c   : > { %v751_v39 = vadd.f32 %v750_v38, %v749_v2 }
 0x11e   : > { %v752_v41 = vrot.slane %v751_v39, 2 }
 0x120   : > { %v753_v42 = vadd.f32 %v752_v41, %v751_v39 }
 0x122   : > { %v754_v43 = vrot.slane %v753_v42, 1 }
 0x124   : > { %v755_v3 = vadd.f32 %v754_v43, %v753_v42 }
 0x126   : > { %1030 = vpush %v755_v3 }
 0x157   : > { %s1031_s22 = spop %1030 }
 0x158   : > { %765 = sst [smem:[%s764_s23]] %s1031_s22 }
 0x159   : > { %1049 = dma.smem_to_vmem (%p1073_p8), %s1242_s27, 16, %s786_s19, [#allocation5]  }
 0x15a   : > { %1223 = dma.done.wait (%p1073_p8), [#allocation5], 16  }
 0x15b   : > { %1225 = vsyncadd (%p1073_p8), [#allocation5], 4294967280 }
 0x15c   : > { %794 = sfence }
 0x15d PF: > { %s22_s26 = sadd.s32 1, %s1236_s26   ;;  %s1630_s24 = sld [smem:[#allocation16_spill]] }
 0x15e   : > { %p19_p9 = scmp.ge.s32.totalorder %s22_s26, 4   ;;  %s1631_s25 = sld [smem:[#allocation17_spill]] }
 0x160   :  { %21 = sbr.rel (!%p19_p9) target bundleno = 13 (0xd), region = 123 }
 0x165   :  { %812 = vsyncpa [#allocation4], 1 }
 0x166   :  { %814 = vsyncpa [#allocation4 + $0x1], 1 }
 0x167   :  { %815 = vsyncpa [#allocation7], 1 }
 0x168   :  { %816 = vsyncpa [#allocation10], 1 }
 0x169   :  { %817 = vsyncpa [#allocation5], 1 }
 0x16a   :  { %819 = vsyncpa [#allocation5 + $0x1], 1 }

// kernel: vat2d_v1.5
= control target key start
LH: loop header
LB: loop body
LE: loop exit
PB: predicated region body
PF: predicated region fallthrough
CT: control target
= control target key end

     0   :  { %10 = vsyncpa [#allocation4], 0  ;;  %s1597_s0 = inlined_call_operand.vmem [shape: f32[2,4,256], index: 0, kind: input, shape index: {}]   ;;  %s1598_s1 = inlined_call_operand.vmem [shape: f32[2,4,256], index: 1, kind: input, shape index: {}]   ;;  %s1599_s2 = inlined_call_operand.vmem [shape: f32[2], index: 2, kind: input, shape index: {}]   ;;  %s1600_s3 = inlined_call_operand.vmem [shape: f32[32], index: 3, kind: input, shape index: {}]   ;;  %s1601_s4 = inlined_call_operand.vmem [shape: f32[8], index: 4, kind: input, shape index: {}]   ;;  %s1602_s5 = inlined_call_operand.vmem [shape: f32[12], index: 5, kind: output, shape index: {}]  }
   0x1   :  { %11 = vsyncpa [#allocation7], 0 }
   0x2   :  { %12 = vsyncpa [#allocation5], 0  ;;  %s1326_s18 = smov 0   ;;  %s1328_s19 = smov 0  }
   0x3   :  { %s1330_s20 = smov 0  }
   0x4 LB: > { %s197_s23 = sshll.u32 %s1600_s3, 4  ;;  %s975_s24 = sadd.s32 4294967295, %s1289_s20   ;;  %s1289_s20 = sphi %s1330_s20, %s18_s20   ;;  %s1285_s19 = sphi %s1328_s19, %s1606_s19   ;;  %s1281_s18 = sphi %s1326_s18, %s1605_s18   ;;  %s198_s23 = int_to_ptr.vmem [resolvable:$true] %s197_s23 }
   0x5   : > { %p976_p0 = scmp.ge.s32.totalorder %s1289_s20, 1  ;;  %p175_p1 = scmp.lt.s32.totalorder %s1289_s20, 3 }
   0x6   : > { %p1349_p2 = scmp.eq.s32.totalorder %s975_s24, 0  ;;  %s30_s27 = sadd.s32 1, %s1285_s19 }
   0x7   : > { %p1353_p3 = pnand %p976_p0, %p175_p1  ;;  %s187_s30 = sshll.u32 %s1599_s2, 4  ;;  %s188_s30 = int_to_ptr.vmem [resolvable:$true] %s187_s30 }
   0x8   : > { %p32_p6 = scmp.ge.s32.totalorder %s30_s27, 2  ;;  %s207_s8 = sshll.u32 %s1601_s4, 4  ;;  %s208_s8 = int_to_ptr.vmem [resolvable:$true] %s207_s8 }
   0x9   : > { %p1129_p4 = pneg %p1353_p3  ;;  %s1291_s9 = smov [#allocation6]  }
   0xa   : > { %s1608_s27 = smov (%p32_p6, %s30_s27), 0  ;;  %s1292_s10 = smov [#allocation3]  }
   0xb   : > { %p1130_p5 = pnand %p1349_p2, %p1129_p4  ;;  %s1293_s11 = smov [#allocation8]  }
   0xc   : > { %246 = sbr.rel (%p1353_p3) target bundleno = 339 (0x153), region = 40 }
   0xd   : > { %1135 = dma.vmem_to_smem (!%p1130_p5), %s198_s23, 16, %s1291_s9, [#allocation7]  }
   0xe   : > { %1132 = dma.vmem_to_smem (!%p1130_p5), %s188_s30, 16, %s1292_s10, [#allocation4]  }
   0xf   : > { %1138 = dma.vmem_to_smem (!%p1130_p5), %s208_s8, 16, %s1293_s11, [#allocation7]  }
  0x11   : > { %1268 = dma.done.wait (%p1349_p2), [#allocation4], 16  }
  0x12   : > { %1270 = vsyncadd (%p1349_p2), [#allocation4], 4294967280 }
  0x13   : > { %1272 = dma.done.wait (%p1349_p2), [#allocation7], 32  }
  0x14   : > { %1274 = vsyncadd (%p1349_p2), [#allocation7], 4294967264 }
  0x15   : > { %263 = sfence }
  0x16   : > { %p295_p7 = scmp.lt.s32.totalorder %s1281_s18, 1  ;;  %s1014_s12 = sld [smem:[#allocation6 + $0x10]]  ;;  %vm565_vm0 = vcmask 1040384  }
  0x17   : > { %s1015_s13 = sld [smem:[#allocation6 + $0x14]]  ;;  %p314_p8 = scmp.eq.s32.totalorder %s1281_s18, 0 }
  0x18   : > { %s1382_s14 = scalar_select %p295_p7, %s1281_s18, 1 }
  0x19   : > { %s1016_s15 = sld [smem:[#allocation6 + $0x18]]  ;;  %p823_p9 = scmp.eq.s32.totalorder %s1281_s18, 1 }
  0x1a   : > { %s1061_s16 = sshll.u32 %s1382_s14, 3  ;;  %s1017_s23 = sld [smem:[#allocation6 + $0x1c]] }
  0x1b   : > { %s302_s22 = scalar_lea.vmem %s1597_s0, %s1061_s16  ;;  %s1396_s25 = sld [smem:[#allocation8 + $0x4]] }
  0x1c   : > { %v1390_v0 = vld [vmem:[%s302_s22] ss:$4 sm:$0x3]  ;;  %v1392_v1 = vld [vmem:[%s302_s22 + $0x1] ss:$4 sm:$0x3]  ;;  %v464_v2 = vstv %s1014_s12 }
  0x1d   : > { %v467_v3 = vstv %s1015_s13  ;;  %v465_v4 = vmul.f32 %v464_v2, %v1390_v0  ;;  %v1398_v6 = vld [vmem:[%s302_s22 + $0x2] ss:$4 sm:$0x3]  ;;  %s1019_s26 = sld [smem:[#allocation6 + $0x11]]  ;;  %p1145_p10 = scmp.eq.s32.totalorder %s975_s24, 1 }
  0x1e   : > { %v468_v5 = vmul.f32 %v1392_v1, %v467_v3  ;;  %s1020_s28 = sld [smem:[#allocation6 + $0x15]]  ;;  %v1401_v10 = vld [vmem:[%s302_s22 + $0x3] ss:$4 sm:$0x3] }
  0x1f   : > { %v471_v7 = vstv %s1016_s15  ;;  %s1021_s29 = sld [smem:[#allocation6 + $0x19]] }
  0x20   : > { %v469_v8 = vadd.f32 %v468_v5, %v465_v4  ;;  %v472_v9 = vmul.f32 %v1398_v6, %v471_v7  ;;  %s1022_s30 = sld [smem:[#allocation6 + $0x1d]]  ;;  %v475_v11 = vstv %s1017_s23  ;;  %s312_s23 = scalar_lea.vmem %s1598_s1, %s1061_s16 }
  0x21   : > { %s1403_s6 = sld [smem:[#allocation8 + $0x5]]  ;;  %v476_v14 = vmul.f32 %v1401_v10, %v475_v11  ;;  %v479_v25 = vstv %s1396_s25  ;;  %v352_v43 = vld [vmem:[%s312_s23] ss:$4 sm:$0x3] }
  0x22   : > { %s1024_s7 = sld [smem:[#allocation6 + $0x12]]  ;;  %v473_v13 = vadd.f32 %v472_v9, %v469_v8  ;;  %v993_v47 = vld [vmem:[%s312_s23 + $0x1] ss:$4 sm:$0x3] }
  0x23   : > { %v482_v12 = vstv %s1019_s26  ;;  %s1025_s8 = sld [smem:[#allocation6 + $0x16]]  ;;  %v994_v52 = vld [vmem:[%s312_s23 + $0x2] ss:$4 sm:$0x3] }
  0x24   : > { %v483_v15 = vmul.f32 %v482_v12, %v1390_v0  ;;  %v485_v16 = vstv %s1020_s28  ;;  %s1026_s9 = sld [smem:[#allocation6 + $0x1a]]  ;;  %v477_v23 = vadd.f32 %v476_v14, %v473_v13  ;;  %v995_v55 = vld [vmem:[%s312_s23 + $0x3] ss:$4 sm:$0x3] }
  0x25   : > { %v486_v17 = vmul.f32 %v1392_v1, %v485_v16  ;;  %v489_v18 = vstv %s1021_s29  ;;  %s1027_s10 = sld [smem:[#allocation6 + $0x1e]] }
  0x26   : > { %v490_v19 = vmul.f32 %v1398_v6, %v489_v18  ;;  %v493_v20 = vstv %s1022_s30  ;;  %s1409_s11 = sld [smem:[#allocation8 + $0x6]]  ;;  %v1424_v35 = vadd.f32 %v479_v25, %v477_v23 }
  0x27   : > { %v487_v21 = vadd.f32 %v486_v17, %v483_v15  ;;  %v494_v22 = vmul.f32 %v1401_v10, %v493_v20  ;;  %s1029_s12 = sld [smem:[#allocation6 + $0x13]]  ;;  %v497_v29 = vstv %s1403_s6 }
  0x28   : > { %v500_v24 = vstv %s1024_s7  ;;  %s1030_s13 = sld [smem:[#allocation6 + $0x17]] }
  0x29   : > { %v491_v26 = vadd.f32 %v490_v19, %v487_v21  ;;  %v501_v27 = vmul.f32 %v500_v24, %v1390_v0  ;;  %v503_v28 = vstv %s1025_s8  ;;  %s1031_s15 = sld [smem:[#allocation6 + $0x1b]] }
  0x2a   : > { %v504_v30 = vmul.f32 %v1392_v1, %v503_v28  ;;  %v507_v31 = vstv %s1026_s9  ;;  %s1032_s17 = sld [smem:[#allocation6 + $0x1f]] }
  0x2b   : > { %v495_v32 = vadd.f32 %v494_v22, %v491_v26  ;;  %v508_v33 = vmul.f32 %v1398_v6, %v507_v31  ;;  %v511_v34 = vstv %s1027_s10  ;;  %s1422_s25 = sld [smem:[#allocation8 + $0x7]] }
  0x2c   : > { %v505_v36 = vadd.f32 %v504_v30, %v501_v27  ;;  %v512_v37 = vmul.f32 %v1401_v10, %v511_v34  ;;  %s344_s26 = sld [smem:[#allocation3 + %s1281_s18]]  ;;  %v515_v44 = vstv %s1409_s11 }
  0x2d   : > { %v1428_v38 = vadd.f32 %v497_v29, %v495_v32  ;;  %v518_v39 = vstv %s1029_s12  ;;  %s1430_s14 = sld [smem:[#allocation6]] }
  0x2e   : > { %v509_v40 = vadd.f32 %v508_v33, %v505_v36  ;;  %v519_v41 = vmul.f32 %v518_v39, %v1390_v0  ;;  %v521_v42 = vstv %s1030_s13  ;;  %s1433_s16 = sld [smem:[#allocation6 + $0x4]] }
  0x2f   : > { %v522_v45 = vmul.f32 %v1392_v1, %v521_v42  ;;  %v525_v46 = vstv %s1031_s15  ;;  %s1437_s28 = sld [smem:[#allocation6 + $0x8]]  ;;  %v535_v51 = vmax.f32 %v1424_v35, %v1428_v38 }
  0x30   : > { %v513_v48 = vadd.f32 %v512_v37, %v509_v40  ;;  %v526_v49 = vmul.f32 %v1398_v6, %v525_v46  ;;  %v529_v50 = vstv %s1032_s17  ;;  %s1442_s29 = sld [smem:[#allocation6 + $0xc]] }
  0x31   : > { %v523_v53 = vadd.f32 %v522_v45, %v519_v41  ;;  %v530_v54 = vmul.f32 %v1401_v10, %v529_v50  ;;  %s1445_s30 = sld [smem:[#allocation8]]  ;;  %v533_v62 = vstv %s1422_s25 }
  0x32   : > { %v516_v56 = vadd.f32 %v515_v44, %v513_v48  ;;  %v353_v57 = vstv %s344_s26  ;;  %s999_s6 = sld [smem:[#allocation6 + $0x1]] }
  0x33   : > { %v527_v58 = vadd.f32 %v526_v49, %v523_v53  ;;  %v354_v59 = vmul.f32 %v353_v57, %v352_v43  ;;  %v358_v60 = vmul.f32 %v993_v47, %v353_v57  ;;  %v362_v61 = vmul.f32 %v994_v52, %v353_v57  ;;  %s1447_s7 = sld [smem:[#allocation6 + $0x5]] }
  0x34   : > { %v536_v63 = vmax.f32 %v535_v51, %v516_v56  ;;  %v366_v2 = vmul.f32 %v995_v55, %v353_v57  ;;  %v369_v3 = vstv %s1430_s14  ;;  %s1451_s8 = sld [smem:[#allocation6 + $0x9]]  ;;  %v372_v11 = vstv %s1433_s16  ;;  %s1294_s14 = smov 0.0  }
  0x35   : > { %v531_v4 = vadd.f32 %v530_v54, %v527_v58  ;;  %v1454_v5 = vadd.f32 %v354_v59, %v1390_v0  ;;  %v1457_v7 = vadd.f32 %v1392_v1, %v358_v60  ;;  %v1460_v8 = vadd.f32 %v1398_v6, %v362_v61  ;;  %s1462_s9 = sld [smem:[#allocation6 + $0xd]] }
  0x36   : > { %v1465_v9 = vadd.f32 %v1401_v10, %v366_v2  ;;  %v376_v12 = vstv %s1437_s28  ;;  %s1469_s10 = sld [smem:[#allocation8 + $0x1]]  ;;  %v380_v14 = vstv %s1442_s29 }
  0x37   : > { %v534_v13 = vadd.f32 %v533_v62, %v531_v4  ;;  %v370_v0 = vmul.f32 %v369_v3, %v1454_v5  ;;  %v373_v1 = vmul.f32 %v372_v11, %v1457_v7  ;;  %s1474_s11 = sld [smem:[#allocation6 + $0x2]]  ;;  %v377_v6 = vmul.f32 %v376_v12, %v1460_v8 }
  0x38   : > { %v387_v15 = vstv %s999_s6  ;;  %s1477_s12 = sld [smem:[#allocation6 + $0x6]]  ;;  %v381_v19 = vmul.f32 %v380_v14, %v1465_v9  ;;  %v384_v20 = vstv %s1445_s30 }
  0x39   : > { %v537_v10 = vmax.f32 %v536_v63, %v534_v13  ;;  %v374_v16 = vadd.f32 %v373_v1, %v370_v0  ;;  %v388_v17 = vmul.f32 %v387_v15, %v1454_v5  ;;  %v390_v18 = vstv %s1447_s7  ;;  %s1481_s13 = sld [smem:[#allocation6 + $0xa]] }
  0x3a   : > { %v391_v21 = vmul.f32 %v390_v18, %v1457_v7  ;;  %v394_v22 = vstv %s1451_s8  ;;  %s1487_s15 = sld [smem:[#allocation6 + $0xe]] }
  0x3b   : > { %v538_v23 = vsub.f32 %v1424_v35, %v537_v10  ;;  %v541_v24 = vsub.f32 %v1428_v38, %v537_v10  ;;  %v544_v25 = vsub.f32 %v516_v56, %v537_v10  ;;  %v547_v26 = vsub.f32 %v534_v13, %v537_v10  ;;  %s1491_s17 = sld [smem:[#allocation8 + $0x2]] }
  0x3c   : > { %v378_v27 = vadd.f32 %v377_v6, %v374_v16  ;;  %v392_v28 = vadd.f32 %v391_v21, %v388_v17  ;;  %v395_v29 = vmul.f32 %v394_v22, %v1460_v8  ;;  %v398_v30 = vstv %s1462_s9  ;;  %s1009_s21 = sld [smem:[#allocation6 + $0x3]] }
  0x3d   : > { %v539_v31 = vmul.f32 1.442695, %v538_v23  ;;  %v542_v32 = vmul.f32 1.442695, %v541_v24  ;;  %v545_v33 = vmul.f32 1.442695, %v544_v25  ;;  %v399_v34 = vmul.f32 %v398_v30, %v1465_v9 }
  0x3e   : > { %v548_v35 = vmul.f32 1.442695, %v547_v26  ;;  %v382_v36 = vadd.f32 %v381_v19, %v378_v27  ;;  %v396_v37 = vadd.f32 %v395_v29, %v392_v28  ;;  %v402_v38 = vstv %s1469_s10  ;;  %s1010_s22 = sld [smem:[#allocation6 + $0x7]] }
  0x3f   : > { %1176 = vpow2.f32 %v539_v31  ;;  %v405_v39 = vstv %s1474_s11  ;;  %v408_v40 = vstv %s1477_s12  ;;  %v412_v41 = vstv %s1481_s13  ;;  %s1011_s23 = sld [smem:[#allocation6 + $0xb]] }
  0x40   : > { %1178 = vpow2.f32 %v542_v32  ;;  %v400_v42 = vadd.f32 %v399_v34, %v396_v37  ;;  %v406_v43 = vmul.f32 %v405_v39, %v1454_v5  ;;  %s1012_s25 = sld [smem:[#allocation6 + $0xf]]  ;;  %v409_v44 = vmul.f32 %v408_v40, %v1457_v7 }
  0x41   : > { %1180 = vpow2.f32 %v545_v33  ;;  %v413_v45 = vmul.f32 %v412_v41, %v1460_v8  ;;  %v416_v46 = vstv %s1487_s15  ;;  %v385_v47 = vadd.f32 %v384_v20, %v382_v36  ;;  %s1013_s26 = sld [smem:[#allocation8 + $0x3]] }
  0x42   : > { %1182 = vpow2.f32 %v548_v35  ;;  %v403_v48 = vadd.f32 %v402_v38, %v400_v42  ;;  %v410_v49 = vadd.f32 %v409_v44, %v406_v43  ;;  %v417_v50 = vmul.f32 %v416_v46, %v1465_v9  ;;  %1101 = sst [smem:[#allocation2]] (%p314_p8), %s1294_s14 }
  0x43   : > { %v423_v51 = vstv %s1009_s21  ;;  %v420_v59 = vstv %s1491_s17  ;;  %1105 = sst [smem:[#allocation2 + $0x4]] (%p314_p8), %s1294_s14 }
  0x44   : > { %v424_v52 = vmul.f32 %v423_v51, %v1454_v5  ;;  %v426_v53 = vstv %s1010_s22  ;;  %v414_v55 = vadd.f32 %v413_v45, %v410_v49  ;;  %v440_v62 = vmax.f32 %v385_v47, %v403_v48  ;;  %1109 = sst [smem:[#allocation2 + $0x8]] (%p314_p8), %s1294_s14 }
  0x45   : > { %v1177_v54 = vpop.eup %1176  ;;  %v427_v56 = vmul.f32 %v426_v53, %v1457_v7  ;;  %v430_v57 = vstv %s1011_s23  ;;  %1102 = sst [smem:[#allocation2 + $0x1]] (%p314_p8), %s1294_s14 }
  0x46   : > { %v1179_v58 = vpop.eup %1178  ;;  %v431_v60 = vmul.f32 %v430_v57, %v1460_v8  ;;  %v434_v61 = vstv %s1012_s25  ;;  %v418_v3 = vadd.f32 %v417_v50, %v414_v55  ;;  %1106 = sst [smem:[#allocation2 + $0x5]] (%p314_p8), %s1294_s14 }
  0x47   : > { %v1181_v63 = vpop.eup %1180  ;;  %v550_v2 = vadd.f32 %v1179_v58, %v1177_v54  ;;  %v428_v4 = vadd.f32 %v427_v56, %v424_v52  ;;  %v435_v11 = vmul.f32 %v434_v61, %v1465_v9  ;;  %v438_v1 = vstv %s1013_s26  ;;  %1110 = sst [smem:[#allocation2 + $0x9]] (%p314_p8), %s1294_s14 }
  0x48   : > { %v1183_v12 = vpop.eup %1182  ;;  %v421_v13 = vadd.f32 %v420_v59, %v418_v3  ;;  %1103 = sst [smem:[#allocation2 + $0x2]] (%p314_p8), %s1294_s14 }
  0x49   : > { %v551_v5 = vadd.f32 %v1181_v63, %v550_v2  ;;  %v432_v0 = vadd.f32 %v431_v60, %v428_v4  ;;  %1107 = sst [smem:[#allocation2 + $0x6]] (%p314_p8), %s1294_s14 }
  0x4a   : > { %v441_v6 = vmax.f32 %v440_v62, %v421_v13  ;;  %1111 = sst [smem:[#allocation2 + $0xa]] (%p314_p8), %s1294_s14 }
  0x4b   : > { %v552_v14 = vadd.f32 %v1183_v12, %v551_v5  ;;  %v436_v7 = vadd.f32 %v435_v11, %v432_v0  ;;  %1104 = sst [smem:[#allocation2 + $0x3]] (%p314_p8), %s1294_s14 }
  0x4c   : > { %1108 = sst [smem:[#allocation2 + $0x7]] (%p314_p8), %s1294_s14 }
  0x4d   : > { %1184 = vrcp.f32 %v552_v14  ;;  %v439_v15 = vadd.f32 %v438_v1, %v436_v7  ;;  %1112 = sst [smem:[#allocation2 + $0xb]] (%p314_p8), %s1294_s14 }
  0x4e   : > { %s558_s16 = sld [smem:[#allocation2]] }
  0x4f   : > { %v442_v10 = vmax.f32 %v441_v6, %v439_v15  ;;  %s1034_s28 = sld [smem:[#allocation2 + $0x4]] }
  0x50   : > { %s1035_s29 = sld [smem:[#allocation2 + $0x8]] }
  0x51   : > { %v443_v8 = vsub.f32 %v385_v47, %v442_v10  ;;  %v446_v16 = vsub.f32 %v403_v48, %v442_v10  ;;  %v449_v17 = vsub.f32 %v421_v13, %v442_v10  ;;  %v452_v18 = vsub.f32 %v439_v15, %v442_v10  ;;  %s1036_s30 = sld [smem:[#allocation2 + $0x1]] }
  0x52   : > { %s1037_s6 = sld [smem:[#allocation2 + $0x5]] }
  0x53   : > { %v1185_v19 = vpop.eup %1184  ;;  %v444_v20 = vmul.f32 1.442695, %v443_v8  ;;  %v447_v21 = vmul.f32 1.442695, %v446_v16  ;;  %v450_v22 = vmul.f32 1.442695, %v449_v17 }
  0x54   : > { %v555_v9 = vmul.f32 %v1185_v19, %v1179_v58  ;;  %v554_v23 = vmul.f32 %v1185_v19, %v1177_v54  ;;  %v1510_v24 = vmul.f32 %v1185_v19, %v1181_v63  ;;  %v453_v25 = vmul.f32 1.442695, %v452_v18  ;;  %s1541_s7 = sld [smem:[#allocation2 + $0x9]] }
  0x55   : > { %1186 = vpow2.f32 %v444_v20  ;;  %v557_v52 = vmul.f32 %v1185_v19, %v1183_v12  ;;  %s1039_s9 = sld [smem:[#allocation2 + $0x2]] }
  0x56   : > { %v670_v26 = vmul.f32 %v555_v9, %v555_v9  ;;  %v604_v27 = vmul.f32 %v554_v23, %v554_v23  ;;  %1188 = vpow2.f32 %v447_v21  ;;  %v736_v28 = vmul.f32 %v1510_v24, %v1510_v24  ;;  %s1543_s11 = sld [smem:[#allocation2 + $0x6]] }
  0x57   : > { %1190 = vpow2.f32 %v450_v22  ;;  %v802_v61 = vmul.f32 %v557_v52, %v557_v52  ;;  %s1547_s12 = sld [smem:[#allocation2 + $0xa]] }
  0x58   : > { %v672_v29 = vperm.slane %v670_v26, 0  ;;  %v673_v30 = vperm.slane %v670_v26, 1  ;;  %v606_v31 = vperm.slane %v604_v27, 0  ;;  %v607_v32 = vperm.slane %v604_v27, 1  ;;  %s1549_s13 = sld [smem:[#allocation2 + $0x3]] }
  0x59   : > { %1192 = vpow2.f32 %v453_v25  ;;  %v738_v33 = vperm.slane %v736_v28, 0  ;;  %v739_v34 = vperm.slane %v736_v28, 1  ;;  %v804_v10 = vperm.slane %v802_v61, 0  ;;  %s1551_s15 = sld [smem:[#allocation2 + $0x7]] }
  0x5a   : > { %v676_v35 = vsel %vm565_vm0, %v672_v29, 0.0  ;;  %v677_v36 = vsel %vm565_vm0, %v673_v30, 0.0  ;;  %v610_v37 = vsel %vm565_vm0, %v606_v31, 0.0  ;;  %v611_v38 = vsel %vm565_vm0, %v607_v32, 0.0  ;;  %s1553_s21 = sld [smem:[#allocation2 + $0xb]] }
  0x5b   : > { %v1187_v39 = vpop.eup %1186  ;;  %v678_v40 = vadd.f32 %v677_v36, %v676_v35  ;;  %v612_v41 = vadd.f32 %v611_v38, %v610_v37  ;;  %v742_v45 = vsel %vm565_vm0, %v738_v33, 0.0  ;;  %v743_v46 = vsel %vm565_vm0, %v739_v34, 0.0 }
  0x5c   : > { %v1189_v42 = vpop.eup %1188  ;;  %v744_v50 = vadd.f32 %v743_v46, %v742_v45  ;;  %v805_v18 = vperm.slane %v802_v61, 1  ;;  %v808_v27 = vsel %vm565_vm0, %v804_v10, 0.0 }
  0x5d   : > { %v1191_v43 = vpop.eup %1190  ;;  %679 = vadd.xlane.f32.xlu2 %v678_v40  ;;  %613 = vadd.xlane.f32.xlu1 %v612_v41  ;;  %v455_v44 = vadd.f32 %v1189_v42, %v1187_v39 }
  0x5e   : > { %v809_v28 = vsel %vm565_vm0, %v805_v18, 0.0 }
  0x5f   : > { %v1193_v47 = vpop.eup %1192  ;;  %v456_v48 = vadd.f32 %v1191_v43, %v455_v44  ;;  %v810_v34 = vadd.f32 %v809_v28, %v808_v27 }
  0x61   : > { %v457_v49 = vadd.f32 %v1193_v47, %v456_v48 }
  0x63   : > { %1194 = vrcp.f32 %v457_v49 }
  0x65   : > { %745 = vadd.xlane.f32.xlu2 %v744_v50 }
  0x69   : > { %v1195_v51 = vpop.eup %1194 }
  0x6a   : > { %v459_v53 = vmul.f32 %v1195_v51, %v1187_v39  ;;  %v460_v54 = vmul.f32 %v1195_v51, %v1189_v42  ;;  %v461_v55 = vmul.f32 %v1195_v51, %v1191_v43  ;;  %v462_v62 = vmul.f32 %v1195_v51, %v1193_v47 }
  0x6c   : > { %v559_v56 = vmul.f32 %v554_v23, %v459_v53  ;;  %v626_v57 = vmul.f32 %v555_v9, %v460_v54  ;;  %v582_v58 = vmul.f32 %v459_v53, %v459_v53  ;;  %v648_v59 = vmul.f32 %v460_v54, %v460_v54 }
  0x6d   : > { %v714_v60 = vmul.f32 %v461_v55, %v461_v55  ;;  %v692_v21 = vmul.f32 %v1510_v24, %v461_v55  ;;  %v780_v25 = vmul.f32 %v462_v62, %v462_v62  ;;  %v758_v35 = vmul.f32 %v557_v52, %v462_v62 }
  0x6e   : > { %v561_v63 = vperm.slane %v559_v56, 0  ;;  %v562_v2 = vperm.slane %v559_v56, 1  ;;  %v628_v3 = vperm.slane %v626_v57, 0  ;;  %v629_v4 = vperm.slane %v626_v57, 1 }
  0x6f   : > { %v584_v11 = vperm.slane %v582_v58, 0  ;;  %v585_v5 = vperm.slane %v582_v58, 1  ;;  %v650_v13 = vperm.slane %v648_v59, 0  ;;  %v651_v0 = vperm.slane %v648_v59, 1 }
  0x70   : > { %v566_v12 = vsel %vm565_vm0, %v561_v63, 0.0  ;;  %v567_v1 = vsel %vm565_vm0, %v562_v2, 0.0  ;;  %v632_v14 = vsel %vm565_vm0, %v628_v3, 0.0  ;;  %v633_v7 = vsel %vm565_vm0, %v629_v4, 0.0 }
  0x71   : > { %v568_v6 = vadd.f32 %v567_v1, %v566_v12  ;;  %v634_v15 = vadd.f32 %v633_v7, %v632_v14  ;;  %v654_v8 = vsel %vm565_vm0, %v650_v13, 0.0  ;;  %v655_v16 = vsel %vm565_vm0, %v651_v0, 0.0 }
  0x72   : > { %v716_v17 = vperm.slane %v714_v60, 0  ;;  %v656_v19 = vadd.f32 %v655_v16, %v654_v8  ;;  %v717_v20 = vperm.slane %v714_v60, 1  ;;  %v588_v22 = vsel %vm565_vm0, %v584_v11, 0.0 }
  0x73   : > { %569 = vadd.xlane.f32.xlu0 %v568_v6  ;;  %635 = vadd.xlane.f32.xlu1 %v634_v15  ;;  %v589_v9 = vsel %vm565_vm0, %v585_v5, 0.0  ;;  %v694_v31 = vperm.slane %v692_v21, 0  ;;  %v695_v32 = vperm.slane %v692_v21, 1  ;;  %v782_v33 = vperm.slane %v780_v25, 0 }
  0x74   : > { %v720_v23 = vsel %vm565_vm0, %v716_v17, 0.0  ;;  %657 = vadd.xlane.f32.xlu2 %v656_v19  ;;  %v721_v26 = vsel %vm565_vm0, %v717_v20, 0.0  ;;  %v590_v29 = vadd.f32 %v589_v9, %v588_v22  ;;  %v783_v24 = vperm.slane %v780_v25, 1 }
  0x75   : > { %v722_v30 = vadd.f32 %v721_v26, %v720_v23  ;;  %v698_v36 = vsel %vm565_vm0, %v694_v31, 0.0  ;;  %v699_v37 = vsel %vm565_vm0, %v695_v32, 0.0  ;;  %v786_v38 = vsel %vm565_vm0, %v782_v33, 0.0 }
  0x76   : > { %v787_v39 = vsel %vm565_vm0, %v783_v24, 0.0  ;;  %v700_v40 = vadd.f32 %v699_v37, %v698_v36  ;;  %v760_v42 = vperm.slane %v758_v35, 0  ;;  %v761_v43 = vperm.slane %v758_v35, 1 }
  0x77   : > { %v788_v41 = vadd.f32 %v787_v39, %v786_v38 }
  0x78   : > { %v764_v44 = vsel %vm565_vm0, %v760_v42, 0.0  ;;  %v765_v45 = vsel %vm565_vm0, %v761_v43, 0.0 }
  0x79   : > { %v766_v46 = vadd.f32 %v765_v45, %v764_v44 }
  0x7b   : > { %591 = vadd.xlane.f32.xlu0 %v590_v29  ;;  %723 = vadd.xlane.f32.xlu1 %v722_v30 }
  0x7c   : > { %811 = vadd.xlane.f32.xlu2 %v810_v34 }
  0x83   : > { %701 = vadd.xlane.f32.xlu0 %v700_v40  ;;  %789 = vadd.xlane.f32.xlu1 %v788_v41 }
  0x8b   : > { %767 = vadd.xlane.f32.xlu0 %v766_v46 }
  0xd0   : > { %v680_v47 = vpop.xlane.xlu2 %679  ;;  %v614_v48 = vpop.xlane.xlu1 %613 }
  0xd1   : > { %v615_v50 = vrot.slane %v614_v48, 4  ;;  %v681_v56 = vrot.slane %v680_v47, 4 }
  0xd3   : > { %v616_v57 = vadd.f32 %v615_v50, %v614_v48  ;;  %v682_v63 = vadd.f32 %v681_v56, %v680_v47 }
  0xd5   : > { %v617_v2 = vrot.slane %v616_v57, 2  ;;  %v683_v7 = vrot.slane %v682_v63, 2 }
  0xd7   : > { %v618_v10 = vadd.f32 %v617_v2, %v616_v57  ;;  %v684_v9 = vadd.f32 %v683_v7, %v682_v63 }
  0xd8   : > { %v746_v49 = vpop.xlane.xlu2 %745 }
  0xd9   : > { %v747_v4 = vrot.slane %v746_v49, 4  ;;  %v619_v22 = vrot.slane %v618_v10, 1  ;;  %v685_v35 = vrot.slane %v684_v9, 1 }
  0xdb   : > { %v748_v8 = vadd.f32 %v747_v4, %v746_v49  ;;  %v620_v37 = vadd.f32 %v619_v22, %v618_v10  ;;  %v686_v44 = vadd.f32 %v685_v35, %v684_v9 }
  0xdd   : > { %v749_v23 = vrot.slane %v748_v8, 2 }
  0xdf   : > { %v750_v43 = vadd.f32 %v749_v23, %v748_v8 }
  0xe6   : > { %v570_v51 = vpop.xlane.xlu0 %569  ;;  %v636_v52 = vpop.xlane.xlu1 %635 }
  0xe7   : > { %v571_v53 = vrot.slane %v570_v51, 4  ;;  %v637_v54 = vrot.slane %v636_v52, 4  ;;  %v658_v55 = vpop.xlane.xlu2 %657 }
  0xe8   : > { %v659_v59 = vrot.slane %v658_v55, 4 }
  0xe9   : > { %v572_v58 = vadd.f32 %v571_v53, %v570_v51  ;;  %v638_v60 = vadd.f32 %v637_v54, %v636_v52  ;;  %v751_v52 = vrot.slane %v750_v43, 1 }
  0xea   : > { %v660_v62 = vadd.f32 %v659_v59, %v658_v55 }
  0xeb   : > { %v573_v61 = vrot.slane %v572_v58, 2  ;;  %v639_v11 = vrot.slane %v638_v60, 2  ;;  %v752_v59 = vadd.f32 %v751_v52, %v750_v43 }
  0xec   : > { %v661_v13 = vrot.slane %v660_v62, 2 }
  0xed   : > { %v574_v3 = vadd.f32 %v573_v61, %v572_v58  ;;  %v640_v17 = vadd.f32 %v639_v11, %v638_v60 }
  0xee   : > { %v592_v5 = vpop.xlane.xlu0 %591  ;;  %v724_v0 = vpop.xlane.xlu1 %723  ;;  %v662_v18 = vadd.f32 %v661_v13, %v660_v62 }
  0xef   : > { %v593_v12 = vrot.slane %v592_v5, 4  ;;  %v725_v1 = vrot.slane %v724_v0, 4  ;;  %v575_v14 = vrot.slane %v574_v3, 1  ;;  %v812_v20 = vpop.xlane.xlu2 %811  ;;  %v641_v28 = vrot.slane %v640_v17, 1 }
  0xf0   : > { %v663_v29 = vrot.slane %v662_v18, 1  ;;  %v813_v31 = vrot.slane %v812_v20, 4 }
  0xf1   : > { %v594_v6 = vadd.f32 %v593_v12, %v592_v5  ;;  %v576_v15 = vadd.f32 %v575_v14, %v574_v3  ;;  %v726_v16 = vadd.f32 %v725_v1, %v724_v0  ;;  %v642_v42 = vadd.f32 %v641_v28, %v640_v17 }
  0xf2   : > { %v664_v38 = vadd.f32 %v663_v29, %v662_v18  ;;  %v814_v41 = vadd.f32 %v813_v31, %v812_v20 }
  0xf3   : > { %v595_v19 = vrot.slane %v594_v6, 2  ;;  %1065 = vpush %v576_v15  ;;  %v727_v25 = vrot.slane %v726_v16, 2 }
  0xf4   : > { %v815_v49 = vrot.slane %v814_v41, 2 }
  0xf5   : > { %v596_v21 = vadd.f32 %v595_v19, %v594_v6  ;;  %v728_v39 = vadd.f32 %v727_v25, %v726_v16 }
  0xf6   : > { %v702_v26 = vpop.xlane.xlu0 %701  ;;  %v790_v27 = vpop.xlane.xlu1 %789  ;;  %v816_v57 = vadd.f32 %v815_v49, %v814_v41 }
  0xf7   : > { %v703_v30 = vrot.slane %v702_v26, 4  ;;  %v791_v32 = vrot.slane %v790_v27, 4  ;;  %v597_v33 = vrot.slane %v596_v21, 1  ;;  %v729_v48 = vrot.slane %v728_v39, 1 }
  0xf8   : > { %v817_v63 = vrot.slane %v816_v57, 1 }
  0xf9   : > { %v704_v24 = vadd.f32 %v703_v30, %v702_v26  ;;  %v598_v34 = vadd.f32 %v597_v33, %v596_v21  ;;  %v792_v36 = vadd.f32 %v791_v32, %v790_v27  ;;  %v730_v56 = vadd.f32 %v729_v48, %v728_v39 }
  0xfa   : > { %v818_v4 = vadd.f32 %v817_v63, %v816_v57 }
  0xfb   : > { %v705_v40 = vrot.slane %v704_v24, 2  ;;  %1067 = vpush %v598_v34  ;;  %v793_v46 = vrot.slane %v792_v36, 2 }
  0xfc   : > { %1069 = vpush %v620_v37 }
  0xfd   : > { %1071 = vpush %v642_v42  ;;  %v706_v45 = vadd.f32 %v705_v40, %v704_v24  ;;  %v794_v55 = vadd.f32 %v793_v46, %v792_v36 }
  0xfe   : > { %v768_v47 = vpop.xlane.xlu0 %767  ;;  %1073 = vpush %v664_v38 }
  0xff   : > { %v769_v50 = vrot.slane %v768_v47, 4  ;;  %1075 = vpush %v686_v44  ;;  %v707_v51 = vrot.slane %v706_v45, 1  ;;  %v795_v61 = vrot.slane %v794_v55, 1 }
 0x101   : > { %v770_v53 = vadd.f32 %v769_v50, %v768_v47  ;;  %v708_v54 = vadd.f32 %v707_v51, %v706_v45  ;;  %v796_v3 = vadd.f32 %v795_v61, %v794_v55 }
 0x103   : > { %v771_v58 = vrot.slane %v770_v53, 2  ;;  %1077 = vpush %v708_v54 }
 0x104   : > { %1079 = vpush %v730_v56 }
 0x105   : > { %v772_v60 = vadd.f32 %v771_v58, %v770_v53  ;;  %1081 = vpush %v752_v59 }
 0x107   : > { %v773_v62 = vrot.slane %v772_v60, 1 }
 0x109   : > { %v774_v2 = vadd.f32 %v773_v62, %v772_v60 }
 0x10b   : > { %1083 = vpush %v774_v2 }
 0x10c   : > { %1085 = vpush %v796_v3 }
 0x10d   : > { %1087 = vpush %v818_v4 }
 0x124   : > { %s1066_s8 = spop %1065 }
 0x125   : > { %s578_s10 = sadd.f32 %s1066_s8, %s558_s16 }
 0x127   : > { %580 = sst [smem:[#allocation2]] %s578_s10 }
 0x128   : > { %1113 = sst [smem:[#allocation9]] (%p823_p9), %s578_s10 }
 0x12c   : > { %s1068_s17 = spop %1067 }
 0x12d   : > { %s600_s22 = sadd.f32 %s1068_s17, %s1034_s28  ;;  %s1070_s23 = spop %1069 }
 0x12e   : > { %s622_s25 = sadd.f32 %s1070_s23, %s1035_s29  ;;  %s1072_s26 = spop %1071 }
 0x12f   : > { %602 = sst [smem:[#allocation2 + $0x4]] %s600_s22  ;;  %s1074_s14 = spop %1073 }
 0x130   : > { %1117 = sst [smem:[#allocation9 + $0x4]] (%p823_p9), %s600_s22  ;;  %s1076_s28 = spop %1075 }
 0x131   : > { %624 = sst [smem:[#allocation2 + $0x8]] %s622_s25 }
 0x132   : > { %1121 = sst [smem:[#allocation9 + $0x8]] (%p823_p9), %s622_s25 }
 0x133   : > { %s644_s16 = sadd.f32 %s1072_s26, %s1036_s30 }
 0x134   : > { %s666_s8 = sadd.f32 %s1074_s14, %s1037_s6  ;;  %s1078_s29 = spop %1077 }
 0x135   : > { %646 = sst [smem:[#allocation2 + $0x1]] %s644_s16  ;;  %s1080_s22 = spop %1079 }
 0x136   : > { %1114 = sst [smem:[#allocation9 + $0x1]] (%p823_p9), %s644_s16  ;;  %s1082_s30 = spop %1081 }
 0x137   : > { %668 = sst [smem:[#allocation2 + $0x5]] %s666_s8 }
 0x138   : > { %1118 = sst [smem:[#allocation9 + $0x5]] (%p823_p9), %s666_s8 }
 0x139   : > { %s688_s10 = sadd.f32 %s1076_s28, %s1541_s7 }
 0x13a   : > { %s710_s17 = sadd.f32 %s1078_s29, %s1039_s9 }
 0x13b   : > { %690 = sst [smem:[#allocation2 + $0x9]] %s688_s10 }
 0x13c   : > { %1122 = sst [smem:[#allocation9 + $0x9]] (%p823_p9), %s688_s10  ;;  %s1084_s25 = spop %1083 }
 0x13d   : > { %712 = sst [smem:[#allocation2 + $0x2]] %s710_s17  ;;  %s1086_s7 = spop %1085 }
 0x13e   : > { %1115 = sst [smem:[#allocation9 + $0x2]] (%p823_p9), %s710_s17  ;;  %s1088_s14 = spop %1087 }
 0x13f   : > { %s732_s6 = sadd.f32 %s1080_s22, %s1543_s11 }
 0x140   : > { %s754_s23 = sadd.f32 %s1082_s30, %s1547_s12  ;;  %s870_s12 = sshll.u32 %s1602_s5, 4  ;;  %s871_s12 = int_to_ptr.vmem [resolvable:$true] %s870_s12 }
 0x141   : > { %734 = sst [smem:[#allocation2 + $0x6]] %s732_s6 }
 0x142   : > { %1119 = sst [smem:[#allocation9 + $0x6]] (%p823_p9), %s732_s6 }
 0x143   : > { %756 = sst [smem:[#allocation2 + $0xa]] %s754_s23 }
 0x144   : > { %1123 = sst [smem:[#allocation9 + $0xa]] (%p823_p9), %s754_s23 }
 0x145   : > { %s776_s9 = sadd.f32 %s1084_s25, %s1549_s13  ;;  %s1295_s13 = smov [#allocation9]  }
 0x146   : > { %s798_s26 = sadd.f32 %s1086_s7, %s1551_s15 }
 0x147   : > { %778 = sst [smem:[#allocation2 + $0x3]] %s776_s9 }
 0x148   : > { %1116 = sst [smem:[#allocation9 + $0x3]] (%p823_p9), %s776_s9 }
 0x149   : > { %800 = sst [smem:[#allocation2 + $0x7]] %s798_s26 }
 0x14a   : > { %1120 = sst [smem:[#allocation9 + $0x7]] (%p823_p9), %s798_s26 }
 0x14b   : > { %s820_s8 = sadd.f32 %s1088_s14, %s1553_s21 }
 0x14d   : > { %822 = sst [smem:[#allocation2 + $0xb]] %s820_s8 }
 0x14e   : > { %1124 = sst [smem:[#allocation9 + $0xb]] (%p823_p9), %s820_s8 }
 0x14f   : > { %1126 = dma.smem_to_vmem (%p1145_p10), %s1295_s13, 16, %s871_s12, [#allocation5]  }
 0x150   : > { %1276 = dma.done.wait (%p1145_p10), [#allocation5], 16  }
 0x151   : > { %1278 = vsyncadd (%p1145_p10), [#allocation5], 4294967280 }
 0x152   : > { %879 = sfence }
 0x153 PF: > { %s18_s20 = sadd.s32 1, %s1289_s20   ;;  %s1605_s18 = smov %s1285_s19 }
 0x154   : > { %p15_p11 = scmp.ge.s32.totalorder %s18_s20, 4   ;;  %s1606_s19 = smov %s1608_s27 }
 0x156   :  { %17 = sbr.rel (!%p15_p11) target bundleno = 4 (0x4), region = 133 }
 0x15b   :  { %885 = vsyncpa [#allocation4], 1 }
 0x15c   :  { %887 = vsyncpa [#allocation4 + $0x1], 1 }
 0x15d   :  { %888 = vsyncpa [#allocation7], 1 }
 0x15e   :  { %889 = vsyncpa [#allocation5], 1 }
 0x15f   :  { %891 = vsyncpa [#allocation5 + $0x1], 1 }

// kernel: vat2d_v1.7
= control target key start
LH: loop header
LB: loop body
LE: loop exit
PB: predicated region body
PF: predicated region fallthrough
CT: control target
= control target key end

     0   :  { %s2478_s0 = inlined_call_operand.vmem [shape: f32[2,4,256], index: 0, kind: input, shape index: {}]   ;;  %s2479_s1 = inlined_call_operand.vmem [shape: f32[2,4,256], index: 1, kind: input, shape index: {}]   ;;  %s2480_s2 = inlined_call_operand.vmem [shape: f32[2], index: 2, kind: input, shape index: {}]   ;;  %s2481_s3 = inlined_call_operand.vmem [shape: f32[32], index: 3, kind: input, shape index: {}]   ;;  %s2482_s4 = inlined_call_operand.vmem [shape: f32[8], index: 4, kind: input, shape index: {}]   ;;  %s2483_s5 = inlined_call_operand.vmem [shape: f32[24], index: 5, kind: output, shape index: {}]  }
   0x1   :  { %2486 = sst [smem:[#allocation15_spill]] %s2478_s0 }
   0x2   :  { %2487 = sst [smem:[#allocation16_spill]] %s2479_s1 }
   0x3   :  { %2488 = sst [smem:[#allocation17_spill]] %s2480_s2 }
   0x4   :  { %2489 = sst [smem:[#allocation18_spill]] %s2481_s3 }
   0x5   :  { %2490 = sst [smem:[#allocation19_spill]] %s2482_s4 }
   0x6   :  { %10 = vsyncpa [#allocation4], 0 }
   0x7   :  { %11 = vsyncpa [#allocation7], 0 }
   0x8   :  { %12 = vsyncpa [#allocation5], 0  ;;  %s1852_s18 = smov 0   ;;  %s1854_s19 = smov 0  }
   0x9   :  { %s1856_s20 = smov 0  }
   0xa LB: > { %2491 = sst [smem:[#allocation13_spill]] %s1811_s19  ;;  %s2484_s24 = sadd.s32 4294967295, %s1815_s20   ;;  %s1815_s20 = sphi %s1856_s20, %s18_s20   ;;  %s1811_s19 = sphi %s1854_s19, %s2502_s19   ;;  %s1807_s18 = sphi %s1852_s18, %s2501_s18  }
   0xb   : > { %s2492_s3 = sld [smem:[#allocation18_spill]]  ;;  %p1410_p0 = scmp.ge.s32.totalorder %s1815_s20, 1 }
   0xc   : > { %p175_p1 = scmp.lt.s32.totalorder %s1815_s20, 3  ;;  %p1875_p2 = scmp.eq.s32.totalorder %s2484_s24, 0 }
   0xd   : > { %s30_s27 = sadd.s32 1, %s1811_s19  ;;  %s2495_s2 = sld [smem:[#allocation17_spill]] }
   0xe   : > { %p1879_p3 = pnand %p1410_p0, %p175_p1  ;;  %p32_p6 = scmp.ge.s32.totalorder %s30_s27, 2 }
   0xf   : > { %s2496_s4 = sld [smem:[#allocation19_spill]]  ;;  %s1817_s9 = smov [#allocation6]  }
  0x10   : > { %p1635_p4 = pneg %p1879_p3  ;;  %s2504_s27 = smov (%p32_p6, %s30_s27), 0 }
  0x11   : > { %s197_s23 = sshll.u32 %s2492_s3, 4  ;;  %2497 = sst [smem:[#allocation14_spill]] %s2504_s27  ;;  %s198_s23 = int_to_ptr.vmem [resolvable:$true] %s197_s23 }
  0x12   : > { %p1636_p5 = pnand %p1875_p2, %p1635_p4  ;;  %s1818_s10 = smov [#allocation3]  }
  0x13   : > { %s187_s30 = sshll.u32 %s2495_s2, 4  ;;  %s1819_s11 = smov [#allocation8]   ;;  %s188_s30 = int_to_ptr.vmem [resolvable:$true] %s187_s30 }
  0x14   : > { %1641 = dma.vmem_to_smem (!%p1636_p5), %s198_s23, 16, %s1817_s9, [#allocation7]  }
  0x15   : > { %s207_s8 = sshll.u32 %s2496_s4, 4  ;;  %246 = sbr.rel (%p1879_p3) target bundleno = 406 (0x196), region = 40  ;;  %s208_s8 = int_to_ptr.vmem [resolvable:$true] %s207_s8 }
  0x16   : > { %1638 = dma.vmem_to_smem (!%p1636_p5), %s188_s30, 16, %s1818_s10, [#allocation4]  }
  0x17   : > { %1644 = dma.vmem_to_smem (!%p1636_p5), %s208_s8, 16, %s1819_s11, [#allocation7]  }
  0x1a   : > { %1794 = dma.done.wait (%p1875_p2), [#allocation4], 16  }
  0x1b   : > { %1796 = vsyncadd (%p1875_p2), [#allocation4], 4294967280 }
  0x1c   : > { %1798 = dma.done.wait (%p1875_p2), [#allocation7], 32  }
  0x1d   : > { %1800 = vsyncadd (%p1875_p2), [#allocation7], 4294967264 }
  0x1e   : > { %263 = sfence }
  0x1f   : > { %p295_p7 = scmp.lt.s32.totalorder %s1807_s18, 1  ;;  %s368_s12 = sld [smem:[#allocation3 + %s1807_s18]]  ;;  %vm699_vm0 = vcmask 1040384  }
  0x20   : > { %s1908_s13 = sld [smem:[#allocation6]]  ;;  %p314_p8 = scmp.eq.s32.totalorder %s1807_s18, 0 }
  0x21   : > { %s296_s14 = scalar_select %p295_p7, %s1807_s18, 1 }
  0x22   : > { %s1911_s15 = sld [smem:[#allocation6 + $0x4]]  ;;  %p1221_p9 = scmp.eq.s32.totalorder %s1807_s18, 1 }
  0x23   : > { %s1519_s16 = sshll.u32 %s296_s14, 3  ;;  %s1913_s17 = sld [smem:[#allocation6 + $0x8]] }
  0x24   : > { %s2498_s0 = sld [smem:[#allocation15_spill]] }
  0x25   : > { %s2499_s1 = sld [smem:[#allocation16_spill]]  ;;  %v377_v1 = vstv %s368_s12 }
  0x26   : > { %v393_v4 = vstv %s1908_s13  ;;  %s1432_s29 = sld [smem:[#allocation6 + $0xc]] }
  0x27   : > { %s1935_s30 = sld [smem:[#allocation8]] }
  0x28   : > { %v396_v12 = vstv %s1911_s15  ;;  %s1433_s6 = sld [smem:[#allocation6 + $0x1]] }
  0x29   : > { %v400_v15 = vstv %s1913_s17  ;;  %s1434_s7 = sld [smem:[#allocation6 + $0x5]] }
  0x2a   : > { %s302_s23 = scalar_lea.vmem %s2498_s0, %s1519_s16  ;;  %s1435_s8 = sld [smem:[#allocation6 + $0x9]] }
  0x2b   : > { %s312_s28 = scalar_lea.vmem %s2499_s1, %s1519_s16  ;;  %v1921_v0 = vld [vmem:[%s302_s23] ss:$4 sm:$0x3]  ;;  %v1923_v2 = vld [vmem:[%s302_s23 + $0x1] ss:$4 sm:$0x3] }
  0x2c   : > { %v1925_v3 = vld [vmem:[%s302_s23 + $0x2] ss:$4 sm:$0x3]  ;;  %v376_v5 = vld [vmem:[%s312_s28] ss:$4 sm:$0x3]  ;;  %v487_v7 = vmul.f32 %v393_v4, %v1921_v0  ;;  %v488_v16 = vmul.f32 %v1923_v2, %v396_v12  ;;  %v404_v29 = vstv %s1432_s29 }
  0x2d   : > { %v1427_v6 = vld [vmem:[%s312_s28 + $0x1] ss:$4 sm:$0x3]  ;;  %v378_v8 = vmul.f32 %v377_v1, %v376_v5  ;;  %v1428_v10 = vld [vmem:[%s312_s28 + $0x2] ss:$4 sm:$0x3]  ;;  %v490_v18 = vmul.f32 %v1925_v3, %v400_v15  ;;  %v408_v33 = vstv %s1935_s30 }
  0x2e   : > { %v382_v9 = vmul.f32 %v1427_v6, %v377_v1  ;;  %v1429_v11 = vld [vmem:[%s312_s28 + $0x3] ss:$4 sm:$0x3]  ;;  %v386_v13 = vmul.f32 %v1428_v10, %v377_v1  ;;  %v489_v22 = vadd.f32 %v488_v16, %v487_v7  ;;  %s1436_s9 = sld [smem:[#allocation6 + $0xd]]  ;;  %v411_v34 = vstv %s1433_s6 }
  0x2f   : > { %v390_v14 = vmul.f32 %v1429_v11, %v377_v1  ;;  %v1939_v19 = vadd.f32 %v378_v8, %v1921_v0  ;;  %v1941_v20 = vld [vmem:[%s302_s23 + $0x3] ss:$4 sm:$0x3]  ;;  %s1952_s10 = sld [smem:[#allocation8 + $0x1]]  ;;  %v414_v35 = vstv %s1434_s7  ;;  %v495_v37 = vmul.f32 %v411_v34, %v1921_v0 }
  0x30   : > { %v1933_v17 = vadd.f32 %v1923_v2, %v382_v9  ;;  %v1944_v21 = vadd.f32 %v1925_v3, %v386_v13  ;;  %v491_v27 = vadd.f32 %v490_v18, %v489_v22  ;;  %s1954_s11 = sld [smem:[#allocation6 + $0x2]]  ;;  %v492_v30 = vmul.f32 %v1941_v20, %v404_v29 }
  0x31   : > { %v1947_v23 = vadd.f32 %v1941_v20, %v390_v14  ;;  %v394_v24 = vmul.f32 %v393_v4, %v1939_v19  ;;  %s1959_s12 = sld [smem:[#allocation6 + $0x6]]  ;;  %v412_v38 = vmul.f32 %v411_v34, %v1939_v19  ;;  %v418_v40 = vstv %s1435_s8 }
  0x32   : > { %v397_v25 = vmul.f32 %v396_v12, %v1933_v17  ;;  %v401_v26 = vmul.f32 %v400_v15, %v1944_v21  ;;  %s1961_s13 = sld [smem:[#allocation6 + $0xa]]  ;;  %v493_v36 = vadd.f32 %v492_v30, %v491_v27  ;;  %v415_v39 = vmul.f32 %v414_v35, %v1933_v17 }
  0x33   : > { %v405_v32 = vmul.f32 %v404_v29, %v1947_v23  ;;  %s1966_s14 = sld [smem:[#allocation6 + $0xe]]  ;;  %v496_v41 = vmul.f32 %v1923_v2, %v414_v35  ;;  %v419_v43 = vmul.f32 %v418_v40, %v1944_v21  ;;  %v498_v45 = vmul.f32 %v1925_v3, %v418_v40 }
  0x34   : > { %v398_v28 = vadd.f32 %v397_v25, %v394_v24  ;;  %v422_v44 = vstv %s1436_s9  ;;  %s1970_s15 = sld [smem:[#allocation8 + $0x2]]  ;;  %v1976_v47 = vadd.f32 %v493_v36, %v408_v33  ;;  %v416_v52 = vadd.f32 %v415_v39, %v412_v38 }
  0x35   : > { %v423_v46 = vmul.f32 %v422_v44, %v1947_v23  ;;  %s1974_s16 = sld [smem:[#allocation6 + $0x3]]  ;;  %v497_v48 = vadd.f32 %v496_v41, %v495_v37  ;;  %v500_v49 = vmul.f32 %v1941_v20, %v422_v44  ;;  %v426_v50 = vstv %s1952_s10 }
  0x36   : > { %v402_v31 = vadd.f32 %v401_v26, %v398_v28  ;;  %v429_v51 = vstv %s1954_s11  ;;  %s1981_s17 = sld [smem:[#allocation6 + $0x7]]  ;;  %v420_v60 = vadd.f32 %v419_v43, %v416_v52 }
  0x37   : > { %v432_v54 = vstv %s1959_s12  ;;  %s1986_s21 = sld [smem:[#allocation6 + $0xb]]  ;;  %v499_v55 = vadd.f32 %v498_v45, %v497_v48  ;;  %v503_v56 = vmul.f32 %v429_v51, %v1921_v0  ;;  %v430_v57 = vmul.f32 %v429_v51, %v1939_v19 }
  0x38   : > { %v406_v42 = vadd.f32 %v405_v32, %v402_v31  ;;  %v436_v58 = vstv %s1961_s13  ;;  %s1991_s22 = sld [smem:[#allocation6 + $0xf]]  ;;  %v504_v59 = vmul.f32 %v1923_v2, %v432_v54  ;;  %v433_v61 = vmul.f32 %v432_v54, %v1933_v17 }
  0x39   : > { %v440_v62 = vstv %s1966_s14  ;;  %s1996_s23 = sld [smem:[#allocation8 + $0x3]]  ;;  %v501_v63 = vadd.f32 %v500_v49, %v499_v55  ;;  %v506_v1 = vmul.f32 %v1925_v3, %v436_v58  ;;  %v437_v4 = vmul.f32 %v436_v58, %v1944_v21 }
  0x3a   : > { %v1983_v53 = vadd.f32 %v408_v33, %v406_v42  ;;  %v444_v5 = vstv %s1970_s15  ;;  %v505_v6 = vadd.f32 %v504_v59, %v503_v56  ;;  %v508_v7 = vmul.f32 %v1941_v20, %v440_v62  ;;  %s2002_s25 = sld [smem:[#allocation6 + $0x10]] }
  0x3b   : > { %v424_v8 = vadd.f32 %v423_v46, %v420_v60  ;;  %v447_v9 = vstv %s1974_s16  ;;  %v2005_v10 = vadd.f32 %v501_v63, %v426_v50  ;;  %v434_v11 = vadd.f32 %v433_v61, %v430_v57  ;;  %s2008_s26 = sld [smem:[#allocation6 + $0x14]] }
  0x3c   : > { %v441_v12 = vmul.f32 %v440_v62, %v1947_v23  ;;  %v450_v13 = vstv %s1981_s17  ;;  %v507_v14 = vadd.f32 %v506_v1, %v505_v6  ;;  %v511_v15 = vmul.f32 %v447_v9, %v1921_v0  ;;  %s2014_s28 = sld [smem:[#allocation6 + $0x18]] }
  0x3d   : > { %v2012_v16 = vadd.f32 %v426_v50, %v424_v8  ;;  %v454_v18 = vstv %s1986_s21  ;;  %v512_v22 = vmul.f32 %v1923_v2, %v450_v13  ;;  %v519_v24 = vmax.f32 %v1976_v47, %v2005_v10  ;;  %s2020_s29 = sld [smem:[#allocation6 + $0x1c]] }
  0x3e   : > { %v438_v25 = vadd.f32 %v437_v4, %v434_v11  ;;  %v458_v26 = vstv %s1991_s22  ;;  %v509_v27 = vadd.f32 %v508_v7, %v507_v14  ;;  %v514_v28 = vmul.f32 %v1925_v3, %v454_v18  ;;  %s2025_s30 = sld [smem:[#allocation8 + $0x4]] }
  0x3f   : > { %v448_v29 = vmul.f32 %v447_v9, %v1939_v19  ;;  %v513_v30 = vadd.f32 %v512_v22, %v511_v15  ;;  %v516_v31 = vmul.f32 %v1941_v20, %v458_v26  ;;  %s2028_s6 = sld [smem:[#allocation6 + $0x11]]  ;;  %v462_v33 = vstv %s1996_s23 }
  0x40   : > { %v442_v32 = vadd.f32 %v441_v12, %v438_v25  ;;  %v510_v34 = vadd.f32 %v509_v27, %v444_v5  ;;  %v451_v35 = vmul.f32 %v450_v13, %v1933_v17  ;;  %v455_v36 = vmul.f32 %v454_v18, %v1944_v21  ;;  %s2033_s7 = sld [smem:[#allocation6 + $0x15]] }
  0x41   : > { %v515_v37 = vadd.f32 %v514_v28, %v513_v30  ;;  %v464_v39 = vmax.f32 %v1983_v53, %v2012_v16  ;;  %v543_v40 = vstv %s2002_s25  ;;  %s2040_s8 = sld [smem:[#allocation6 + $0x19]]  ;;  %v459_v43 = vmul.f32 %v458_v26, %v1947_v23  ;;  %s1820_s25 = smov 0.0  }
  0x42   : > { %v2035_v38 = vadd.f32 %v444_v5, %v442_v32  ;;  %v520_v41 = vmax.f32 %v519_v24, %v510_v34  ;;  %v452_v42 = vadd.f32 %v451_v35, %v448_v29  ;;  %v546_v44 = vstv %s2008_s26  ;;  %s2044_s9 = sld [smem:[#allocation6 + $0x1d]] }
  0x43   : > { %v517_v45 = vadd.f32 %v516_v31, %v515_v37  ;;  %v550_v48 = vstv %s2014_s28  ;;  %v554_v49 = vstv %s2020_s29  ;;  %s2049_s10 = sld [smem:[#allocation8 + $0x5]]  ;;  %v637_v52 = vmul.f32 %v543_v40, %v1921_v0 }
  0x44   : > { %v465_v46 = vmax.f32 %v464_v39, %v2035_v38  ;;  %v456_v50 = vadd.f32 %v455_v36, %v452_v42  ;;  %v558_v51 = vstv %s2025_s30  ;;  %s2052_s11 = sld [smem:[#allocation6 + $0x12]]  ;;  %v638_v54 = vmul.f32 %v1923_v2, %v546_v44 }
  0x45   : > { %v518_v55 = vadd.f32 %v517_v45, %v462_v33  ;;  %v561_v56 = vstv %s2028_s6  ;;  %s2059_s12 = sld [smem:[#allocation6 + $0x16]]  ;;  %v640_v57 = vmul.f32 %v1925_v3, %v550_v48  ;;  %v642_v58 = vmul.f32 %v1941_v20, %v554_v49 }
  0x46   : > { %v460_v59 = vadd.f32 %v459_v43, %v456_v50  ;;  %v564_v60 = vstv %s2033_s7  ;;  %s2068_s13 = sld [smem:[#allocation6 + $0x1a]]  ;;  %v639_v61 = vadd.f32 %v638_v54, %v637_v52  ;;  %v645_v62 = vmul.f32 %v561_v56, %v1921_v0 }
  0x47   : > { %v521_v63 = vmax.f32 %v520_v41, %v518_v55  ;;  %v568_v1 = vstv %s2040_s8  ;;  %s2074_s14 = sld [smem:[#allocation6 + $0x1e]]  ;;  %v646_v4 = vmul.f32 %v1923_v2, %v564_v60  ;;  %v2080_v5 = vmul.f32 %v543_v40, %v1939_v19 }
  0x48   : > { %v463_v6 = vadd.f32 %v462_v33, %v460_v59  ;;  %v572_v7 = vstv %s2044_s9  ;;  %s2083_s15 = sld [smem:[#allocation8 + $0x6]]  ;;  %v641_v8 = vadd.f32 %v640_v57, %v639_v61  ;;  %v648_v9 = vmul.f32 %v1925_v3, %v568_v1 }
  0x49   : > { %v522_v11 = vsub.f32 %v1976_v47, %v521_v63  ;;  %v525_v12 = vsub.f32 %v2005_v10, %v521_v63  ;;  %v528_v13 = vsub.f32 %v510_v34, %v521_v63  ;;  %v531_v14 = vsub.f32 %v518_v55, %v521_v63  ;;  %s2090_s16 = sld [smem:[#allocation6 + $0x13]] }
  0x4a   : > { %v466_v15 = vmax.f32 %v465_v46, %v463_v6  ;;  %v576_v18 = vstv %s2049_s10  ;;  %v579_v22 = vstv %s2052_s11  ;;  %s2094_s17 = sld [smem:[#allocation6 + $0x17]]  ;;  %v643_v24 = vadd.f32 %v642_v58, %v641_v8 }
  0x4b   : > { %v523_v25 = vmul.f32 1.442695, %v522_v11  ;;  %v526_v26 = vmul.f32 1.442695, %v525_v12  ;;  %v529_v27 = vmul.f32 1.442695, %v528_v13  ;;  %v582_v28 = vstv %s2059_s12 }
  0x4c   : > { %v532_v29 = vmul.f32 1.442695, %v531_v14  ;;  %v467_v47 = vsub.f32 %v1983_v53, %v466_v15  ;;  %v470_v10 = vsub.f32 %v2012_v16, %v466_v15  ;;  %v473_v30 = vsub.f32 %v2035_v38, %v466_v15  ;;  %s2100_s21 = sld [smem:[#allocation6 + $0x1b]] }
  0x4d   : > { %1682 = vpow2.f32 %v523_v25  ;;  %v476_v31 = vsub.f32 %v463_v6, %v466_v15  ;;  %v586_v32 = vstv %s2068_s13  ;;  %v590_v33 = vstv %s2074_s14  ;;  %s2104_s22 = sld [smem:[#allocation6 + $0x1f]] }
  0x4e   : > { %1684 = vpow2.f32 %v526_v26  ;;  %v468_v53 = vmul.f32 1.442695, %v467_v47  ;;  %v471_v34 = vmul.f32 1.442695, %v470_v10  ;;  %v474_v16 = vmul.f32 1.442695, %v473_v30 }
  0x4f   : > { %1686 = vpow2.f32 %v529_v27  ;;  %v477_v35 = vmul.f32 1.442695, %v476_v31  ;;  %v594_v36 = vstv %s2083_s15  ;;  %v597_v37 = vstv %s2090_s16  ;;  %s2108_s23 = sld [smem:[#allocation8 + $0x7]] }
  0x50   : > { %1688 = vpow2.f32 %v532_v29  ;;  %v600_v38 = vstv %s2094_s17  ;;  %v2113_v39 = vadd.f32 %v643_v24, %v558_v51  ;;  %v647_v40 = vadd.f32 %v646_v4, %v645_v62  ;;  %1583 = sst [smem:[#allocation2]] (%p314_p8), %s1820_s25 }
  0x51   : > { %1690 = vpow2.f32 %v468_v53  ;;  %v650_v41 = vmul.f32 %v1941_v20, %v572_v7  ;;  %v653_v42 = vmul.f32 %v579_v22, %v1921_v0  ;;  %v654_v43 = vmul.f32 %v1923_v2, %v582_v28  ;;  %1587 = sst [smem:[#allocation2 + $0x4]] (%p314_p8), %s1820_s25 }
  0x52   : > { %1692 = vpow2.f32 %v471_v34  ;;  %v604_v45 = vstv %s2100_s21  ;;  %v649_v46 = vadd.f32 %v648_v9, %v647_v40  ;;  %v656_v50 = vmul.f32 %v1925_v3, %v586_v32  ;;  %1591 = sst [smem:[#allocation2 + $0x8]] (%p314_p8), %s1820_s25 }
  0x53   : > { %v2128_v52 = vpop.eup %1682  ;;  %1694 = vpow2.f32 %v474_v16  ;;  %v608_v54 = vstv %s2104_s22  ;;  %v655_v55 = vadd.f32 %v654_v43, %v653_v42  ;;  %v658_v57 = vmul.f32 %v1941_v20, %v590_v33  ;;  %1584 = sst [smem:[#allocation2 + $0x1]] (%p314_p8), %s1820_s25 }
  0x54   : > { %v1685_v58 = vpop.eup %1684  ;;  %1696 = vpow2.f32 %v477_v35  ;;  %v651_v59 = vadd.f32 %v650_v41, %v649_v46  ;;  %v661_v61 = vmul.f32 %v597_v37, %v1921_v0  ;;  %v662_v62 = vmul.f32 %v1923_v2, %v600_v38  ;;  %1588 = sst [smem:[#allocation2 + $0x5]] (%p314_p8), %s1820_s25 }
  0x55   : > { %v1687_v63 = vpop.eup %1686  ;;  %v534_v4 = vadd.f32 %v1685_v58, %v2128_v52  ;;  %v612_v6 = vstv %s2108_s23  ;;  %v657_v8 = vadd.f32 %v656_v50, %v655_v55  ;;  %v664_v9 = vmul.f32 %v1925_v3, %v604_v45  ;;  %1592 = sst [smem:[#allocation2 + $0x9]] (%p314_p8), %s1820_s25 }
  0x56   : > { %v1689_v11 = vpop.eup %1688  ;;  %v652_v12 = vadd.f32 %v651_v59, %v576_v18  ;;  %v663_v13 = vadd.f32 %v662_v62, %v661_v61  ;;  %v666_v0 = vmul.f32 %v1941_v20, %v608_v54  ;;  %v547_v2 = vmul.f32 %v546_v44, %v1933_v17  ;;  %1585 = sst [smem:[#allocation2 + $0x2]] (%p314_p8), %s1820_s25 }
  0x57   : > { %v2153_v14 = vpop.eup %1690  ;;  %v535_v15 = vadd.f32 %v1687_v63, %v534_v4  ;;  %v659_v24 = vadd.f32 %v658_v57, %v657_v8  ;;  %v551_v3 = vmul.f32 %v550_v48, %v1944_v21  ;;  %v555_v25 = vmul.f32 %v554_v49, %v1947_v23  ;;  %1589 = sst [smem:[#allocation2 + $0x6]] (%p314_p8), %s1820_s25 }
  0x58   : > { %v1693_v26 = vpop.eup %1692  ;;  %v665_v27 = vadd.f32 %v664_v9, %v663_v13  ;;  %v669_v29 = vmax.f32 %v2113_v39, %v652_v12  ;;  %v548_v20 = vadd.f32 %v547_v2, %v2080_v5  ;;  %v562_v44 = vmul.f32 %v561_v56, %v1939_v19  ;;  %1593 = sst [smem:[#allocation2 + $0xa]] (%p314_p8), %s1820_s25 }
  0x59   : > { %v2166_v47 = vpop.eup %1694  ;;  %v536_v10 = vadd.f32 %v1689_v11, %v535_v15  ;;  %v479_v48 = vadd.f32 %v1693_v26, %v2153_v14  ;;  %v660_v30 = vadd.f32 %v659_v24, %v594_v36  ;;  %v565_v49 = vmul.f32 %v564_v60, %v1933_v17  ;;  %1586 = sst [smem:[#allocation2 + $0x3]] (%p314_p8), %s1820_s25 }
  0x5a   : > { %v2174_v31 = vpop.eup %1696  ;;  %v667_v5 = vadd.f32 %v666_v0, %v665_v27  ;;  %v552_v53 = vadd.f32 %v551_v3, %v548_v20  ;;  %v569_v56 = vmul.f32 %v568_v1, %v1944_v21  ;;  %v580_v60 = vmul.f32 %v579_v22, %v1939_v19  ;;  %1590 = sst [smem:[#allocation2 + $0x7]] (%p314_p8), %s1820_s25 }
  0x5b   : > { %1698 = vrcp.f32 %v536_v10  ;;  %v480_v34 = vadd.f32 %v2166_v47, %v479_v48  ;;  %v670_v16 = vmax.f32 %v669_v29, %v660_v30  ;;  %v566_v35 = vadd.f32 %v565_v49, %v562_v44  ;;  %1594 = sst [smem:[#allocation2 + $0xb]] (%p314_p8), %s1820_s25 }
  0x5c   : > { %v668_v40 = vadd.f32 %v667_v5, %v612_v6  ;;  %v583_v41 = vmul.f32 %v582_v28, %v1933_v17  ;;  %v556_v1 = vadd.f32 %v555_v25, %v552_v53  ;;  %v573_v50 = vmul.f32 %v572_v7, %v1947_v23  ;;  %1595 = sst [smem:[#allocation2 + $0xc]] (%p314_p8), %s1820_s25 }
  0x5d   : > { %v481_v42 = vadd.f32 %v2174_v31, %v480_v34  ;;  %v570_v46 = vadd.f32 %v569_v56, %v566_v35  ;;  %v587_v55 = vmul.f32 %v586_v32, %v1944_v21  ;;  %v598_v22 = vmul.f32 %v597_v37, %v1939_v19  ;;  %1599 = sst [smem:[#allocation2 + $0x10]] (%p314_p8), %s1820_s25 }
  0x5e   : > { %v671_v43 = vmax.f32 %v670_v16, %v668_v40  ;;  %v584_v57 = vadd.f32 %v583_v41, %v580_v60  ;;  %v601_v28 = vmul.f32 %v600_v38, %v1933_v17  ;;  %v591_v59 = vmul.f32 %v590_v33, %v1947_v23  ;;  %1603 = sst [smem:[#allocation2 + $0x14]] (%p314_p8), %s1820_s25 }
  0x5f   : > { %1700 = vrcp.f32 %v481_v42  ;;  %v2207_v32 = vadd.f32 %v558_v51, %v556_v1  ;;  %v574_v9 = vadd.f32 %v573_v50, %v570_v46  ;;  %v605_v33 = vmul.f32 %v604_v45, %v1944_v21  ;;  %1596 = sst [smem:[#allocation2 + $0xd]] (%p314_p8), %s1820_s25 }
  0x60   : > { %v672_v7 = vsub.f32 %v2113_v39, %v671_v43  ;;  %v675_v62 = vsub.f32 %v652_v12, %v671_v43  ;;  %v678_v4 = vsub.f32 %v660_v30, %v671_v43  ;;  %v681_v17 = vsub.f32 %v668_v40, %v671_v43  ;;  %1600 = sst [smem:[#allocation2 + $0x11]] (%p314_p8), %s1820_s25 }
  0x61   : > { %v1699_v61 = vpop.eup %1698  ;;  %v588_v38 = vadd.f32 %v587_v55, %v584_v57  ;;  %v602_v13 = vadd.f32 %v601_v28, %v598_v22  ;;  %v609_v51 = vmul.f32 %v608_v54, %v1947_v23  ;;  %1604 = sst [smem:[#allocation2 + $0x15]] (%p314_p8), %s1820_s25 }
  0x62   : > { %v539_v8 = vmul.f32 %v1699_v61, %v1685_v58  ;;  %v538_v19 = vmul.f32 %v1699_v61, %v2128_v52  ;;  %v2210_v37 = vmul.f32 %v1699_v61, %v1687_v63  ;;  %v2220_v12 = vmul.f32 %v1699_v61, %v1689_v11  ;;  %1597 = sst [smem:[#allocation2 + $0xe]] (%p314_p8), %s1820_s25 }
  0x63   : > { %v673_v52 = vmul.f32 1.442695, %v672_v7  ;;  %v676_v63 = vmul.f32 1.442695, %v675_v62  ;;  %v679_v15 = vmul.f32 1.442695, %v678_v4  ;;  %v592_v49 = vadd.f32 %v591_v59, %v588_v38 }
  0x64   : > { %v804_v0 = vmul.f32 %v539_v8, %v539_v8  ;;  %v738_v2 = vmul.f32 %v538_v19, %v538_v19  ;;  %v870_v39 = vmul.f32 %v2210_v37, %v2210_v37  ;;  %v682_v16 = vmul.f32 1.442695, %v681_v17  ;;  %1601 = sst [smem:[#allocation2 + $0x12]] (%p314_p8), %s1820_s25 }
  0x65   : > { %v1701_v58 = vpop.eup %1700  ;;  %1702 = vpow2.f32 %v673_v52  ;;  %v606_v46 = vadd.f32 %v605_v33, %v602_v13  ;;  %1605 = sst [smem:[#allocation2 + $0x16]] (%p314_p8), %s1820_s25 }
  0x66   : > { %v806_v24 = vperm.slane %v804_v0, 0  ;;  %v807_v3 = vperm.slane %v804_v0, 1  ;;  %v740_v25 = vperm.slane %v738_v2, 0  ;;  %v741_v27 = vperm.slane %v738_v2, 1  ;;  %1598 = sst [smem:[#allocation2 + $0xf]] (%p314_p8), %s1820_s25 }
  0x67   : > { %v483_v21 = vmul.f32 %v1701_v58, %v2153_v14  ;;  %v872_v45 = vperm.slane %v870_v39, 0  ;;  %v873_v29 = vperm.slane %v870_v39, 1  ;;  %v2223_v20 = vmul.f32 %v1701_v58, %v1693_v26  ;;  %1602 = sst [smem:[#allocation2 + $0x13]] (%p314_p8), %s1820_s25 }
  0x68   : > { %v810_v44 = vsel %vm699_vm0, %v806_v24, 0.0  ;;  %v811_v23 = vsel %vm699_vm0, %v807_v3, 0.0  ;;  %v744_v54 = vsel %vm699_vm0, %v740_v25, 0.0  ;;  %v745_v11 = vsel %vm699_vm0, %v741_v27, 0.0  ;;  %1606 = sst [smem:[#allocation2 + $0x17]] (%p314_p8), %s1820_s25 }
  0x69   : > { %v812_v10 = vadd.f32 %v811_v23, %v810_v44  ;;  %v746_v48 = vadd.f32 %v745_v11, %v744_v54  ;;  %v693_v30 = vmul.f32 %v538_v19, %v483_v21  ;;  %v760_v5 = vmul.f32 %v539_v8, %v2223_v20  ;;  %s2353_s26 = sld [smem:[#allocation2]] }
  0x6a   : > { %v716_v53 = vmul.f32 %v483_v21, %v483_v21  ;;  %v936_v14 = vmul.f32 %v2220_v12, %v2220_v12  ;;  %v876_v34 = vsel %vm699_vm0, %v872_v45, 0.0  ;;  %v877_v35 = vsel %vm699_vm0, %v873_v29, 0.0  ;;  %s2357_s29 = sld [smem:[#allocation2 + $0x4]] }
  0x6b   : > { %813 = vadd.xlane.f32.xlu2 %v812_v10  ;;  %747 = vadd.xlane.f32.xlu1 %v746_v48  ;;  %v695_v26 = vperm.slane %v693_v30, 0  ;;  %v696_v56 = vperm.slane %v693_v30, 1  ;;  %v762_v40 = vperm.slane %v760_v5, 0  ;;  %v763_v60 = vperm.slane %v760_v5, 1  ;;  %v2239_v62 = vpop.eup %1702  ;;  %s2360_s6 = sld [smem:[#allocation2 + $0x8]] }
  0x6c   : > { %v718_v41 = vperm.slane %v716_v53, 0  ;;  %v719_v43 = vperm.slane %v716_v53, 1  ;;  %v938_v22 = vperm.slane %v936_v14, 0  ;;  %v878_v28 = vadd.f32 %v877_v35, %v876_v34  ;;  %s2365_s7 = sld [smem:[#allocation2 + $0x1]] }
  0x6d   : > { %v700_v42 = vsel %vm699_vm0, %v695_v26, 0.0  ;;  %v701_v1 = vsel %vm699_vm0, %v696_v56, 0.0  ;;  %v766_v55 = vsel %vm699_vm0, %v762_v40, 0.0  ;;  %v767_v57 = vsel %vm699_vm0, %v763_v60, 0.0  ;;  %s1471_s14 = sld [smem:[#allocation2 + $0x5]] }
  0x6e   : > { %v702_v50 = vadd.f32 %v701_v1, %v700_v42  ;;  %v768_v59 = vadd.f32 %v767_v57, %v766_v55  ;;  %v939_v61 = vperm.slane %v936_v14, 1  ;;  %v485_v7 = vmul.f32 %v1701_v58, %v2166_v47  ;;  %s1472_s15 = sld [smem:[#allocation2 + $0x9]] }
  0x6f   : > { %v722_v4 = vsel %vm699_vm0, %v718_v41, 0.0  ;;  %1704 = vpow2.f32 %v676_v63  ;;  %v486_v8 = vmul.f32 %v1701_v58, %v2174_v31  ;;  %v577_v19 = vadd.f32 %v576_v18, %v574_v9  ;;  %s1473_s16 = sld [smem:[#allocation2 + $0x2]] }
  0x70   : > { %703 = vadd.xlane.f32.xlu0 %v702_v50  ;;  %v723_v17 = vsel %vm699_vm0, %v719_v43, 0.0  ;;  %v848_v38 = vmul.f32 %v485_v7, %v485_v7  ;;  %v826_v13 = vmul.f32 %v2210_v37, %v485_v7  ;;  %1706 = vpow2.f32 %v679_v15  ;;  %s1474_s17 = sld [smem:[#allocation2 + $0x6]] }
  0x71   : > { %v942_v33 = vsel %vm699_vm0, %v938_v22, 0.0  ;;  %1708 = vpow2.f32 %v682_v16  ;;  %v595_v47 = vadd.f32 %v594_v36, %v592_v49  ;;  %v610_v0 = vadd.f32 %v609_v51, %v606_v46  ;;  %s2376_s21 = sld [smem:[#allocation2 + $0xa]] }
  0x72   : > { %v943_v2 = vsel %vm699_vm0, %v939_v61, 0.0  ;;  %v850_v31 = vperm.slane %v848_v38, 0  ;;  %v851_v39 = vperm.slane %v848_v38, 1  ;;  %v914_v18 = vmul.f32 %v486_v8, %v486_v8  ;;  %s2378_s22 = sld [smem:[#allocation2 + $0x3]] }
  0x73   : > { %879 = vadd.xlane.f32.xlu2 %v878_v28  ;;  %769 = vadd.xlane.f32.xlu1 %v768_v59  ;;  %v724_v9 = vadd.f32 %v723_v17, %v722_v4  ;;  %v828_v58 = vperm.slane %v826_v13, 0  ;;  %v829_v52 = vperm.slane %v826_v13, 1  ;;  %v614_v37 = vmax.f32 %v2207_v32, %v577_v19  ;;  %s2380_s23 = sld [smem:[#allocation2 + $0x7]] }
  0x74   : > { %v854_v63 = vsel %vm699_vm0, %v850_v31, 0.0  ;;  %v855_v15 = vsel %vm699_vm0, %v851_v39, 0.0  ;;  %v944_v36 = vadd.f32 %v943_v2, %v942_v33  ;;  %v613_v51 = vadd.f32 %v612_v6, %v610_v0  ;;  %s2382_s25 = sld [smem:[#allocation2 + $0xb]] }
  0x75   : > { %v1705_v24 = vpop.eup %1704  ;;  %v856_v25 = vadd.f32 %v855_v15, %v854_v63  ;;  %v916_v21 = vperm.slane %v914_v18, 0  ;;  %v917_v45 = vperm.slane %v914_v18, 1  ;;  %v832_v44 = vsel %vm699_vm0, %v828_v58, 0.0  ;;  %s2406_s24 = sld [smem:[#allocation2 + $0x17]] }
  0x76   : > { %v1707_v3 = vpop.eup %1706  ;;  %v684_v27 = vadd.f32 %v1705_v24, %v2239_v62  ;;  %v833_v23 = vsel %vm699_vm0, %v829_v52, 0.0  ;;  %v615_v54 = vmax.f32 %v614_v37, %v595_v47  ;;  %v892_v10 = vmul.f32 %v2220_v12, %v486_v8 }
  0x77   : > { %v2257_v29 = vpop.eup %1708  ;;  %v834_v6 = vadd.f32 %v833_v23, %v832_v44  ;;  %v920_v49 = vsel %vm699_vm0, %v916_v21, 0.0  ;;  %v921_v5 = vsel %vm699_vm0, %v917_v45, 0.0  ;;  %v782_v52 = vmul.f32 %v2223_v20, %v2223_v20 }
  0x78   : > { %725 = vadd.xlane.f32.xlu0 %v724_v9  ;;  %v685_v11 = vadd.f32 %v1707_v3, %v684_v27  ;;  %v616_v48 = vmax.f32 %v615_v54, %v613_v51  ;;  %v894_v34 = vperm.slane %v892_v10, 0  ;;  %v895_v16 = vperm.slane %v892_v10, 1 }
  0x79   : > { %v922_v60 = vadd.f32 %v921_v5, %v920_v49  ;;  %v785_v44 = vperm.slane %v782_v52, 1 }
  0x7a   : > { %v686_v30 = vadd.f32 %v2257_v29, %v685_v11  ;;  %v617_v53 = vsub.f32 %v2207_v32, %v616_v48  ;;  %v620_v14 = vsub.f32 %v577_v19, %v616_v48  ;;  %v623_v26 = vsub.f32 %v595_v47, %v616_v48 }
  0x7b   : > { %945 = vadd.xlane.f32.xlu2 %v944_v36  ;;  %857 = vadd.xlane.f32.xlu1 %v856_v25  ;;  %v626_v56 = vsub.f32 %v613_v51, %v616_v48  ;;  %v898_v42 = vsel %vm699_vm0, %v894_v34, 0.0  ;;  %v899_v1 = vsel %vm699_vm0, %v895_v16, 0.0  ;;  %v784_v51 = vperm.slane %v782_v52, 0 }
  0x7c   : > { %1710 = vrcp.f32 %v686_v30  ;;  %v618_v35 = vmul.f32 1.442695, %v617_v53  ;;  %v621_v12 = vmul.f32 1.442695, %v620_v14  ;;  %v624_v40 = vmul.f32 1.442695, %v623_v26 }
  0x7d   : > { %v627_v41 = vmul.f32 1.442695, %v626_v56  ;;  %v900_v46 = vadd.f32 %v899_v1, %v898_v42 }
  0x7e   : > { %1712 = vpow2.f32 %v618_v35  ;;  %v789_v35 = vsel %vm699_vm0, %v785_v44, 0.0 }
  0x7f   : > { %1714 = vpow2.f32 %v621_v12 }
  0x80   : > { %835 = vadd.xlane.f32.xlu0 %v834_v6  ;;  %1716 = vpow2.f32 %v624_v40 }
  0x81   : > { %1718 = vpow2.f32 %v627_v41 }
  0x82   : > { %v1711_v32 = vpop.eup %1710 }
  0x83   : > { %923 = vadd.xlane.f32.xlu1 %v922_v60  ;;  %v688_v43 = vmul.f32 %v1711_v32, %v2239_v62  ;;  %v689_v50 = vmul.f32 %v1711_v32, %v1705_v24  ;;  %v690_v8 = vmul.f32 %v1711_v32, %v1707_v3  ;;  %v691_v54 = vmul.f32 %v1711_v32, %v2257_v29 }
  0x84   : > { %v1713_v55 = vpop.eup %1712  ;;  %v788_v29 = vsel %vm699_vm0, %v784_v51, 0.0 }
  0x85   : > { %v1002_v57 = vmul.f32 %v688_v43, %v688_v43  ;;  %v1068_v22 = vmul.f32 %v689_v50, %v689_v50  ;;  %v1715_v28 = vpop.eup %1714  ;;  %v1134_v39 = vmul.f32 %v690_v8, %v690_v8  ;;  %v1200_v12 = vmul.f32 %v691_v54, %v691_v54 }
  0x86   : > { %v1717_v59 = vpop.eup %1716  ;;  %v629_v4 = vadd.f32 %v1715_v28, %v1713_v55 }
  0x87   : > { %v1004_v61 = vperm.slane %v1002_v57, 0  ;;  %v1005_v7 = vperm.slane %v1002_v57, 1  ;;  %v2269_v19 = vpop.eup %1718  ;;  %v1070_v62 = vperm.slane %v1068_v22, 0  ;;  %v1071_v13 = vperm.slane %v1068_v22, 1 }
  0x88   : > { %901 = vadd.xlane.f32.xlu0 %v900_v46  ;;  %v630_v47 = vadd.f32 %v1717_v59, %v629_v4  ;;  %v1136_v9 = vperm.slane %v1134_v39, 0  ;;  %v1137_v58 = vperm.slane %v1134_v39, 1  ;;  %v1202_v46 = vperm.slane %v1200_v12, 0 }
  0x89   : > { %v1008_v17 = vsel %vm699_vm0, %v1004_v61, 0.0  ;;  %v1009_v38 = vsel %vm699_vm0, %v1005_v7, 0.0  ;;  %v1074_v2 = vsel %vm699_vm0, %v1070_v62, 0.0  ;;  %v1075_v31 = vsel %vm699_vm0, %v1071_v13, 0.0 }
  0x8a   : > { %v1010_v33 = vadd.f32 %v1009_v38, %v1008_v17  ;;  %v631_v0 = vadd.f32 %v2269_v19, %v630_v47  ;;  %v1076_v18 = vadd.f32 %v1075_v31, %v1074_v2  ;;  %v1140_v15 = vsel %vm699_vm0, %v1136_v9, 0.0 }
  0x8b   : > { %v1141_v24 = vsel %vm699_vm0, %v1137_v58, 0.0  ;;  %v1206_v4 = vsel %vm699_vm0, %v1202_v46, 0.0 }
  0x8c   : > { %1011 = vadd.xlane.f32.xlu2 %v1010_v33  ;;  %1720 = vrcp.f32 %v631_v0  ;;  %v1142_v45 = vadd.f32 %v1141_v24, %v1140_v15 }
  0x92   : > { %v1721_v37 = vpop.eup %1720 }
  0x93   : > { %v633_v63 = vmul.f32 %v1721_v37, %v1713_v55  ;;  %v634_v36 = vmul.f32 %v1721_v37, %v1715_v28  ;;  %v635_v23 = vmul.f32 %v1721_v37, %v1717_v59  ;;  %v636_v22 = vmul.f32 %v1721_v37, %v2269_v19 }
  0x94   : > { %1077 = vadd.xlane.f32.xlu2 %v1076_v18 }
  0x95   : > { %v980_v3 = vmul.f32 %v633_v63, %v633_v63  ;;  %v958_v25 = vmul.f32 %v688_v43, %v633_v63  ;;  %v1046_v27 = vmul.f32 %v634_v36, %v634_v36  ;;  %v1024_v21 = vmul.f32 %v689_v50, %v634_v36 }
  0x96   : > { %v1112_v40 = vmul.f32 %v635_v23, %v635_v23  ;;  %v1090_v60 = vmul.f32 %v690_v8, %v635_v23  ;;  %v790_v43 = vadd.f32 %v789_v35, %v788_v29  ;;  %v1203_v50 = vperm.slane %v1200_v12, 1 }
  0x97   : > { %v982_v11 = vperm.slane %v980_v3, 0  ;;  %v983_v20 = vperm.slane %v980_v3, 1  ;;  %v960_v10 = vperm.slane %v958_v25, 0  ;;  %v961_v48 = vperm.slane %v958_v25, 1 }
  0x98   : > { %v1048_v6 = vperm.slane %v1046_v27, 0  ;;  %v1049_v30 = vperm.slane %v1046_v27, 1  ;;  %v1026_v49 = vperm.slane %v1024_v21, 0  ;;  %v1027_v5 = vperm.slane %v1024_v21, 1 }
  0x99   : > { %v986_v53 = vsel %vm699_vm0, %v982_v11, 0.0  ;;  %v987_v14 = vsel %vm699_vm0, %v983_v20, 0.0  ;;  %v964_v26 = vsel %vm699_vm0, %v960_v10, 0.0  ;;  %v965_v56 = vsel %vm699_vm0, %v961_v48, 0.0 }
  0x9a   : > { %v988_v34 = vadd.f32 %v987_v14, %v986_v53  ;;  %v966_v16 = vadd.f32 %v965_v56, %v964_v26  ;;  %v1052_v41 = vsel %vm699_vm0, %v1048_v6, 0.0  ;;  %v1053_v42 = vsel %vm699_vm0, %v1049_v30, 0.0 }
  0x9b   : > { %v1030_v1 = vsel %vm699_vm0, %v1026_v49, 0.0  ;;  %v1031_v32 = vsel %vm699_vm0, %v1027_v5, 0.0  ;;  %v1054_v55 = vadd.f32 %v1053_v42, %v1052_v41  ;;  %v1114_v28 = vperm.slane %v1112_v40, 0 }
  0x9c   : > { %1143 = vadd.xlane.f32.xlu2 %v1142_v45  ;;  %989 = vadd.xlane.f32.xlu1 %v988_v34  ;;  %v1032_v57 = vadd.f32 %v1031_v32, %v1030_v1  ;;  %v1115_v59 = vperm.slane %v1112_v40, 1  ;;  %v1092_v61 = vperm.slane %v1090_v60, 0  ;;  %v1093_v7 = vperm.slane %v1090_v60, 1 }
  0x9d   : > { %967 = vadd.xlane.f32.xlu0 %v966_v16  ;;  %v1207_v8 = vsel %vm699_vm0, %v1203_v50, 0.0  ;;  %v1178_v17 = vmul.f32 %v636_v22, %v636_v22  ;;  %v1156_v38 = vmul.f32 %v691_v54, %v636_v22  ;;  %v1118_v62 = vsel %vm699_vm0, %v1114_v28, 0.0 }
  0x9e   : > { %v1119_v13 = vsel %vm699_vm0, %v1115_v59, 0.0  ;;  %v1096_v19 = vsel %vm699_vm0, %v1092_v61, 0.0  ;;  %v1097_v33 = vsel %vm699_vm0, %v1093_v7, 0.0  ;;  %v1208_v47 = vadd.f32 %v1207_v8, %v1206_v4 }
  0x9f   : > { %v1120_v0 = vadd.f32 %v1119_v13, %v1118_v62  ;;  %v1098_v2 = vadd.f32 %v1097_v33, %v1096_v19  ;;  %v1180_v31 = vperm.slane %v1178_v17, 0  ;;  %v1181_v39 = vperm.slane %v1178_v17, 1 }
  0xa0   : > { %v1158_v18 = vperm.slane %v1156_v38, 0  ;;  %v1159_v9 = vperm.slane %v1156_v38, 1 }
  0xa1   : > { %v1184_v58 = vsel %vm699_vm0, %v1180_v31, 0.0  ;;  %v1185_v52 = vsel %vm699_vm0, %v1181_v39, 0.0 }
  0xa2   : > { %v1162_v37 = vsel %vm699_vm0, %v1158_v18, 0.0  ;;  %v1163_v63 = vsel %vm699_vm0, %v1159_v9, 0.0  ;;  %v1186_v15 = vadd.f32 %v1185_v52, %v1184_v58 }
  0xa3   : > { %v1164_v24 = vadd.f32 %v1163_v63, %v1162_v37 }
  0xa4   : > { %791 = vadd.xlane.f32.xlu2 %v790_v43  ;;  %1055 = vadd.xlane.f32.xlu1 %v1054_v55 }
  0xa5   : > { %1033 = vadd.xlane.f32.xlu0 %v1032_v57 }
  0xac   : > { %1209 = vadd.xlane.f32.xlu2 %v1208_v47  ;;  %1121 = vadd.xlane.f32.xlu1 %v1120_v0 }
  0xad   : > { %1099 = vadd.xlane.f32.xlu0 %v1098_v2 }
  0xb4   : > { %1187 = vadd.xlane.f32.xlu1 %v1186_v15 }
  0xb5   : > { %1165 = vadd.xlane.f32.xlu0 %v1164_v24 }
  0xde   : > { %v748_v36 = vpop.xlane.xlu1 %747  ;;  %v814_v51 = vpop.xlane.xlu2 %813 }
  0xdf   : > { %v749_v3 = vrot.slane %v748_v36, 4  ;;  %v815_v57 = vrot.slane %v814_v51, 4 }
  0xe1   : > { %v750_v44 = vadd.f32 %v749_v3, %v748_v36  ;;  %v816_v22 = vadd.f32 %v815_v57, %v814_v51 }
  0xe3   : > { %v704_v25 = vpop.xlane.xlu0 %703  ;;  %v751_v10 = vrot.slane %v750_v44, 2  ;;  %v817_v8 = vrot.slane %v816_v22, 2 }
  0xe4   : > { %v705_v27 = vrot.slane %v704_v25, 4 }
  0xe5   : > { %v752_v26 = vadd.f32 %v751_v10, %v750_v44  ;;  %v818_v18 = vadd.f32 %v817_v8, %v816_v22 }
  0xe6   : > { %v706_v21 = vadd.f32 %v705_v27, %v704_v25  ;;  %v770_v45 = vpop.xlane.xlu1 %769  ;;  %v880_v6 = vpop.xlane.xlu2 %879 }
  0xe7   : > { %v771_v23 = vrot.slane %v770_v45, 4  ;;  %v753_v29 = vrot.slane %v752_v26, 1  ;;  %v881_v28 = vrot.slane %v880_v6, 4  ;;  %v819_v27 = vrot.slane %v818_v18, 1 }
  0xe8   : > { %v707_v54 = vrot.slane %v706_v21, 2 }
  0xe9   : > { %v772_v11 = vadd.f32 %v771_v23, %v770_v45  ;;  %v754_v41 = vadd.f32 %v753_v29, %v752_v26  ;;  %v882_v17 = vadd.f32 %v881_v28, %v880_v6  ;;  %v820_v29 = vadd.f32 %v819_v27, %v818_v18 }
  0xea   : > { %v708_v20 = vadd.f32 %v707_v54, %v706_v21 }
  0xeb   : > { %v726_v48 = vpop.xlane.xlu0 %725  ;;  %v773_v30 = vrot.slane %v772_v11, 2  ;;  %v883_v2 = vrot.slane %v882_v17, 2 }
  0xec   : > { %v727_v49 = vrot.slane %v726_v48, 4  ;;  %v709_v5 = vrot.slane %v708_v20, 1 }
  0xed   : > { %v774_v34 = vadd.f32 %v773_v30, %v772_v11  ;;  %v2351_v45 = vadd.f32 %v883_v2, %v882_v17 }
  0xee   : > { %v728_v53 = vadd.f32 %v727_v49, %v726_v48  ;;  %v710_v14 = vadd.f32 %v709_v5, %v708_v20  ;;  %v946_v40 = vpop.xlane.xlu2 %945  ;;  %v858_v1 = vpop.xlane.xlu1 %857 }
  0xef   : > { %v775_v12 = vrot.slane %v774_v34, 1  ;;  %v859_v61 = vrot.slane %v858_v1, 4  ;;  %v947_v4 = vrot.slane %v946_v40, 4 }
  0xf0   : > { %v729_v56 = vrot.slane %v728_v53, 2  ;;  %1523 = vpush %v710_v14 }
  0xf1   : > { %v776_v42 = vadd.f32 %v775_v12, %v774_v34  ;;  %v860_v19 = vadd.f32 %v859_v61, %v858_v1  ;;  %v948_v0 = vadd.f32 %v947_v4, %v946_v40  ;;  %v885_v12 = vrot.slane %v2351_v45, 1 }
  0xf2   : > { %v730_v16 = vadd.f32 %v729_v56, %v728_v53 }
  0xf3   : > { %v836_v32 = vpop.xlane.xlu0 %835  ;;  %v861_v9 = vrot.slane %v860_v19, 2  ;;  %v949_v15 = vrot.slane %v948_v0, 2 }
  0xf4   : > { %v731_v35 = vrot.slane %v730_v16, 1  ;;  %v837_v59 = vrot.slane %v836_v32, 4 }
  0xf5   : > { %v862_v11 = vadd.f32 %v861_v9, %v860_v19  ;;  %v950_v53 = vadd.f32 %v949_v15, %v948_v0 }
  0xf6   : > { %v732_v60 = vadd.f32 %v731_v35, %v730_v16  ;;  %v924_v46 = vpop.xlane.xlu1 %923  ;;  %v838_v38 = vadd.f32 %v837_v59, %v836_v32 }
  0xf7   : > { %v925_v33 = vrot.slane %v924_v46, 4  ;;  %v863_v35 = vrot.slane %v862_v11, 1 }
  0xf8   : > { %1525 = vpush %v732_v60  ;;  %v839_v31 = vrot.slane %v838_v38, 2 }
  0xf9   : > { %1527 = vpush %v754_v41  ;;  %v926_v58 = vadd.f32 %v925_v33, %v924_v46 }
  0xfa   : > { %1529 = vpush %v776_v42  ;;  %v840_v21 = vadd.f32 %v839_v31, %v838_v38  ;;  %v864_v31 = vadd.f32 %v863_v35, %v862_v11 }
  0xfb   : > { %v902_v50 = vpop.xlane.xlu0 %901  ;;  %v927_v20 = vrot.slane %v926_v58, 2 }
  0xfc   : > { %v903_v47 = vrot.slane %v902_v50, 4  ;;  %v841_v34 = vrot.slane %v840_v21, 1 }
  0xfd   : > { %v928_v1 = vadd.f32 %v927_v20, %v926_v58 }
  0xfe   : > { %v904_v52 = vadd.f32 %v903_v47, %v902_v50  ;;  %v951_v50 = vrot.slane %v950_v53, 1  ;;  %v842_v61 = vadd.f32 %v841_v34, %v840_v21 }
  0xff   : > { %v1012_v43 = vpop.xlane.xlu2 %1011 }
 0x100   : > { %v1013_v24 = vrot.slane %v1012_v43, 4  ;;  %v905_v10 = vrot.slane %v904_v52, 2 }
 0x102   : > { %v1014_v30 = vadd.f32 %v1013_v24, %v1012_v43  ;;  %v906_v42 = vadd.f32 %v905_v10, %v904_v52  ;;  %v952_v24 = vadd.f32 %v951_v50, %v950_v53 }
 0x104   : > { %v1015_v32 = vrot.slane %v1014_v30, 2 }
 0x106   : > { %v1016_v2 = vadd.f32 %v1015_v32, %v1014_v30 }
 0x107   : > { %v1078_v55 = vpop.xlane.xlu2 %1077 }
 0x108   : > { %v1079_v48 = vrot.slane %v1078_v55, 4 }
 0x10a   : > { %v1080_v40 = vadd.f32 %v1079_v48, %v1078_v55 }
 0x10f   : > { %v1144_v7 = vpop.xlane.xlu2 %1143  ;;  %v990_v62 = vpop.xlane.xlu1 %989 }
 0x110   : > { %v968_v13 = vpop.xlane.xlu0 %967  ;;  %v991_v37 = vrot.slane %v990_v62, 4  ;;  %v1145_v49 = vrot.slane %v1144_v7, 4 }
 0x111   : > { %v969_v39 = vrot.slane %v968_v13, 4 }
 0x112   : > { %v992_v6 = vadd.f32 %v991_v37, %v990_v62  ;;  %v1146_v43 = vadd.f32 %v1145_v49, %v1144_v7  ;;  %v1081_v7 = vrot.slane %v1080_v40, 2  ;;  %v907_v62 = vrot.slane %v906_v42, 1 }
 0x113   : > { %v970_v51 = vadd.f32 %v969_v39, %v968_v13  ;;  %v929_v13 = vrot.slane %v928_v1, 1 }
 0x114   : > { %v993_v60 = vrot.slane %v992_v6, 2  ;;  %v1147_v33 = vrot.slane %v1146_v43, 2  ;;  %v908_v15 = vadd.f32 %v907_v62, %v906_v42 }
 0x115   : > { %v971_v14 = vrot.slane %v970_v51, 2 }
 0x116   : > { %v994_v19 = vadd.f32 %v993_v60, %v992_v6  ;;  %v1148_v21 = vadd.f32 %v1147_v33, %v1146_v43 }
 0x117   : > { %v792_v63 = vpop.xlane.xlu2 %791  ;;  %v1056_v3 = vpop.xlane.xlu1 %1055  ;;  %v972_v4 = vadd.f32 %v971_v14, %v970_v51  ;;  %v1082_v51 = vadd.f32 %v1081_v7, %v1080_v40 }
 0x118   : > { %v793_v36 = vrot.slane %v792_v63, 4  ;;  %v1034_v25 = vpop.xlane.xlu0 %1033  ;;  %v1057_v44 = vrot.slane %v1056_v3, 4 }
 0x119   : > { %v1035_v23 = vrot.slane %v1034_v25, 4  ;;  %v973_v39 = vrot.slane %v972_v4, 1 }
 0x11a   : > { %v794_v54 = vadd.f32 %v793_v36, %v792_v63  ;;  %v1058_v26 = vadd.f32 %v1057_v44, %v1056_v3  ;;  %v886_v63 = vadd.f32 %v885_v12, %v2351_v45  ;;  %v995_v36 = vrot.slane %v994_v19, 1 }
 0x11b   : > { %v1036_v56 = vadd.f32 %v1035_v23, %v1034_v25  ;;  %v930_v3 = vadd.f32 %v929_v13, %v928_v1  ;;  %v1017_v25 = vrot.slane %v1016_v2, 1 }
 0x11c   : > { %v795_v5 = vrot.slane %v794_v54, 2  ;;  %v1059_v57 = vrot.slane %v1058_v26, 2  ;;  %v996_v49 = vadd.f32 %v995_v36, %v994_v19 }
 0x11d   : > { %v1037_v22 = vrot.slane %v1036_v56, 2 }
 0x11e   : > { %v796_v16 = vadd.f32 %v795_v5, %v794_v54  ;;  %v1060_v9 = vadd.f32 %v1059_v57, %v1058_v26  ;;  %v974_v54 = vadd.f32 %v973_v39, %v972_v4  ;;  %v1083_v5 = vrot.slane %v1082_v51, 1 }
 0x11f   : > { %v1210_v41 = vpop.xlane.xlu2 %1209  ;;  %v1122_v28 = vpop.xlane.xlu1 %1121  ;;  %v1038_v18 = vadd.f32 %v1037_v22, %v1036_v56  ;;  %v1018_v26 = vadd.f32 %v1017_v25, %v1016_v2 }
 0x120   : > { %v797_v46 = vrot.slane %v796_v16, 1  ;;  %v1100_v59 = vpop.xlane.xlu0 %1099  ;;  %v1123_v55 = vrot.slane %v1122_v28, 4  ;;  %v1211_v17 = vrot.slane %v1210_v41, 4  ;;  %v1061_v11 = vrot.slane %v1060_v9, 1 }
 0x121   : > { %s1524_s28 = spop %1523  ;;  %v1101_v8 = vrot.slane %v1100_v59, 4  ;;  %v1039_v45 = vrot.slane %v1038_v18, 1 }
 0x122   : > { %s712_s30 = sadd.f32 %s1524_s28, %s2353_s26  ;;  %v798_v38 = vadd.f32 %v797_v46, %v796_v16  ;;  %v1124_v47 = vadd.f32 %v1123_v55, %v1122_v28  ;;  %v1212_v37 = vadd.f32 %v1211_v17, %v1210_v41  ;;  %v1062_v34 = vadd.f32 %v1061_v11, %v1060_v9 }
 0x123   : > { %v1102_v0 = vadd.f32 %v1101_v8, %v1100_v59  ;;  %v1040_v56 = vadd.f32 %v1039_v45, %v1038_v18  ;;  %v1084_v41 = vadd.f32 %v1083_v5, %v1082_v51  ;;  %s2384_s26 = sld [smem:[#allocation2 + $0xc]] }
 0x124   : > { %714 = sst [smem:[#allocation2]] %s712_s30  ;;  %1531 = vpush %v798_v38  ;;  %v1125_v58 = vrot.slane %v1124_v47, 2  ;;  %v1213_v10 = vrot.slane %v1212_v37, 2 }
 0x125   : > { %1607 = sst [smem:[#allocation9]] (%p1221_p9), %s712_s30  ;;  %1533 = vpush %v820_v29  ;;  %v1103_v52 = vrot.slane %v1102_v0, 2  ;;  %v1149_v29 = vrot.slane %v1148_v21, 1 }
 0x126   : > { %1535 = vpush %v842_v61  ;;  %v1126_v20 = vadd.f32 %v1125_v58, %v1124_v47  ;;  %v1214_v35 = vadd.f32 %v1213_v10, %v1212_v37  ;;  %s2386_s28 = sld [smem:[#allocation2 + $0x10]] }
 0x127   : > { %1537 = vpush %v864_v31  ;;  %v1104_v27 = vadd.f32 %v1103_v52, %v1102_v0  ;;  %v1188_v44 = vpop.xlane.xlu1 %1187  ;;  %v1150_v43 = vadd.f32 %v1149_v29, %v1148_v21  ;;  %s2390_s30 = sld [smem:[#allocation2 + $0xd]] }
 0x128   : > { %1539 = vpush %v886_v63  ;;  %v1166_v23 = vpop.xlane.xlu0 %1165  ;;  %v1189_v48 = vrot.slane %v1188_v44, 4  ;;  %v1127_v16 = vrot.slane %v1126_v20, 1  ;;  %v1215_v57 = vrot.slane %v1214_v35, 1 }
 0x129   : > { %s1526_s8 = spop %1525  ;;  %1541 = vpush %v908_v15  ;;  %v1167_v6 = vrot.slane %v1166_v23, 4  ;;  %v1105_v30 = vrot.slane %v1104_v27, 1 }
 0x12a   : > { %s734_s9 = sadd.f32 %s1526_s8, %s2357_s29  ;;  %s1528_s10 = spop %1527  ;;  %1543 = vpush %v930_v3  ;;  %v1190_v53 = vadd.f32 %v1189_v48, %v1188_v44  ;;  %v1128_v32 = vadd.f32 %v1127_v16, %v1126_v20  ;;  %v1216_v59 = vadd.f32 %v1215_v57, %v1214_v35 }
 0x12b   : > { %s756_s11 = sadd.f32 %s1528_s10, %s2360_s6  ;;  %1545 = vpush %v952_v24  ;;  %v1168_v14 = vadd.f32 %v1167_v6, %v1166_v23  ;;  %s1530_s12 = spop %1529  ;;  %v1106_v60 = vadd.f32 %v1105_v30, %v1104_v27 }
 0x12c   : > { %736 = sst [smem:[#allocation2 + $0x4]] %s734_s9  ;;  %1547 = vpush %v974_v54  ;;  %v1191_v12 = vrot.slane %v1190_v53, 2 }
 0x12d   : > { %1611 = sst [smem:[#allocation9 + $0x4]] (%p1221_p9), %s734_s9  ;;  %1549 = vpush %v996_v49  ;;  %v1169_v40 = vrot.slane %v1168_v14, 2 }
 0x12e   : > { %758 = sst [smem:[#allocation2 + $0x8]] %s756_s11  ;;  %1551 = vpush %v1018_v26  ;;  %v1192_v42 = vadd.f32 %v1191_v12, %v1190_v53 }
 0x12f   : > { %1615 = sst [smem:[#allocation9 + $0x8]] (%p1221_p9), %s756_s11  ;;  %1553 = vpush %v1040_v56  ;;  %v1170_v1 = vadd.f32 %v1169_v40, %v1168_v14 }
 0x130   : > { %s778_s13 = sadd.f32 %s1530_s12, %s2365_s7  ;;  %1555 = vpush %v1062_v34  ;;  %v1193_v50 = vrot.slane %v1192_v42, 1 }
 0x131   : > { %1557 = vpush %v1084_v41  ;;  %v1171_v46 = vrot.slane %v1170_v1, 1  ;;  %s2388_s29 = sld [smem:[#allocation2 + $0x14]] }
 0x132   : > { %780 = sst [smem:[#allocation2 + $0x1]] %s778_s13  ;;  %1559 = vpush %v1106_v60  ;;  %v1194_v28 = vadd.f32 %v1193_v50, %v1192_v42 }
 0x133   : > { %1608 = sst [smem:[#allocation9 + $0x1]] (%p1221_p9), %s778_s13  ;;  %1561 = vpush %v1128_v32  ;;  %v1172_v22 = vadd.f32 %v1171_v46, %v1170_v1 }
 0x134   : > { %1563 = vpush %v1150_v43  ;;  %s2392_s6 = sld [smem:[#allocation2 + $0x11]] }
 0x135   : > { %1565 = vpush %v1172_v22  ;;  %s2394_s7 = sld [smem:[#allocation2 + $0x15]] }
 0x136   : > { %1567 = vpush %v1194_v28  ;;  %s2396_s8 = sld [smem:[#allocation2 + $0xe]] }
 0x137   : > { %1569 = vpush %v1216_v59  ;;  %s2398_s9 = sld [smem:[#allocation2 + $0x12]] }
 0x138   : > { %s2400_s10 = sld [smem:[#allocation2 + $0x16]] }
 0x139   : > { %s2402_s11 = sld [smem:[#allocation2 + $0xf]] }
 0x13a   : > { %s2404_s12 = sld [smem:[#allocation2 + $0x13]] }
 0x155   : > { %s1532_s13 = spop %1531 }
 0x156   : > { %s800_s0 = sadd.f32 %s1532_s13, %s1471_s14  ;;  %s1534_s1 = spop %1533 }
 0x157   : > { %s822_s2 = sadd.f32 %s1534_s1, %s1472_s15  ;;  %s1536_s3 = spop %1535 }
 0x158   : > { %802 = sst [smem:[#allocation2 + $0x5]] %s800_s0  ;;  %s1538_s4 = spop %1537 }
 0x159   : > { %1612 = sst [smem:[#allocation9 + $0x5]] (%p1221_p9), %s800_s0  ;;  %s1540_s14 = spop %1539 }
 0x15a   : > { %824 = sst [smem:[#allocation2 + $0x9]] %s822_s2  ;;  %s1542_s1 = spop %1541 }
 0x15b   : > { %1616 = sst [smem:[#allocation9 + $0x9]] (%p1221_p9), %s822_s2  ;;  %s1544_s2 = spop %1543 }
 0x15c   : > { %s844_s27 = sadd.f32 %s1536_s3, %s1473_s16  ;;  %s1546_s3 = spop %1545 }
 0x15d   : > { %s866_s19 = sadd.f32 %s1538_s4, %s1474_s17 }
 0x15e   : > { %846 = sst [smem:[#allocation2 + $0x2]] %s844_s27 }
 0x15f   : > { %1609 = sst [smem:[#allocation9 + $0x2]] (%p1221_p9), %s844_s27 }
 0x160   : > { %868 = sst [smem:[#allocation2 + $0x6]] %s866_s19 }
 0x161   : > { %1613 = sst [smem:[#allocation9 + $0x6]] (%p1221_p9), %s866_s19  ;;  %s1548_s19 = spop %1547 }
 0x162   : > { %s888_s0 = sadd.f32 %s1540_s14, %s2376_s21  ;;  %s1550_s16 = spop %1549 }
 0x163   : > { %s910_s15 = sadd.f32 %s1542_s1, %s2378_s22  ;;  %s1552_s22 = spop %1551 }
 0x164   : > { %890 = sst [smem:[#allocation2 + $0xa]] %s888_s0 }
 0x165   : > { %1617 = sst [smem:[#allocation9 + $0xa]] (%p1221_p9), %s888_s0 }
 0x166   : > { %912 = sst [smem:[#allocation2 + $0x3]] %s910_s15 }
 0x167   : > { %1610 = sst [smem:[#allocation9 + $0x3]] (%p1221_p9), %s910_s15 }
 0x168   : > { %s932_s4 = sadd.f32 %s1544_s2, %s2380_s23  ;;  %s1554_s23 = spop %1553 }
 0x169   : > { %s954_s27 = sadd.f32 %s1546_s3, %s2382_s25  ;;  %s1556_s14 = spop %1555 }
 0x16a   : > { %934 = sst [smem:[#allocation2 + $0x7]] %s932_s4 }
 0x16b   : > { %1614 = sst [smem:[#allocation9 + $0x7]] (%p1221_p9), %s932_s4 }
 0x16c   : > { %956 = sst [smem:[#allocation2 + $0xb]] %s954_s27 }
 0x16d   : > { %1618 = sst [smem:[#allocation9 + $0xb]] (%p1221_p9), %s954_s27 }
 0x16e   : > { %s976_s17 = sadd.f32 %s1548_s19, %s2384_s26  ;;  %s1558_s26 = spop %1557 }
 0x16f   : > { %s998_s21 = sadd.f32 %s1550_s16, %s2386_s28  ;;  %s1560_s0 = spop %1559 }
 0x170   : > { %978 = sst [smem:[#allocation2 + $0xc]] %s976_s17  ;;  %s1304_s19 = sshll.u32 %s2483_s5, 4  ;;  %s1305_s19 = int_to_ptr.vmem [resolvable:$true] %s1304_s19 }
 0x171   : > { %1619 = sst [smem:[#allocation9 + $0xc]] (%p1221_p9), %s976_s17 }
 0x172   : > { %1000 = sst [smem:[#allocation2 + $0x10]] %s998_s21 }
 0x173   : > { %1623 = sst [smem:[#allocation9 + $0x10]] (%p1221_p9), %s998_s21  ;;  %s2500_s21 = sadd.s32 4294967295, %s1815_s20  }
 0x174   : > { %s1020_s25 = sadd.f32 %s1552_s22, %s2388_s29  ;;  %s1562_s29 = spop %1561 }
 0x175   : > { %s1042_s13 = sadd.f32 %s1554_s23, %s2390_s30  ;;  %p1651_p10 = scmp.eq.s32.totalorder %s2500_s21, 1 }
 0x176   : > { %1022 = sst [smem:[#allocation2 + $0x14]] %s1020_s25 }
 0x177   : > { %1627 = sst [smem:[#allocation9 + $0x14]] (%p1221_p9), %s1020_s25 }
 0x178   : > { %1044 = sst [smem:[#allocation2 + $0xd]] %s1042_s13 }
 0x179   : > { %1620 = sst [smem:[#allocation9 + $0xd]] (%p1221_p9), %s1042_s13 }
 0x17a   : > { %s1064_s28 = sadd.f32 %s1556_s14, %s2392_s6  ;;  %s1564_s6 = spop %1563 }
 0x17b   : > { %s1086_s1 = sadd.f32 %s1558_s26, %s2394_s7  ;;  %s1566_s7 = spop %1565 }
 0x17c   : > { %1066 = sst [smem:[#allocation2 + $0x11]] %s1064_s28  ;;  %s1568_s4 = spop %1567 }
 0x17d   : > { %1624 = sst [smem:[#allocation9 + $0x11]] (%p1221_p9), %s1064_s28 }
 0x17e   : > { %1088 = sst [smem:[#allocation2 + $0x15]] %s1086_s1 }
 0x17f   : > { %1628 = sst [smem:[#allocation9 + $0x15]] (%p1221_p9), %s1086_s1 }
 0x180   : > { %s1108_s30 = sadd.f32 %s1560_s0, %s2396_s8  ;;  %s1570_s8 = spop %1569 }
 0x181   : > { %s1130_s15 = sadd.f32 %s1562_s29, %s2398_s9 }
 0x182   : > { %1110 = sst [smem:[#allocation2 + $0xe]] %s1108_s30 }
 0x183   : > { %1621 = sst [smem:[#allocation9 + $0xe]] (%p1221_p9), %s1108_s30 }
 0x184   : > { %1132 = sst [smem:[#allocation2 + $0x12]] %s1130_s15 }
 0x185   : > { %1625 = sst [smem:[#allocation9 + $0x12]] (%p1221_p9), %s1130_s15 }
 0x186   : > { %s1152_s2 = sadd.f32 %s1564_s6, %s2400_s10  ;;  %s1821_s10 = smov [#allocation9]  }
 0x187   : > { %s1174_s3 = sadd.f32 %s1566_s7, %s2402_s11 }
 0x188   : > { %1154 = sst [smem:[#allocation2 + $0x16]] %s1152_s2 }
 0x189   : > { %1629 = sst [smem:[#allocation9 + $0x16]] (%p1221_p9), %s1152_s2 }
 0x18a   : > { %1176 = sst [smem:[#allocation2 + $0xf]] %s1174_s3 }
 0x18b   : > { %1622 = sst [smem:[#allocation9 + $0xf]] (%p1221_p9), %s1174_s3 }
 0x18c   : > { %s1196_s16 = sadd.f32 %s1568_s4, %s2404_s12 }
 0x18d   : > { %s1218_s17 = sadd.f32 %s1570_s8, %s2406_s24 }
 0x18e   : > { %1198 = sst [smem:[#allocation2 + $0x13]] %s1196_s16 }
 0x18f   : > { %1626 = sst [smem:[#allocation9 + $0x13]] (%p1221_p9), %s1196_s16 }
 0x190   : > { %1220 = sst [smem:[#allocation2 + $0x17]] %s1218_s17 }
 0x191   : > { %1630 = sst [smem:[#allocation9 + $0x17]] (%p1221_p9), %s1218_s17 }
 0x192   : > { %1632 = dma.smem_to_vmem (%p1651_p10), %s1821_s10, 16, %s1305_s19, [#allocation5]  }
 0x193   : > { %1802 = dma.done.wait (%p1651_p10), [#allocation5], 16  }
 0x194   : > { %1804 = vsyncadd (%p1651_p10), [#allocation5], 4294967280 }
 0x195   : > { %1313 = sfence }
 0x196 PF: > { %s18_s20 = sadd.s32 1, %s1815_s20   ;;  %s2501_s18 = sld [smem:[#allocation13_spill]] }
 0x197   : > { %p15_p11 = scmp.ge.s32.totalorder %s18_s20, 4   ;;  %s2502_s19 = sld [smem:[#allocation14_spill]] }
 0x199   :  { %17 = sbr.rel (!%p15_p11) target bundleno = 10 (0xa), region = 169 }
 0x19e   :  { %1319 = vsyncpa [#allocation4], 1 }
 0x19f   :  { %1321 = vsyncpa [#allocation4 + $0x1], 1 }
 0x1a0   :  { %1322 = vsyncpa [#allocation7], 1 }
 0x1a1   :  { %1323 = vsyncpa [#allocation5], 1 }
 0x1a2   :  { %1325 = vsyncpa [#allocation5 + $0x1], 1 }

</bundles_post_ra>
